<compile_context>
chip_gen: v6e
topology: v6e:2x2x1
jax: 0.10.0
libtpu: 0.0.40
codegen_flags: <defaults>
</compile_context>

<pallas_src>
import math
import functools
import numpy as np
import jax
import jax.numpy as jnp
from jax.experimental import pallas as pl
from jax.experimental.pallas import tpu as pltpu

LANE = 128   # lane width: every feature axis zero-padded to a multiple of this
SUB = 8      # sublane granularity: sequence rows padded to a multiple of this


def _round_up(x, m):
    return ((x + m - 1) // m) * m


def _pad2(a, rows, cols):
    return jnp.pad(a, ((0, rows - a.shape[0]), (0, cols - a.shape[1])))


# ----------------------------------------------------------------------------
# Fused kernel: full HMMEncoder forward for Bt batch elements per grid step.
# ----------------------------------------------------------------------------
def _fused_kernel(cfg, xin_ref, asm_ref, add_ref, uwbd_ref,
                  wqkv_ref, bqkv_ref, wo_ref, bo_ref,
                  g1_ref, b1_ref, w1_ref, bf1_ref, w2_ref, bf2_ref, g2_ref, b2_ref,
                  qmask_ref, kbias_ref, gates_ref, mem_ref):
    Bt, SP, nhead, E, plan = cfg
    EP = mem_ref.shape[-1]
    inv_E = 1.0 / float(E)
    bf16 = jnp.bfloat16

    # ---- stage 1: block-diagonal unify + assembly (global token = mean) -----
    # y[(b,t), :] = x_{b,t} @ W_{modal(t)}   (input rows are zero outside their
    # modality's 128-lane feature block; uwbd is the matching block-diagonal W)
    y = jnp.dot(xin_ref[...].astype(bf16), uwbd_ref[...],
                preferred_element_type=jnp.float32)            # (Bt*TtotP, EP)
    # asm places each frame row and writes the prepended global token as the
    # 1/T_j average of its modality's frames.  add = per-row unify bias +
    # temporal/modal embedding (precomputed, batch-invariant).  Kept in f32 so
    # the 1/T_j averaging weights are exact.
    ori = jnp.dot(asm_ref[...], y,
                  preferred_element_type=jnp.float32) + add_ref[...]  # (Bt*SP, EP)

    # hoisted constants (review: no per-layer mask rebuilds)
    qmask = qmask_ref[...]        # (nhead*SP, EP) block-diagonal head mask
    kbias = kbias_ref[...]        # (1, SP): 0 for real keys, -1e30 for padded rows
    g1 = g1_ref[...]; b1 = b1_ref[...]; g2 = g2_ref[...]; b2 = b2_ref[...]
    bqkv = bqkv_ref[...]; bo = bo_ref[...]; bf1 = bf1_ref[...]; bf2 = bf2_ref[...]

    def layer_norm(x, g, b):
        # padded lanes are exactly 0; sums over the padded width == sums over E
        mu = jnp.sum(x, axis=-1, keepdims=True) * inv_E
        var = jnp.sum(x * x, axis=-1, keepdims=True) * inv_E - mu * mu
        return (x - mu) * jax.lax.rsqrt(var + 1e-5) * g + b

    def gelu(x):
        # TODO(synk): PyTorch F.gelu is erf-exact; tanh approximation used here
        # (erf lowering in Mosaic is not guaranteed; ~1e-3 relative difference).
        return 0.5 * x * (1.0 + jnp.tanh(0.7978845608028654 *
                                         (x + 0.044715 * x * x * x)))

    def self_attention(x):
        # one stacked lane-dense projection producing [Q | K | V]; 1/sqrt(Dh)
        # already folded into the Q weight/bias.
        qkv = jnp.dot(x.astype(bf16), wqkv_ref[...],
                      preferred_element_type=jnp.float32) + bqkv   # (Bt*SP, 3*EP)
        outs = []
        for b in range(Bt):                       # score blocks stay per-element
            blk = qkv[b * SP:(b + 1) * SP, :]     # 8-aligned sublane slice
            qb = blk[:, :EP]
            kb = blk[:, EP:2 * EP]
            vb = blk[:, 2 * EP:]
            # block-diagonal Q: row-block h keeps only head h's Dh columns, so
            # ONE matmul yields all heads' (SP, SP) score blocks stacked on rows.
            qbd = jnp.concatenate([qb] * nhead, axis=0) * qmask    # (nhead*SP, EP)
            s = jax.lax.dot_general(qbd, kb, (((1,), (1,)), ((), ())),
                                    preferred_element_type=jnp.float32)
            s = s + kbias                          # mask padded key rows
            s = s - jnp.max(s, axis=-1, keepdims=True)
            p = jnp.exp(s)
            p = p * pl.reciprocal(jnp.sum(p, axis=-1, keepdims=True), approx=True)
            # one P@V matmul for all heads; keep only each head's own Dh columns
            pv = jnp.dot(p, vb, preferred_element_type=jnp.float32) * qmask
            ob = pv[0:SP, :]
            for h in range(1, nhead):              # assembles concat_h(o_h)
                ob = ob + pv[h * SP:(h + 1) * SP, :]
            outs.append(ob)
        o_all = outs[0] if Bt == 1 else jnp.concatenate(outs, axis=0)
        # head merge already laid out at columns h*Dh -> single output projection
        return jnp.dot(o_all.astype(bf16), wo_ref[...],
                       preferred_element_type=jnp.float32) + bo

    def encoder_layer(x):
        y1 = layer_norm(x + self_attention(x), g1, b1)
        h = gelu(jnp.dot(y1.astype(bf16), w1_ref[...],
                         preferred_element_type=jnp.float32) + bf1)
        h = jnp.dot(h.astype(bf16), w2_ref[...],
                    preferred_element_type=jnp.float32) + bf2
        return layer_norm(y1 + h, g2, b2)

    # ---- stage 2: stacked layers with static per-modal layer-skip gating ----
    cur = ori
    for kind, idx in plan:                        # static per-layer plan
        if kind == 0:                             # all modalities use ori
            x_in = ori
        elif kind == 1:                           # all modalities use last output
            x_in = cur
        else:                                     # mixed: precomputed 0/1 row mask
            m = gates_ref[idx]                    # (Bt*SP, 1)
            x_in = ori + m * (cur - ori)
        cur = encoder_layer(x_in)

    # ---- stage 3: lane-dense output store ----
    mem_ref[...] = cur


# ----------------------------------------------------------------------------
# HMMEncoder forward wrapper (one pallas_call; tiny one-time prep in XLA/host)
# ----------------------------------------------------------------------------
def hmm_encoder_forward(srcs, params, src_padding_masks=None, batch_tile=8):
    # batch_tile: ~8 for v5e (128-wide MXU), 16 for v6e/v7x (256-wide MXU).
    assert src_padding_masks is None  # TODO(synk): key-padding-mask path not implemented.

    num_modal = len(srcs)
    B = int(srcs[0].shape[0])
    E = params['unify_w'][0].shape[1]              # d_model
    nhead = params['nhead']
    assert E % nhead == 0
    Dh = E // nhead
    dff = params['layer']['w1'].shape[1]

    EP = _round_up(E, LANE)
    FP = _round_up(dff, LANE)
    DP = _round_up(max(w.shape[0] for w in params['unify_w']), LANE)
    MD = num_modal * DP

    T = [int(s.shape[1]) for s in srcs]
    seq_lens = [t + 1 for t in T]                  # +1 = prepended global token
    offs = [int(v) for v in np.cumsum([0] + seq_lens)]
    toffs = [int(v) for v in np.cumsum([0] + T)]
    S, Ttot = offs[-1], toffs[-1]
    SP = _round_up(S, SUB)                         # sublane-aligned sequence
    TtotP = _round_up(Ttot, SUB)

    # ---- batch tiling: Bt elements per grid step (review: fill the MXU M dim) ----
    Bt = B if B <= batch_tile else batch_tile
    Bpad = _round_up(B, Bt)
    grid = Bpad // Bt

    # ---- pack all modalities into one block-diagonal-feature input tensor ----
    parts = []
    for j, s in enumerate(srcs):
        d = s.shape[2]
        parts.append(jnp.pad(s, ((0, Bpad - B), (0, 0),
                                 (j * DP, MD - j * DP - d))))
    xcat = jnp.concatenate(parts, axis=1)                       # (Bpad, Ttot, MD)
    if TtotP > Ttot:
        xcat = jnp.pad(xcat, ((0, 0), (0, TtotP - Ttot), (0, 0)))
    xin = xcat.reshape(Bpad * TtotP, MD)

    # ---- assembly matrix: frame copy + 1/T_j averaging for the global token ----
    asm = np.zeros((Bt * SP, Bt * TtotP), np.float32)
    for b in range(Bt):
        for j in range(num_modal):
            r0 = b * SP + offs[j]
            c0 = b * TtotP + toffs[j]
            tj = T[j]
            asm[r0, c0:c0 + tj] = 1.0 / tj                       # AdaptiveAvgPool1d(1)
            asm[r0 + 1:r0 + 1 + tj, c0:c0 + tj] = np.eye(tj, dtype=np.float32)
    asm = jnp.asarray(asm)

    # ---- temporal + modal embedding (batch-invariant) + per-row unify bias ----
    D = T[0]
    temp_idx = []
    for L in seq_lens:
        t = L - 1
        idx = np.concatenate([np.zeros([1]), np.linspace(1, D, t).astype(np.int32)])
        temp_idx.append(idx.astype(np.int32))
    temp_idx = np.concatenate(temp_idx)
    emb = params['temp_table'][jnp.asarray(temp_idx)]            # (S, E)
    if num_modal > 1:
        modal_labels = []
        for j, L in enumerate(seq_lens):
            modal_labels += [j + num_modal] + (L - 1) * [j]
        emb = emb + params['modal_table'][jnp.asarray(np.asarray(modal_labels, np.int32))]
    modal_of_row = np.zeros(S, np.int32)
    for j in range(num_modal):
        modal_of_row[offs[j]:offs[j + 1]] = j
    row_bias = jnp.concatenate(params['unify_b'], axis=0)[jnp.asarray(modal_of_row)]
    add_rows = jnp.tile(_pad2(emb + row_bias, SP, EP), (Bt, 1))  # (Bt*SP, EP)

    # ---- weights: zero-pad to 128 lanes, fold 1/sqrt(Dh) into Q, cast to bf16 ----
    lp = params['layer']
    scale = 1.0 / math.sqrt(Dh)
    wq, wk, wv = lp['wqkv'][:, :E], lp['wqkv'][:, E:2 * E], lp['wqkv'][:, 2 * E:]
    bq, bk, bv = lp['bqkv'][:, :E], lp['bqkv'][:, E:2 * E], lp['bqkv'][:, 2 * E:]
    wqkv = jnp.concatenate([_pad2(wq * scale, EP, EP), _pad2(wk, EP, EP),
                            _pad2(wv, EP, EP)], axis=1).astype(jnp.bfloat16)
    bqkv = jnp.concatenate([_pad2(bq * scale, 1, EP), _pad2(bk, 1, EP),
                            _pad2(bv, 1, EP)], axis=1)
    wo, bo = _pad2(lp['wo'], EP, EP).astype(jnp.bfloat16), _pad2(lp['bo'], 1, EP)
    g1, b1 = _pad2(lp['g1'], 1, EP), _pad2(lp['b1'], 1, EP)      # padded gamma/beta = 0
    w1, bf1 = _pad2(lp['w1'], EP, FP).astype(jnp.bfloat16), _pad2(lp['bf1'], 1, FP)
    w2, bf2 = _pad2(lp['w2'], FP, EP).astype(jnp.bfloat16), _pad2(lp['bf2'], 1, EP)
    g2, b2 = _pad2(lp['g2'], 1, EP), _pad2(lp['b2'], 1, EP)
    uwbd = jnp.concatenate([_pad2(w, DP, EP) for w in params['unify_w']],
                           axis=0).astype(jnp.bfloat16)          # (MD, EP)

    # ---- static masks: block-diagonal head mask + padded-key bias ----
    qm = np.zeros((nhead * SP, EP), np.float32)
    for h in range(nhead):
        qm[h * SP:(h + 1) * SP, h * Dh:(h + 1) * Dh] = 1.0
    qmask = jnp.asarray(qm)
    kb = np.zeros((1, SP), np.float32)
    kb[0, S:] = -1e30
    kbias = jnp.asarray(kb)

    # ---- static layer plan + hoisted gating masks (one per distinct pattern) ----
    num_encoder_layers = params['num_encoder_layers']
    max_L = max(num_encoder_layers)
    target_layer = [max_L - n for n in num_encoder_layers]
    plan, mixed_patterns = [], []
    for i in range(max_L):
        use_cur = tuple(tl < i for tl in target_layer)
        if not any(use_cur):
            plan.append((0, 0))
        elif all(use_cur):
            plan.append((1, 0))
        else:
            if use_cur not in mixed_patterns:
                mixed_patterns.append(use_cur)
            plan.append((2, mixed_patterns.index(use_cur)))
    n_mix = max(len(mixed_patterns), 1)
    gm = np.zeros((n_mix, Bt * SP, 1), np.float32)
    for k, pat in enumerate(mixed_patterns):
        for b in range(Bt):
            for j in range(num_modal):
                if pat[j]:
                    gm[k, b * SP + offs[j]:b * SP + offs[j + 1], 0] = 1.0
    gates = jnp.asarray(gm)

    cfg = (Bt, SP, nhead, E, tuple(plan))
    operands = (xin, asm, add_rows, uwbd, wqkv, bqkv, wo, bo,
                g1, b1, w1, bf1, w2, bf2, g2, b2, qmask, kbias, gates)

    def const_spec(a):
        nd = a.ndim
        return pl.BlockSpec(a.shape, lambda b, _nd=nd: (0,) * _nd)

    in_specs = [pl.BlockSpec((Bt * TtotP, MD), lambda b: (b, 0))] \
             + [const_spec(a) for a in operands[1:]]

    mem_flat = pl.pallas_call(
        functools.partial(_fused_kernel, cfg),
        out_shape=jax.ShapeDtypeStruct((Bpad * SP, EP), jnp.float32),
        grid_spec=pltpu.PrefetchScalarGridSpec(
            num_scalar_prefetch=0,
            grid=(grid,),                   # batch tiles; weights/masks constant maps
            in_specs=in_specs,
            out_specs=pl.BlockSpec((Bt * SP, EP), lambda b: (b, 0))),
        # "parallel": v7x splits batch tiles across its 2 TensorCores; on v5e/v6e the
        # grid is a serial loop whose ~0.35us/step overhead is amortized over Bt.
        compiler_params=pltpu.CompilerParams(dimension_semantics=("parallel",)),
    )(*operands)

    memory = mem_flat.reshape(Bpad, SP, EP)[:B, :S, :E]          # strip padding
    # Reference: agg_feats = sum(cat([o[:,0] for o in last_outputs], dim=1), dim=1)
    # = sum over BOTH the modal and feature axes of the global tokens -> (B,)
    g = memory[:, offs[0], :]
    for j in range(1, num_modal):
        g = g + memory[:, offs[j], :]
    agg_feats = jnp.sum(g, axis=-1)
    global_masks = None                                          # masks are None
    return memory, global_masks, agg_feats


# ----------------------------------------------------------------------------
# Deterministic parameter init (shapes from HMMEncoder.__init__); Linear weights
# are stored pre-transposed as [in_features, out_features].
# ----------------------------------------------------------------------------
def init_params(key, d_feats, d_model, nhead, dim_ff, num_encoder_layers, max_len=512):
    ks = iter(jax.random.split(key, 32))

    def w(shape, scale=0.02):
        return jax.random.normal(next(ks), shape, jnp.float32) * scale

    return {
        'unify_w': [w((d, d_model)) for d in d_feats],
        'unify_b': [w((1, d_model)) for d in d_feats],
        'temp_table': w((max_len, d_model)),               # TemporalEmbedding
        'modal_table': w((len(d_feats) * 2, d_model)),     # ModalEmbedding (modal_different)
        'nhead': nhead,
        'num_encoder_layers': num_encoder_layers,
        # single layer weight set: _get_clones deep-copies, so all layers are identical
        'layer': {
            'wqkv': w((d_model, 3 * d_model)),
            'bqkv': w((1, 3 * d_model)),
            'wo': w((d_model, d_model)),
            'bo': w((1, d_model)),
            'g1': jnp.ones((1, d_model), jnp.float32),
            'b1': jnp.zeros((1, d_model), jnp.float32),
            'w1': w((d_model, dim_ff)),
            'bf1': w((1, dim_ff)),
            'w2': w((dim_ff, d_model)),
            'bf2': w((1, d_model)),
            'g2': jnp.ones((1, d_model), jnp.float32),
            'b2': jnp.zeros((1, d_model), jnp.float32),
        },
    }


if __name__ == "__main__":
    key = jax.random.PRNGKey(0)
    d_feats = [12, 20]
    d_model, nhead, dim_ff = 32, 4, 64
    num_encoder_layers = [2, 1]
    B, T1, T2 = 2, 7, 5

    kp, kx1, kx2 = jax.random.split(key, 3)
    params = init_params(kp, d_feats, d_model, nhead, dim_ff, num_encoder_layers)
    srcs = [jax.random.normal(kx1, (B, T1, d_feats[0]), jnp.float32),
            jax.random.normal(kx2, (B, T2, d_feats[1]), jnp.float32)]

    memory, global_masks, agg_feats = hmm_encoder_forward(srcs, params)
    jax.block_until_ready(memory)
    jax.block_until_ready(agg_feats)

    S = (T1 + 1) + (T2 + 1)
    assert memory.shape == (B, S, d_model), memory.shape
    assert agg_feats.shape == (B,), agg_feats.shape
    assert global_masks is None
    assert bool(jnp.all(jnp.isfinite(memory))) and bool(jnp.all(jnp.isfinite(agg_feats)))
    print("KERNEL_OK")
</pallas_src>

<mosaic_0001>
module attributes {stable_mosaic.version = 11 : i64} {
  func.func @_fused_kernel(%arg0: i32, %arg1: memref<32x256xf32, #tpu.memory_space<vmem>>, %arg2: memref<32x32xf32, #tpu.memory_space<vmem>>, %arg3: memref<32x128xf32, #tpu.memory_space<vmem>>, %arg4: memref<256x128xbf16, #tpu.memory_space<vmem>>, %arg5: memref<128x384xbf16, #tpu.memory_space<vmem>>, %arg6: memref<1x384xf32, #tpu.memory_space<vmem>>, %arg7: memref<128x128xbf16, #tpu.memory_space<vmem>>, %arg8: memref<1x128xf32, #tpu.memory_space<vmem>>, %arg9: memref<1x128xf32, #tpu.memory_space<vmem>>, %arg10: memref<1x128xf32, #tpu.memory_space<vmem>>, %arg11: memref<128x128xbf16, #tpu.memory_space<vmem>>, %arg12: memref<1x128xf32, #tpu.memory_space<vmem>>, %arg13: memref<128x128xbf16, #tpu.memory_space<vmem>>, %arg14: memref<1x128xf32, #tpu.memory_space<vmem>>, %arg15: memref<1x128xf32, #tpu.memory_space<vmem>>, %arg16: memref<1x128xf32, #tpu.memory_space<vmem>>, %arg17: memref<64x128xf32, #tpu.memory_space<vmem>>, %arg18: memref<1x16xf32, #tpu.memory_space<vmem>>, %arg19: memref<1x32x1xf32, #tpu.memory_space<vmem>>, %arg20: memref<32x128xf32, #tpu.memory_space<vmem>>) attributes {dimension_semantics = [#tpu.dimension_semantics<parallel>], iteration_bounds = array<i64: 1>, scalar_prefetch = 0 : i64, scratch_operands = 0 : i64, tpu.core_type = #tpu.core_type<tc>, window_params = [{transform_indices = @transform_0, window_bounds = array<i64: 32, 256>}, {pipeline_mode = #tpu.pipeline_mode<synchronous>, transform_indices = @transform_1, window_bounds = array<i64: 32, 32>}, {pipeline_mode = #tpu.pipeline_mode<synchronous>, transform_indices = @transform_2, window_bounds = array<i64: 32, 128>}, {pipeline_mode = #tpu.pipeline_mode<synchronous>, transform_indices = @transform_3, window_bounds = array<i64: 256, 128>}, {pipeline_mode = #tpu.pipeline_mode<synchronous>, transform_indices = @transform_4, window_bounds = array<i64: 128, 384>}, {pipeline_mode = #tpu.pipeline_mode<synchronous>, transform_indices = @transform_5, window_bounds = array<i64: 1, 384>}, {pipeline_mode = #tpu.pipeline_mode<synchronous>, transform_indices = @transform_6, window_bounds = array<i64: 128, 128>}, {pipeline_mode = #tpu.pipeline_mode<synchronous>, transform_indices = @transform_7, window_bounds = array<i64: 1, 128>}, {pipeline_mode = #tpu.pipeline_mode<synchronous>, transform_indices = @transform_8, window_bounds = array<i64: 1, 128>}, {pipeline_mode = #tpu.pipeline_mode<synchronous>, transform_indices = @transform_9, window_bounds = array<i64: 1, 128>}, {pipeline_mode = #tpu.pipeline_mode<synchronous>, transform_indices = @transform_10, window_bounds = array<i64: 128, 128>}, {pipeline_mode = #tpu.pipeline_mode<synchronous>, transform_indices = @transform_11, window_bounds = array<i64: 1, 128>}, {pipeline_mode = #tpu.pipeline_mode<synchronous>, transform_indices = @transform_12, window_bounds = array<i64: 128, 128>}, {pipeline_mode = #tpu.pipeline_mode<synchronous>, transform_indices = @transform_13, window_bounds = array<i64: 1, 128>}, {pipeline_mode = #tpu.pipeline_mode<synchronous>, transform_indices = @transform_14, window_bounds = array<i64: 1, 128>}, {pipeline_mode = #tpu.pipeline_mode<synchronous>, transform_indices = @transform_15, window_bounds = array<i64: 1, 128>}, {pipeline_mode = #tpu.pipeline_mode<synchronous>, transform_indices = @transform_16, window_bounds = array<i64: 64, 128>}, {pipeline_mode = #tpu.pipeline_mode<synchronous>, transform_indices = @transform_17, window_bounds = array<i64: 1, 16>}, {pipeline_mode = #tpu.pipeline_mode<synchronous>, transform_indices = @transform_18, window_bounds = array<i64: 1, 32, 1>}, {transform_indices = @transform_19, window_bounds = array<i64: 32, 128>}]} {
    %c0 = arith.constant 0 : index
    %c0_0 = arith.constant 0 : index
    %0 = vector.load %arg1[%c0, %c0_0] : memref<32x256xf32, #tpu.memory_space<vmem>>, vector<32x256xf32>
    %1 = arith.truncf %0 : vector<32x256xf32> to vector<32x256xbf16>
    %c0_1 = arith.constant 0 : index
    %c0_2 = arith.constant 0 : index
    %2 = vector.load %arg4[%c0_1, %c0_2] : memref<256x128xbf16, #tpu.memory_space<vmem>>, vector<256x128xbf16>
    %cst = arith.constant dense<0.000000e+00> : vector<32x128xf32>
    %3 = tpu.matmul %1, %2, %cst {dimension_numbers = #tpu.dot_dimension_numbers<[1], [0], [0], [1], [0, 0, 1, 1], [], []>} : vector<32x256xbf16>, vector<256x128xbf16>, vector<32x128xf32> -> vector<32x128xf32>
    %c0_3 = arith.constant 0 : index
    %c0_4 = arith.constant 0 : index
    %4 = vector.load %arg2[%c0_3, %c0_4] : memref<32x32xf32, #tpu.memory_space<vmem>>, vector<32x32xf32>
    %cst_5 = arith.constant dense<0.000000e+00> : vector<32x128xf32>
    %5 = tpu.matmul %4, %3, %cst_5 {dimension_numbers = #tpu.dot_dimension_numbers<[1], [0], [0], [1], [0, 0, 1, 1], [], []>} : vector<32x32xf32>, vector<32x128xf32>, vector<32x128xf32> -> vector<32x128xf32>
    %c0_6 = arith.constant 0 : index
    %c0_7 = arith.constant 0 : index
    %6 = vector.load %arg3[%c0_6, %c0_7] : memref<32x128xf32, #tpu.memory_space<vmem>>, vector<32x128xf32>
    %7 = arith.addf %5, %6 : vector<32x128xf32>
    %c0_8 = arith.constant 0 : index
    %c0_9 = arith.constant 0 : index
    %8 = vector.load %arg17[%c0_8, %c0_9] : memref<64x128xf32, #tpu.memory_space<vmem>>, vector<64x128xf32>
    %c0_10 = arith.constant 0 : index
    %c0_11 = arith.constant 0 : index
    %9 = vector.load %arg18[%c0_10, %c0_11] : memref<1x16xf32, #tpu.memory_space<vmem>>, vector<1x16xf32>
    %c0_12 = arith.constant 0 : index
    %c0_13 = arith.constant 0 : index
    %10 = vector.load %arg9[%c0_12, %c0_13] : memref<1x128xf32, #tpu.memory_space<vmem>>, vector<1x128xf32>
    %c0_14 = arith.constant 0 : index
    %c0_15 = arith.constant 0 : index
    %11 = vector.load %arg10[%c0_14, %c0_15] : memref<1x128xf32, #tpu.memory_space<vmem>>, vector<1x128xf32>
    %c0_16 = arith.constant 0 : index
    %c0_17 = arith.constant 0 : index
    %12 = vector.load %arg15[%c0_16, %c0_17] : memref<1x128xf32, #tpu.memory_space<vmem>>, vector<1x128xf32>
    %c0_18 = arith.constant 0 : index
    %c0_19 = arith.constant 0 : index
    %13 = vector.load %arg16[%c0_18, %c0_19] : memref<1x128xf32, #tpu.memory_space<vmem>>, vector<1x128xf32>
    %c0_20 = arith.constant 0 : index
    %c0_21 = arith.constant 0 : index
    %14 = vector.load %arg6[%c0_20, %c0_21] : memref<1x384xf32, #tpu.memory_space<vmem>>, vector<1x384xf32>
    %c0_22 = arith.constant 0 : index
    %c0_23 = arith.constant 0 : index
    %15 = vector.load %arg8[%c0_22, %c0_23] : memref<1x128xf32, #tpu.memory_space<vmem>>, vector<1x128xf32>
    %c0_24 = arith.constant 0 : index
    %c0_25 = arith.constant 0 : index
    %16 = vector.load %arg12[%c0_24, %c0_25] : memref<1x128xf32, #tpu.memory_space<vmem>>, vector<1x128xf32>
    %c0_26 = arith.constant 0 : index
    %c0_27 = arith.constant 0 : index
    %17 = vector.load %arg14[%c0_26, %c0_27] : memref<1x128xf32, #tpu.memory_space<vmem>>, vector<1x128xf32>
    %18 = arith.truncf %7 : vector<32x128xf32> to vector<32x128xbf16>
    %c0_28 = arith.constant 0 : index
    %c0_29 = arith.constant 0 : index
    %19 = vector.load %arg5[%c0_28, %c0_29] : memref<128x384xbf16, #tpu.memory_space<vmem>>, vector<128x384xbf16>
    %cst_30 = arith.constant dense<0.000000e+00> : vector<32x384xf32>
    %20 = tpu.matmul %18, %19, %cst_30 {dimension_numbers = #tpu.dot_dimension_numbers<[1], [0], [0], [1], [0, 0, 1, 1], [], []>} : vector<32x128xbf16>, vector<128x384xbf16>, vector<32x384xf32> -> vector<32x384xf32>
    %21 = vector.broadcast %14 : vector<1x384xf32> to vector<32x384xf32>
    %22 = arith.addf %20, %21 : vector<32x384xf32>
    %23 = vector.extract_strided_slice %22 {offsets = [0, 0], sizes = [16, 384], strides = [1, 1]} : vector<32x384xf32> to vector<16x384xf32>
    %24 = vector.extract_strided_slice %23 {offsets = [0, 0], sizes = [16, 128], strides = [1, 1]} : vector<16x384xf32> to vector<16x128xf32>
    %25 = vector.extract_strided_slice %23 {offsets = [0, 128], sizes = [16, 128], strides = [1, 1]} : vector<16x384xf32> to vector<16x128xf32>
    %26 = vector.extract_strided_slice %23 {offsets = [0, 256], sizes = [16, 128], strides = [1, 1]} : vector<16x384xf32> to vector<16x128xf32>
    %27 = tpu.concatenate %24, %24, %24, %24 in 0 : vector<16x128xf32>, vector<16x128xf32>, vector<16x128xf32>, vector<16x128xf32> -> vector<64x128xf32>
    %28 = arith.mulf %27, %8 : vector<64x128xf32>
    %cst_31 = arith.constant dense<0.000000e+00> : vector<64x16xf32>
    %29 = tpu.matmul %28, %25, %cst_31 {dimension_numbers = #tpu.dot_dimension_numbers<[1], [1], [0], [0], [0, 0, 1, 0], [], []>} : vector<64x128xf32>, vector<16x128xf32>, vector<64x16xf32> -> vector<64x16xf32>
    %30 = vector.broadcast %9 : vector<1x16xf32> to vector<64x16xf32>
    %31 = arith.addf %29, %30 : vector<64x16xf32>
    %cst_32 = arith.constant dense<0xFF800000> : vector<64xf32>
    %32 = vector.multi_reduction <maximumf>, %31, %cst_32 [1] : vector<64x16xf32> to vector<64xf32>
    %33 = vector.shape_cast %32 : vector<64xf32> to vector<64x1xf32>
    %34 = vector.broadcast %33 : vector<64x1xf32> to vector<64x16xf32>
    %35 = arith.subf %31, %34 : vector<64x16xf32>
    %36 = math.exp %35 : vector<64x16xf32>
    %cst_33 = arith.constant dense<0.000000e+00> : vector<64xf32>
    %37 = vector.multi_reduction <add>, %36, %cst_33 [1] : vector<64x16xf32> to vector<64xf32>
    %38 = vector.shape_cast %37 : vector<64xf32> to vector<64x1xf32>
    %39 = tpu.reciprocal %38 {approx = true} : vector<64x1xf32> -> vector<64x1xf32>
    %40 = vector.broadcast %39 : vector<64x1xf32> to vector<64x16xf32>
    %41 = arith.mulf %36, %40 : vector<64x16xf32>
    %cst_34 = arith.constant dense<0.000000e+00> : vector<64x128xf32>
    %42 = tpu.matmul %41, %26, %cst_34 {dimension_numbers = #tpu.dot_dimension_numbers<[1], [0], [0], [1], [0, 0, 1, 1], [], []>} : vector<64x16xf32>, vector<16x128xf32>, vector<64x128xf32> -> vector<64x128xf32>
    %43 = arith.mulf %42, %8 : vector<64x128xf32>
    %44 = vector.extract_strided_slice %43 {offsets = [0, 0], sizes = [16, 128], strides = [1, 1]} : vector<64x128xf32> to vector<16x128xf32>
    %45 = vector.extract_strided_slice %43 {offsets = [16, 0], sizes = [16, 128], strides = [1, 1]} : vector<64x128xf32> to vector<16x128xf32>
    %46 = arith.addf %44, %45 : vector<16x128xf32>
    %47 = vector.extract_strided_slice %43 {offsets = [32, 0], sizes = [16, 128], strides = [1, 1]} : vector<64x128xf32> to vector<16x128xf32>
    %48 = arith.addf %46, %47 : vector<16x128xf32>
    %49 = vector.extract_strided_slice %43 {offsets = [48, 0], sizes = [16, 128], strides = [1, 1]} : vector<64x128xf32> to vector<16x128xf32>
    %50 = arith.addf %48, %49 : vector<16x128xf32>
    %51 = vector.extract_strided_slice %22 {offsets = [16, 0], sizes = [16, 384], strides = [1, 1]} : vector<32x384xf32> to vector<16x384xf32>
    %52 = vector.extract_strided_slice %51 {offsets = [0, 0], sizes = [16, 128], strides = [1, 1]} : vector<16x384xf32> to vector<16x128xf32>
    %53 = vector.extract_strided_slice %51 {offsets = [0, 128], sizes = [16, 128], strides = [1, 1]} : vector<16x384xf32> to vector<16x128xf32>
    %54 = vector.extract_strided_slice %51 {offsets = [0, 256], sizes = [16, 128], strides = [1, 1]} : vector<16x384xf32> to vector<16x128xf32>
    %55 = tpu.concatenate %52, %52, %52, %52 in 0 : vector<16x128xf32>, vector<16x128xf32>, vector<16x128xf32>, vector<16x128xf32> -> vector<64x128xf32>
    %56 = arith.mulf %55, %8 : vector<64x128xf32>
    %cst_35 = arith.constant dense<0.000000e+00> : vector<64x16xf32>
    %57 = tpu.matmul %56, %53, %cst_35 {dimension_numbers = #tpu.dot_dimension_numbers<[1], [1], [0], [0], [0, 0, 1, 0], [], []>} : vector<64x128xf32>, vector<16x128xf32>, vector<64x16xf32> -> vector<64x16xf32>
    %58 = vector.broadcast %9 : vector<1x16xf32> to vector<64x16xf32>
    %59 = arith.addf %57, %58 : vector<64x16xf32>
    %cst_36 = arith.constant dense<0xFF800000> : vector<64xf32>
    %60 = vector.multi_reduction <maximumf>, %59, %cst_36 [1] : vector<64x16xf32> to vector<64xf32>
    %61 = vector.shape_cast %60 : vector<64xf32> to vector<64x1xf32>
    %62 = vector.broadcast %61 : vector<64x1xf32> to vector<64x16xf32>
    %63 = arith.subf %59, %62 : vector<64x16xf32>
    %64 = math.exp %63 : vector<64x16xf32>
    %cst_37 = arith.constant dense<0.000000e+00> : vector<64xf32>
    %65 = vector.multi_reduction <add>, %64, %cst_37 [1] : vector<64x16xf32> to vector<64xf32>
    %66 = vector.shape_cast %65 : vector<64xf32> to vector<64x1xf32>
    %67 = tpu.reciprocal %66 {approx = true} : vector<64x1xf32> -> vector<64x1xf32>
    %68 = vector.broadcast %67 : vector<64x1xf32> to vector<64x16xf32>
    %69 = arith.mulf %64, %68 : vector<64x16xf32>
    %cst_38 = arith.constant dense<0.000000e+00> : vector<64x128xf32>
    %70 = tpu.matmul %69, %54, %cst_38 {dimension_numbers = #tpu.dot_dimension_numbers<[1], [0], [0], [1], [0, 0, 1, 1], [], []>} : vector<64x16xf32>, vector<16x128xf32>, vector<64x128xf32> -> vector<64x128xf32>
    %71 = arith.mulf %70, %8 : vector<64x128xf32>
    %72 = vector.extract_strided_slice %71 {offsets = [0, 0], sizes = [16, 128], strides = [1, 1]} : vector<64x128xf32> to vector<16x128xf32>
    %73 = vector.extract_strided_slice %71 {offsets = [16, 0], sizes = [16, 128], strides = [1, 1]} : vector<64x128xf32> to vector<16x128xf32>
    %74 = arith.addf %72, %73 : vector<16x128xf32>
    %75 = vector.extract_strided_slice %71 {offsets = [32, 0], sizes = [16, 128], strides = [1, 1]} : vector<64x128xf32> to vector<16x128xf32>
    %76 = arith.addf %74, %75 : vector<16x128xf32>
    %77 = vector.extract_strided_slice %71 {offsets = [48, 0], sizes = [16, 128], strides = [1, 1]} : vector<64x128xf32> to vector<16x128xf32>
    %78 = arith.addf %76, %77 : vector<16x128xf32>
    %79 = tpu.concatenate %50, %78 in 0 : vector<16x128xf32>, vector<16x128xf32> -> vector<32x128xf32>
    %80 = arith.truncf %79 : vector<32x128xf32> to vector<32x128xbf16>
    %c0_39 = arith.constant 0 : index
    %c0_40 = arith.constant 0 : index
    %81 = vector.load %arg7[%c0_39, %c0_40] : memref<128x128xbf16, #tpu.memory_space<vmem>>, vector<128x128xbf16>
    %cst_41 = arith.constant dense<0.000000e+00> : vector<32x128xf32>
    %82 = tpu.matmul %80, %81, %cst_41 {dimension_numbers = #tpu.dot_dimension_numbers<[1], [0], [0], [1], [0, 0, 1, 1], [], []>} : vector<32x128xbf16>, vector<128x128xbf16>, vector<32x128xf32> -> vector<32x128xf32>
    %83 = vector.broadcast %15 : vector<1x128xf32> to vector<32x128xf32>
    %84 = arith.addf %82, %83 : vector<32x128xf32>
    %85 = arith.addf %7, %84 : vector<32x128xf32>
    %cst_42 = arith.constant dense<0.000000e+00> : vector<32xf32>
    %86 = vector.multi_reduction <add>, %85, %cst_42 [1] : vector<32x128xf32> to vector<32xf32>
    %87 = vector.shape_cast %86 : vector<32xf32> to vector<32x1xf32>
    %cst_43 = arith.constant 3.125000e-02 : f32
    %88 = vector.broadcast %cst_43 : f32 to vector<32x1xf32>
    %89 = arith.mulf %87, %88 : vector<32x1xf32>
    %90 = arith.mulf %85, %85 : vector<32x128xf32>
    %cst_44 = arith.constant dense<0.000000e+00> : vector<32xf32>
    %91 = vector.multi_reduction <add>, %90, %cst_44 [1] : vector<32x128xf32> to vector<32xf32>
    %92 = vector.shape_cast %91 : vector<32xf32> to vector<32x1xf32>
    %cst_45 = arith.constant 3.125000e-02 : f32
    %93 = vector.broadcast %cst_45 : f32 to vector<32x1xf32>
    %94 = arith.mulf %92, %93 : vector<32x1xf32>
    %95 = arith.mulf %89, %89 : vector<32x1xf32>
    %96 = arith.subf %94, %95 : vector<32x1xf32>
    %97 = vector.broadcast %89 : vector<32x1xf32> to vector<32x128xf32>
    %98 = arith.subf %85, %97 : vector<32x128xf32>
    %cst_46 = arith.constant 9.99999974E-6 : f32
    %99 = vector.broadcast %cst_46 : f32 to vector<32x1xf32>
    %100 = arith.addf %96, %99 : vector<32x1xf32>
    %101 = math.rsqrt %100 : vector<32x1xf32>
    %102 = vector.broadcast %101 : vector<32x1xf32> to vector<32x128xf32>
    %103 = arith.mulf %98, %102 : vector<32x128xf32>
    %104 = vector.broadcast %10 : vector<1x128xf32> to vector<32x128xf32>
    %105 = arith.mulf %103, %104 : vector<32x128xf32>
    %106 = vector.broadcast %11 : vector<1x128xf32> to vector<32x128xf32>
    %107 = arith.addf %105, %106 : vector<32x128xf32>
    %108 = arith.truncf %107 : vector<32x128xf32> to vector<32x128xbf16>
    %c0_47 = arith.constant 0 : index
    %c0_48 = arith.constant 0 : index
    %109 = vector.load %arg11[%c0_47, %c0_48] : memref<128x128xbf16, #tpu.memory_space<vmem>>, vector<128x128xbf16>
    %cst_49 = arith.constant dense<0.000000e+00> : vector<32x128xf32>
    %110 = tpu.matmul %108, %109, %cst_49 {dimension_numbers = #tpu.dot_dimension_numbers<[1], [0], [0], [1], [0, 0, 1, 1], [], []>} : vector<32x128xbf16>, vector<128x128xbf16>, vector<32x128xf32> -> vector<32x128xf32>
    %111 = vector.broadcast %16 : vector<1x128xf32> to vector<32x128xf32>
    %112 = arith.addf %110, %111 : vector<32x128xf32>
    %cst_50 = arith.constant 5.000000e-01 : f32
    %113 = vector.broadcast %cst_50 : f32 to vector<32x128xf32>
    %114 = arith.mulf %113, %112 : vector<32x128xf32>
    %cst_51 = arith.constant 4.471500e-02 : f32
    %115 = vector.broadcast %cst_51 : f32 to vector<32x128xf32>
    %116 = arith.mulf %115, %112 : vector<32x128xf32>
    %117 = arith.mulf %116, %112 : vector<32x128xf32>
    %118 = arith.mulf %117, %112 : vector<32x128xf32>
    %119 = arith.addf %112, %118 : vector<32x128xf32>
    %cst_52 = arith.constant 0.797884583 : f32
    %120 = vector.broadcast %cst_52 : f32 to vector<32x128xf32>
    %121 = arith.mulf %120, %119 : vector<32x128xf32>
    %122 = math.tanh %121 : vector<32x128xf32>
    %cst_53 = arith.constant 1.000000e+00 : f32
    %123 = vector.broadcast %cst_53 : f32 to vector<32x128xf32>
    %124 = arith.addf %123, %122 : vector<32x128xf32>
    %125 = arith.mulf %114, %124 : vector<32x128xf32>
    %126 = arith.truncf %125 : vector<32x128xf32> to vector<32x128xbf16>
    %c0_54 = arith.constant 0 : index
    %c0_55 = arith.constant 0 : index
    %127 = vector.load %arg13[%c0_54, %c0_55] : memref<128x128xbf16, #tpu.memory_space<vmem>>, vector<128x128xbf16>
    %cst_56 = arith.constant dense<0.000000e+00> : vector<32x128xf32>
    %128 = tpu.matmul %126, %127, %cst_56 {dimension_numbers = #tpu.dot_dimension_numbers<[1], [0], [0], [1], [0, 0, 1, 1], [], []>} : vector<32x128xbf16>, vector<128x128xbf16>, vector<32x128xf32> -> vector<32x128xf32>
    %129 = vector.broadcast %17 : vector<1x128xf32> to vector<32x128xf32>
    %130 = arith.addf %128, %129 : vector<32x128xf32>
    %131 = arith.addf %107, %130 : vector<32x128xf32>
    %cst_57 = arith.constant dense<0.000000e+00> : vector<32xf32>
    %132 = vector.multi_reduction <add>, %131, %cst_57 [1] : vector<32x128xf32> to vector<32xf32>
    %133 = vector.shape_cast %132 : vector<32xf32> to vector<32x1xf32>
    %cst_58 = arith.constant 3.125000e-02 : f32
    %134 = vector.broadcast %cst_58 : f32 to vector<32x1xf32>
    %135 = arith.mulf %133, %134 : vector<32x1xf32>
    %136 = arith.mulf %131, %131 : vector<32x128xf32>
    %cst_59 = arith.constant dense<0.000000e+00> : vector<32xf32>
    %137 = vector.multi_reduction <add>, %136, %cst_59 [1] : vector<32x128xf32> to vector<32xf32>
    %138 = vector.shape_cast %137 : vector<32xf32> to vector<32x1xf32>
    %cst_60 = arith.constant 3.125000e-02 : f32
    %139 = vector.broadcast %cst_60 : f32 to vector<32x1xf32>
    %140 = arith.mulf %138, %139 : vector<32x1xf32>
    %141 = arith.mulf %135, %135 : vector<32x1xf32>
    %142 = arith.subf %140, %141 : vector<32x1xf32>
    %143 = vector.broadcast %135 : vector<32x1xf32> to vector<32x128xf32>
    %144 = arith.subf %131, %143 : vector<32x128xf32>
    %cst_61 = arith.constant 9.99999974E-6 : f32
    %145 = vector.broadcast %cst_61 : f32 to vector<32x1xf32>
    %146 = arith.addf %142, %145 : vector<32x1xf32>
    %147 = math.rsqrt %146 : vector<32x1xf32>
    %148 = vector.broadcast %147 : vector<32x1xf32> to vector<32x128xf32>
    %149 = arith.mulf %144, %148 : vector<32x128xf32>
    %150 = vector.broadcast %12 : vector<1x128xf32> to vector<32x128xf32>
    %151 = arith.mulf %149, %150 : vector<32x128xf32>
    %152 = vector.broadcast %13 : vector<1x128xf32> to vector<32x128xf32>
    %153 = arith.addf %151, %152 : vector<32x128xf32>
    %c0_62 = arith.constant 0 : index
    %c0_63 = arith.constant 0 : index
    %c0_64 = arith.constant 0 : index
    %154 = vector.load %arg19[%c0_62, %c0_63, %c0_64] : memref<1x32x1xf32, #tpu.memory_space<vmem>>, vector<1x32x1xf32>
    %155 = vector.shape_cast %154 : vector<1x32x1xf32> to vector<32x1xf32>
    %156 = arith.subf %153, %7 : vector<32x128xf32>
    %157 = vector.broadcast %155 : vector<32x1xf32> to vector<32x128xf32>
    %158 = arith.mulf %157, %156 : vector<32x128xf32>
    %159 = arith.addf %7, %158 : vector<32x128xf32>
    %160 = arith.truncf %159 : vector<32x128xf32> to vector<32x128xbf16>
    %c0_65 = arith.constant 0 : index
    %c0_66 = arith.constant 0 : index
    %161 = vector.load %arg5[%c0_65, %c0_66] : memref<128x384xbf16, #tpu.memory_space<vmem>>, vector<128x384xbf16>
    %cst_67 = arith.constant dense<0.000000e+00> : vector<32x384xf32>
    %162 = tpu.matmul %160, %161, %cst_67 {dimension_numbers = #tpu.dot_dimension_numbers<[1], [0], [0], [1], [0, 0, 1, 1], [], []>} : vector<32x128xbf16>, vector<128x384xbf16>, vector<32x384xf32> -> vector<32x384xf32>
    %163 = vector.broadcast %14 : vector<1x384xf32> to vector<32x384xf32>
    %164 = arith.addf %162, %163 : vector<32x384xf32>
    %165 = vector.extract_strided_slice %164 {offsets = [0, 0], sizes = [16, 384], strides = [1, 1]} : vector<32x384xf32> to vector<16x384xf32>
    %166 = vector.extract_strided_slice %165 {offsets = [0, 0], sizes = [16, 128], strides = [1, 1]} : vector<16x384xf32> to vector<16x128xf32>
    %167 = vector.extract_strided_slice %165 {offsets = [0, 128], sizes = [16, 128], strides = [1, 1]} : vector<16x384xf32> to vector<16x128xf32>
    %168 = vector.extract_strided_slice %165 {offsets = [0, 256], sizes = [16, 128], strides = [1, 1]} : vector<16x384xf32> to vector<16x128xf32>
    %169 = tpu.concatenate %166, %166, %166, %166 in 0 : vector<16x128xf32>, vector<16x128xf32>, vector<16x128xf32>, vector<16x128xf32> -> vector<64x128xf32>
    %170 = arith.mulf %169, %8 : vector<64x128xf32>
    %cst_68 = arith.constant dense<0.000000e+00> : vector<64x16xf32>
    %171 = tpu.matmul %170, %167, %cst_68 {dimension_numbers = #tpu.dot_dimension_numbers<[1], [1], [0], [0], [0, 0, 1, 0], [], []>} : vector<64x128xf32>, vector<16x128xf32>, vector<64x16xf32> -> vector<64x16xf32>
    %172 = vector.broadcast %9 : vector<1x16xf32> to vector<64x16xf32>
    %173 = arith.addf %171, %172 : vector<64x16xf32>
    %cst_69 = arith.constant dense<0xFF800000> : vector<64xf32>
    %174 = vector.multi_reduction <maximumf>, %173, %cst_69 [1] : vector<64x16xf32> to vector<64xf32>
    %175 = vector.shape_cast %174 : vector<64xf32> to vector<64x1xf32>
    %176 = vector.broadcast %175 : vector<64x1xf32> to vector<64x16xf32>
    %177 = arith.subf %173, %176 : vector<64x16xf32>
    %178 = math.exp %177 : vector<64x16xf32>
    %cst_70 = arith.constant dense<0.000000e+00> : vector<64xf32>
    %179 = vector.multi_reduction <add>, %178, %cst_70 [1] : vector<64x16xf32> to vector<64xf32>
    %180 = vector.shape_cast %179 : vector<64xf32> to vector<64x1xf32>
    %181 = tpu.reciprocal %180 {approx = true} : vector<64x1xf32> -> vector<64x1xf32>
    %182 = vector.broadcast %181 : vector<64x1xf32> to vector<64x16xf32>
    %183 = arith.mulf %178, %182 : vector<64x16xf32>
    %cst_71 = arith.constant dense<0.000000e+00> : vector<64x128xf32>
    %184 = tpu.matmul %183, %168, %cst_71 {dimension_numbers = #tpu.dot_dimension_numbers<[1], [0], [0], [1], [0, 0, 1, 1], [], []>} : vector<64x16xf32>, vector<16x128xf32>, vector<64x128xf32> -> vector<64x128xf32>
    %185 = arith.mulf %184, %8 : vector<64x128xf32>
    %186 = vector.extract_strided_slice %185 {offsets = [0, 0], sizes = [16, 128], strides = [1, 1]} : vector<64x128xf32> to vector<16x128xf32>
    %187 = vector.extract_strided_slice %185 {offsets = [16, 0], sizes = [16, 128], strides = [1, 1]} : vector<64x128xf32> to vector<16x128xf32>
    %188 = arith.addf %186, %187 : vector<16x128xf32>
    %189 = vector.extract_strided_slice %185 {offsets = [32, 0], sizes = [16, 128], strides = [1, 1]} : vector<64x128xf32> to vector<16x128xf32>
    %190 = arith.addf %188, %189 : vector<16x128xf32>
    %191 = vector.extract_strided_slice %185 {offsets = [48, 0], sizes = [16, 128], strides = [1, 1]} : vector<64x128xf32> to vector<16x128xf32>
    %192 = arith.addf %190, %191 : vector<16x128xf32>
    %193 = vector.extract_strided_slice %164 {offsets = [16, 0], sizes = [16, 384], strides = [1, 1]} : vector<32x384xf32> to vector<16x384xf32>
    %194 = vector.extract_strided_slice %193 {offsets = [0, 0], sizes = [16, 128], strides = [1, 1]} : vector<16x384xf32> to vector<16x128xf32>
    %195 = vector.extract_strided_slice %193 {offsets = [0, 128], sizes = [16, 128], strides = [1, 1]} : vector<16x384xf32> to vector<16x128xf32>
    %196 = vector.extract_strided_slice %193 {offsets = [0, 256], sizes = [16, 128], strides = [1, 1]} : vector<16x384xf32> to vector<16x128xf32>
    %197 = tpu.concatenate %194, %194, %194, %194 in 0 : vector<16x128xf32>, vector<16x128xf32>, vector<16x128xf32>, vector<16x128xf32> -> vector<64x128xf32>
    %198 = arith.mulf %197, %8 : vector<64x128xf32>
    %cst_72 = arith.constant dense<0.000000e+00> : vector<64x16xf32>
    %199 = tpu.matmul %198, %195, %cst_72 {dimension_numbers = #tpu.dot_dimension_numbers<[1], [1], [0], [0], [0, 0, 1, 0], [], []>} : vector<64x128xf32>, vector<16x128xf32>, vector<64x16xf32> -> vector<64x16xf32>
    %200 = vector.broadcast %9 : vector<1x16xf32> to vector<64x16xf32>
    %201 = arith.addf %199, %200 : vector<64x16xf32>
    %cst_73 = arith.constant dense<0xFF800000> : vector<64xf32>
    %202 = vector.multi_reduction <maximumf>, %201, %cst_73 [1] : vector<64x16xf32> to vector<64xf32>
    %203 = vector.shape_cast %202 : vector<64xf32> to vector<64x1xf32>
    %204 = vector.broadcast %203 : vector<64x1xf32> to vector<64x16xf32>
    %205 = arith.subf %201, %204 : vector<64x16xf32>
    %206 = math.exp %205 : vector<64x16xf32>
    %cst_74 = arith.constant dense<0.000000e+00> : vector<64xf32>
    %207 = vector.multi_reduction <add>, %206, %cst_74 [1] : vector<64x16xf32> to vector<64xf32>
    %208 = vector.shape_cast %207 : vector<64xf32> to vector<64x1xf32>
    %209 = tpu.reciprocal %208 {approx = true} : vector<64x1xf32> -> vector<64x1xf32>
    %210 = vector.broadcast %209 : vector<64x1xf32> to vector<64x16xf32>
    %211 = arith.mulf %206, %210 : vector<64x16xf32>
    %cst_75 = arith.constant dense<0.000000e+00> : vector<64x128xf32>
    %212 = tpu.matmul %211, %196, %cst_75 {dimension_numbers = #tpu.dot_dimension_numbers<[1], [0], [0], [1], [0, 0, 1, 1], [], []>} : vector<64x16xf32>, vector<16x128xf32>, vector<64x128xf32> -> vector<64x128xf32>
    %213 = arith.mulf %212, %8 : vector<64x128xf32>
    %214 = vector.extract_strided_slice %213 {offsets = [0, 0], sizes = [16, 128], strides = [1, 1]} : vector<64x128xf32> to vector<16x128xf32>
    %215 = vector.extract_strided_slice %213 {offsets = [16, 0], sizes = [16, 128], strides = [1, 1]} : vector<64x128xf32> to vector<16x128xf32>
    %216 = arith.addf %214, %215 : vector<16x128xf32>
    %217 = vector.extract_strided_slice %213 {offsets = [32, 0], sizes = [16, 128], strides = [1, 1]} : vector<64x128xf32> to vector<16x128xf32>
    %218 = arith.addf %216, %217 : vector<16x128xf32>
    %219 = vector.extract_strided_slice %213 {offsets = [48, 0], sizes = [16, 128], strides = [1, 1]} : vector<64x128xf32> to vector<16x128xf32>
    %220 = arith.addf %218, %219 : vector<16x128xf32>
    %221 = tpu.concatenate %192, %220 in 0 : vector<16x128xf32>, vector<16x128xf32> -> vector<32x128xf32>
    %222 = arith.truncf %221 : vector<32x128xf32> to vector<32x128xbf16>
    %c0_76 = arith.constant 0 : index
    %c0_77 = arith.constant 0 : index
    %223 = vector.load %arg7[%c0_76, %c0_77] : memref<128x128xbf16, #tpu.memory_space<vmem>>, vector<128x128xbf16>
    %cst_78 = arith.constant dense<0.000000e+00> : vector<32x128xf32>
    %224 = tpu.matmul %222, %223, %cst_78 {dimension_numbers = #tpu.dot_dimension_numbers<[1], [0], [0], [1], [0, 0, 1, 1], [], []>} : vector<32x128xbf16>, vector<128x128xbf16>, vector<32x128xf32> -> vector<32x128xf32>
    %225 = vector.broadcast %15 : vector<1x128xf32> to vector<32x128xf32>
    %226 = arith.addf %224, %225 : vector<32x128xf32>
    %227 = arith.addf %159, %226 : vector<32x128xf32>
    %cst_79 = arith.constant dense<0.000000e+00> : vector<32xf32>
    %228 = vector.multi_reduction <add>, %227, %cst_79 [1] : vector<32x128xf32> to vector<32xf32>
    %229 = vector.shape_cast %228 : vector<32xf32> to vector<32x1xf32>
    %cst_80 = arith.constant 3.125000e-02 : f32
    %230 = vector.broadcast %cst_80 : f32 to vector<32x1xf32>
    %231 = arith.mulf %229, %230 : vector<32x1xf32>
    %232 = arith.mulf %227, %227 : vector<32x128xf32>
    %cst_81 = arith.constant dense<0.000000e+00> : vector<32xf32>
    %233 = vector.multi_reduction <add>, %232, %cst_81 [1] : vector<32x128xf32> to vector<32xf32>
    %234 = vector.shape_cast %233 : vector<32xf32> to vector<32x1xf32>
    %cst_82 = arith.constant 3.125000e-02 : f32
    %235 = vector.broadcast %cst_82 : f32 to vector<32x1xf32>
    %236 = arith.mulf %234, %235 : vector<32x1xf32>
    %237 = arith.mulf %231, %231 : vector<32x1xf32>
    %238 = arith.subf %236, %237 : vector<32x1xf32>
    %239 = vector.broadcast %231 : vector<32x1xf32> to vector<32x128xf32>
    %240 = arith.subf %227, %239 : vector<32x128xf32>
    %cst_83 = arith.constant 9.99999974E-6 : f32
    %241 = vector.broadcast %cst_83 : f32 to vector<32x1xf32>
    %242 = arith.addf %238, %241 : vector<32x1xf32>
    %243 = math.rsqrt %242 : vector<32x1xf32>
    %244 = vector.broadcast %243 : vector<32x1xf32> to vector<32x128xf32>
    %245 = arith.mulf %240, %244 : vector<32x128xf32>
    %246 = vector.broadcast %10 : vector<1x128xf32> to vector<32x128xf32>
    %247 = arith.mulf %245, %246 : vector<32x128xf32>
    %248 = vector.broadcast %11 : vector<1x128xf32> to vector<32x128xf32>
    %249 = arith.addf %247, %248 : vector<32x128xf32>
    %250 = arith.truncf %249 : vector<32x128xf32> to vector<32x128xbf16>
    %c0_84 = arith.constant 0 : index
    %c0_85 = arith.constant 0 : index
    %251 = vector.load %arg11[%c0_84, %c0_85] : memref<128x128xbf16, #tpu.memory_space<vmem>>, vector<128x128xbf16>
    %cst_86 = arith.constant dense<0.000000e+00> : vector<32x128xf32>
    %252 = tpu.matmul %250, %251, %cst_86 {dimension_numbers = #tpu.dot_dimension_numbers<[1], [0], [0], [1], [0, 0, 1, 1], [], []>} : vector<32x128xbf16>, vector<128x128xbf16>, vector<32x128xf32> -> vector<32x128xf32>
    %253 = vector.broadcast %16 : vector<1x128xf32> to vector<32x128xf32>
    %254 = arith.addf %252, %253 : vector<32x128xf32>
    %cst_87 = arith.constant 5.000000e-01 : f32
    %255 = vector.broadcast %cst_87 : f32 to vector<32x128xf32>
    %256 = arith.mulf %255, %254 : vector<32x128xf32>
    %cst_88 = arith.constant 4.471500e-02 : f32
    %257 = vector.broadcast %cst_88 : f32 to vector<32x128xf32>
    %258 = arith.mulf %257, %254 : vector<32x128xf32>
    %259 = arith.mulf %258, %254 : vector<32x128xf32>
    %260 = arith.mulf %259, %254 : vector<32x128xf32>
    %261 = arith.addf %254, %260 : vector<32x128xf32>
    %cst_89 = arith.constant 0.797884583 : f32
    %262 = vector.broadcast %cst_89 : f32 to vector<32x128xf32>
    %263 = arith.mulf %262, %261 : vector<32x128xf32>
    %264 = math.tanh %263 : vector<32x128xf32>
    %cst_90 = arith.constant 1.000000e+00 : f32
    %265 = vector.broadcast %cst_90 : f32 to vector<32x128xf32>
    %266 = arith.addf %265, %264 : vector<32x128xf32>
    %267 = arith.mulf %256, %266 : vector<32x128xf32>
    %268 = arith.truncf %267 : vector<32x128xf32> to vector<32x128xbf16>
    %c0_91 = arith.constant 0 : index
    %c0_92 = arith.constant 0 : index
    %269 = vector.load %arg13[%c0_91, %c0_92] : memref<128x128xbf16, #tpu.memory_space<vmem>>, vector<128x128xbf16>
    %cst_93 = arith.constant dense<0.000000e+00> : vector<32x128xf32>
    %270 = tpu.matmul %268, %269, %cst_93 {dimension_numbers = #tpu.dot_dimension_numbers<[1], [0], [0], [1], [0, 0, 1, 1], [], []>} : vector<32x128xbf16>, vector<128x128xbf16>, vector<32x128xf32> -> vector<32x128xf32>
    %271 = vector.broadcast %17 : vector<1x128xf32> to vector<32x128xf32>
    %272 = arith.addf %270, %271 : vector<32x128xf32>
    %273 = arith.addf %249, %272 : vector<32x128xf32>
    %cst_94 = arith.constant dense<0.000000e+00> : vector<32xf32>
    %274 = vector.multi_reduction <add>, %273, %cst_94 [1] : vector<32x128xf32> to vector<32xf32>
    %275 = vector.shape_cast %274 : vector<32xf32> to vector<32x1xf32>
    %cst_95 = arith.constant 3.125000e-02 : f32
    %276 = vector.broadcast %cst_95 : f32 to vector<32x1xf32>
    %277 = arith.mulf %275, %276 : vector<32x1xf32>
    %278 = arith.mulf %273, %273 : vector<32x128xf32>
    %cst_96 = arith.constant dense<0.000000e+00> : vector<32xf32>
    %279 = vector.multi_reduction <add>, %278, %cst_96 [1] : vector<32x128xf32> to vector<32xf32>
    %280 = vector.shape_cast %279 : vector<32xf32> to vector<32x1xf32>
    %cst_97 = arith.constant 3.125000e-02 : f32
    %281 = vector.broadcast %cst_97 : f32 to vector<32x1xf32>
    %282 = arith.mulf %280, %281 : vector<32x1xf32>
    %283 = arith.mulf %277, %277 : vector<32x1xf32>
    %284 = arith.subf %282, %283 : vector<32x1xf32>
    %285 = vector.broadcast %277 : vector<32x1xf32> to vector<32x128xf32>
    %286 = arith.subf %273, %285 : vector<32x128xf32>
    %cst_98 = arith.constant 9.99999974E-6 : f32
    %287 = vector.broadcast %cst_98 : f32 to vector<32x1xf32>
    %288 = arith.addf %284, %287 : vector<32x1xf32>
    %289 = math.rsqrt %288 : vector<32x1xf32>
    %290 = vector.broadcast %289 : vector<32x1xf32> to vector<32x128xf32>
    %291 = arith.mulf %286, %290 : vector<32x128xf32>
    %292 = vector.broadcast %12 : vector<1x128xf32> to vector<32x128xf32>
    %293 = arith.mulf %291, %292 : vector<32x128xf32>
    %294 = vector.broadcast %13 : vector<1x128xf32> to vector<32x128xf32>
    %295 = arith.addf %293, %294 : vector<32x128xf32>
    %c0_99 = arith.constant 0 : index
    %c0_100 = arith.constant 0 : index
    %296 = vector.load %arg20[%c0_99, %c0_100] : memref<32x128xf32, #tpu.memory_space<vmem>>, vector<32x128xf32>
    tpu.vector_store %arg20[%c0_99, %c0_100], %295 {strides = array<i32>} : memref<32x128xf32, #tpu.memory_space<vmem>>, vector<32x128xf32>,
    return
  }
  func.func @transform_0(%arg0: i32) -> (i32, i32) {
    %c0_i32 = arith.constant 0 : i32
    %c0_i32_0 = arith.constant 0 : i32
    return %arg0, %c0_i32 : i32, i32
  }
  func.func @transform_1(%arg0: i32) -> (i32, i32) {
    %c0_i32 = arith.constant 0 : i32
    %c0_i32_0 = arith.constant 0 : i32
    %c0_i32_1 = arith.constant 0 : i32
    return %c0_i32, %c0_i32_0 : i32, i32
  }
  func.func @transform_2(%arg0: i32) -> (i32, i32) {
    %c0_i32 = arith.constant 0 : i32
    %c0_i32_0 = arith.constant 0 : i32
    %c0_i32_1 = arith.constant 0 : i32
    return %c0_i32, %c0_i32_0 : i32, i32
  }
  func.func @transform_3(%arg0: i32) -> (i32, i32) {
    %c0_i32 = arith.constant 0 : i32
    %c0_i32_0 = arith.constant 0 : i32
    %c0_i32_1 = arith.constant 0 : i32
    return %c0_i32, %c0_i32_0 : i32, i32
  }
  func.func @transform_4(%arg0: i32) -> (i32, i32) {
    %c0_i32 = arith.constant 0 : i32
    %c0_i32_0 = arith.constant 0 : i32
    %c0_i32_1 = arith.constant 0 : i32
    return %c0_i32, %c0_i32_0 : i32, i32
  }
  func.func @transform_5(%arg0: i32) -> (i32, i32) {
    %c0_i32 = arith.constant 0 : i32
    %c0_i32_0 = arith.constant 0 : i32
    %c0_i32_1 = arith.constant 0 : i32
    return %c0_i32, %c0_i32_0 : i32, i32
  }
  func.func @transform_6(%arg0: i32) -> (i32, i32) {
    %c0_i32 = arith.constant 0 : i32
    %c0_i32_0 = arith.constant 0 : i32
    %c0_i32_1 = arith.constant 0 : i32
    return %c0_i32, %c0_i32_0 : i32, i32
  }
  func.func @transform_7(%arg0: i32) -> (i32, i32) {
    %c0_i32 = arith.constant 0 : i32
    %c0_i32_0 = arith.constant 0 : i32
    %c0_i32_1 = arith.constant 0 : i32
    return %c0_i32, %c0_i32_0 : i32, i32
  }
  func.func @transform_8(%arg0: i32) -> (i32, i32) {
    %c0_i32 = arith.constant 0 : i32
    %c0_i32_0 = arith.constant 0 : i32
    %c0_i32_1 = arith.constant 0 : i32
    return %c0_i32, %c0_i32_0 : i32, i32
  }
  func.func @transform_9(%arg0: i32) -> (i32, i32) {
    %c0_i32 = arith.constant 0 : i32
    %c0_i32_0 = arith.constant 0 : i32
    %c0_i32_1 = arith.constant 0 : i32
    return %c0_i32, %c0_i32_0 : i32, i32
  }
  func.func @transform_10(%arg0: i32) -> (i32, i32) {
    %c0_i32 = arith.constant 0 : i32
    %c0_i32_0 = arith.constant 0 : i32
    %c0_i32_1 = arith.constant 0 : i32
    return %c0_i32, %c0_i32_0 : i32, i32
  }
  func.func @transform_11(%arg0: i32) -> (i32, i32) {
    %c0_i32 = arith.constant 0 : i32
    %c0_i32_0 = arith.constant 0 : i32
    %c0_i32_1 = arith.constant 0 : i32
    return %c0_i32, %c0_i32_0 : i32, i32
  }
  func.func @transform_12(%arg0: i32) -> (i32, i32) {
    %c0_i32 = arith.constant 0 : i32
    %c0_i32_0 = arith.constant 0 : i32
    %c0_i32_1 = arith.constant 0 : i32
    return %c0_i32, %c0_i32_0 : i32, i32
  }
  func.func @transform_13(%arg0: i32) -> (i32, i32) {
    %c0_i32 = arith.constant 0 : i32
    %c0_i32_0 = arith.constant 0 : i32
    %c0_i32_1 = arith.constant 0 : i32
    return %c0_i32, %c0_i32_0 : i32, i32
  }
  func.func @transform_14(%arg0: i32) -> (i32, i32) {
    %c0_i32 = arith.constant 0 : i32
    %c0_i32_0 = arith.constant 0 : i32
    %c0_i32_1 = arith.constant 0 : i32
    return %c0_i32, %c0_i32_0 : i32, i32
  }
  func.func @transform_15(%arg0: i32) -> (i32, i32) {
    %c0_i32 = arith.constant 0 : i32
    %c0_i32_0 = arith.constant 0 : i32
    %c0_i32_1 = arith.constant 0 : i32
    return %c0_i32, %c0_i32_0 : i32, i32
  }
  func.func @transform_16(%arg0: i32) -> (i32, i32) {
    %c0_i32 = arith.constant 0 : i32
    %c0_i32_0 = arith.constant 0 : i32
    %c0_i32_1 = arith.constant 0 : i32
    return %c0_i32, %c0_i32_0 : i32, i32
  }
  func.func @transform_17(%arg0: i32) -> (i32, i32) {
    %c0_i32 = arith.constant 0 : i32
    %c0_i32_0 = arith.constant 0 : i32
    %c0_i32_1 = arith.constant 0 : i32
    return %c0_i32, %c0_i32_0 : i32, i32
  }
  func.func @transform_18(%arg0: i32) -> (i32, i32, i32) {
    %c0_i32 = arith.constant 0 : i32
    %c0_i32_0 = arith.constant 0 : i32
    %c0_i32_1 = arith.constant 0 : i32
    %c0_i32_2 = arith.constant 0 : i32
    return %c0_i32, %c0_i32_0, %c0_i32_1 : i32, i32, i32
  }
  func.func @transform_19(%arg0: i32) -> (i32, i32) {
    %c0_i32 = arith.constant 0 : i32
    %c0_i32_0 = arith.constant 0 : i32
    return %arg0, %c0_i32 : i32, i32
  }
}

</mosaic_0001>

<bundles_post_ra>
// kernel: tpu_custom_call.1
= control target key start
LH: loop header
LB: loop body
LE: loop exit
PB: predicated region body
PF: predicated region fallthrough
CT: control target
= control target key end

     0   :  { %s5190_s0 = inlined_call_operand.hbm [shape: f32[32,256], index: 0, kind: input, shape index: {}]   ;;  %s5191_s1 = inlined_call_operand.vmem [shape: f32[32,32], index: 1, kind: input, shape index: {}]   ;;  %s5192_s2 = inlined_call_operand.hbm [shape: f32[32,128], index: 2, kind: input, shape index: {}]   ;;  %s5193_s3 = inlined_call_operand.hbm [shape: bf16[256,128], index: 3, kind: input, shape index: {}]   ;;  %s5194_s4 = inlined_call_operand.hbm [shape: bf16[128,384], index: 4, kind: input, shape index: {}]   ;;  %s5195_s5 = inlined_call_operand.vmem [shape: f32[1,384], index: 5, kind: input, shape index: {}]   ;;  %s5196_s6 = inlined_call_operand.hbm [shape: bf16[128,128], index: 6, kind: input, shape index: {}]   ;;  %s5197_s7 = inlined_call_operand.vmem [shape: f32[1,128], index: 7, kind: input, shape index: {}]   ;;  %s5198_s8 = inlined_call_operand.vmem [shape: f32[1,128], index: 8, kind: input, shape index: {}]   ;;  %s5199_s9 = inlined_call_operand.vmem [shape: f32[1,128], index: 9, kind: input, shape index: {}]   ;;  %s5200_s10 = inlined_call_operand.hbm [shape: bf16[128,128], index: 10, kind: input, shape index: {}]   ;;  %s5201_s11 = inlined_call_operand.vmem [shape: f32[1,128], index: 11, kind: input, shape index: {}]   ;;  %s5202_s12 = inlined_call_operand.hbm [shape: bf16[128,128], index: 12, kind: input, shape index: {}]   ;;  %s5203_s13 = inlined_call_operand.vmem [shape: f32[1,128], index: 13, kind: input, shape index: {}]   ;;  %s5204_s14 = inlined_call_operand.vmem [shape: f32[1,128], index: 14, kind: input, shape index: {}]   ;;  %s5205_s15 = inlined_call_operand.vmem [shape: f32[1,128], index: 15, kind: input, shape index: {}]   ;;  %s5206_s16 = inlined_call_operand.hbm [shape: f32[64,128], index: 16, kind: input, shape index: {}]   ;;  %s5207_s17 = inlined_call_operand.vmem [shape: f32[1,16], index: 17, kind: input, shape index: {}]   ;;  %s5208_s18 = inlined_call_operand.vmem [shape: f32[1,32,1], index: 18, kind: input, shape index: {}]   ;;  %s5209_s19 = inlined_call_operand.hbm [shape: f32[32,128], index: 19, kind: output, shape index: {}]  }
   0x1   :  { %5215 = sst [smem:[#allocation23_spill]] %s5190_s0 }
   0x2   :  { %5216 = sst [smem:[#allocation24_spill]] %s5191_s1 }
   0x3   :  { %5217 = sst [smem:[#allocation25_spill]] %s5192_s2 }
   0x4   :  { %5218 = sst [smem:[#allocation26_spill]] %s5193_s3 }
   0x5   :  { %24 = vsyncpa [#allocation3], 0 }
   0x6   :  { %25 = vsyncpa [#allocation6], 0 }
   0x7   :  { %26 = vsyncpa [#allocation9], 0 }
   0x8   :  { %27 = vsyncpa [#allocation12], 0 }
   0x9   :  { %28 = vsyncpa [#allocation15], 0 }
   0xa   :  { %29 = vsyncpa [#allocation4], 0  ;;  %s4307_s0 = smov [#allocation5]  }
   0xb   :  { %s49_s30 = sshll.u32 %s4307_s0, 4  ;;  %s50_s30 = int_to_ptr.vmem [resolvable:$true] %s49_s30 }
   0xc   :  { %s4123_s20 = scalar_lea.vmem %s50_s30, 512  ;;  %p4128_p1 = scmp.lt.s32.totalorder %s50_s30, %s50_s30 }
   0xd   :  { %p4124_p0 = scmp.ne.s32.totalorder %s50_s30, %s4123_s20  ;;  %p4129_p2 = scmp.lt.s32.totalorder %s4123_s20, %s4123_s20 }
   0xf   :  { %p4130_p3 = por %p4129_p2, %p4128_p1 }
  0x11   :  { %p4131_p4 = pnand %p4130_p3, %p4124_p0 }
  0x13   :  { %4134 = shalt.err (!%p4131_p4)
}
  0x14   :  { %s5211_s21 = smov 128   ;;  %s5213_s1 = smov 8  }
  0x15   :  { %s5219_s23 = sld [smem:[#allocation25_spill]]  ;;  %s4310_s24 = smov [#allocation8]  }
  0x16   :  { %s73_s25 = sshll.u32 %s4310_s24, 4  ;;  %s74_s25 = int_to_ptr.vmem [resolvable:$true] %s73_s25 }
  0x17   :  { %s4143_s3 = scalar_lea.vmem %s74_s25, 3072  ;;  %p4148_p6 = scmp.lt.s32.totalorder %s74_s25, %s74_s25 }
  0x18   :  { %p4144_p5 = scmp.ne.s32.totalorder %s74_s25, %s4143_s3  ;;  %p4149_p7 = scmp.lt.s32.totalorder %s4143_s3, %s4143_s3 }
  0x1a   :  { %p4150_p8 = por %p4149_p7, %p4148_p6 }
  0x1b   :  { %55 = dma.hbm_to_vmem [thread:$0]  %s5219_s23, 512, %s50_s30, [#allocation6], %s5211_s21, %s5211_s21, %s5213_s1  }
  0x1c   :  { %p4151_p9 = pnand %p4150_p8, %p4144_p5 }
  0x1e   :  { %4154 = shalt.err (!%p4151_p9)
}
  0x1f   :  { %s4311_s26 = smov 192   ;;  %s4312_s27 = smov 12  }
  0x20   :  { %79 = dma.hbm_to_vmem [thread:$0]  %s5194_s4, 3072, %s74_s25, [#allocation9], %s4311_s26, %s4311_s26, %s4312_s27  }
  0x21   :  { %s4313_s0 = smov [#allocation11]   ;;  %s4314_s22 = smov [#allocation2]  }
  0x22   :  { %s105_s20 = sshll.u32 %s4313_s0, 4  ;;  %s35_s30 = sshll.u32 %s4314_s22, 4  ;;  %s106_s20 = int_to_ptr.vmem [resolvable:$true] %s105_s20  ;;  %s36_s30 = int_to_ptr.vmem [resolvable:$true] %s35_s30 }
  0x23   :  { %s4163_s2 = scalar_lea.vmem %s106_s20, 1024  ;;  %p4168_p11 = scmp.lt.s32.totalorder %s106_s20, %s106_s20 }
  0x24   :  { %p4164_p10 = scmp.ne.s32.totalorder %s106_s20, %s4163_s2  ;;  %p4169_p12 = scmp.lt.s32.totalorder %s4163_s2, %s4163_s2 }
  0x26   :  { %p4170_p13 = por %p4169_p12, %p4168_p11 }
  0x28   :  { %p4171_p0 = pnand %p4170_p13, %p4164_p10 }
  0x2a   :  { %4174 = shalt.err (!%p4171_p0)
}
  0x2b   :  { %s4315_s23 = smov 64   ;;  %s4316_s24 = smov 4  }
  0x2c   :  { %111 = dma.hbm_to_vmem [thread:$0]  %s5200_s10, 1024, %s106_s20, [#allocation12], %s4315_s23, %s4315_s23, %s4316_s24  }
  0x2d   :  { %s4183_s25 = scalar_lea.vmem %s36_s30, 1024  ;;  %p4188_p2 = scmp.lt.s32.totalorder %s36_s30, %s36_s30 }
  0x2e   :  { %p4184_p1 = scmp.ne.s32.totalorder %s36_s30, %s4183_s25  ;;  %p4189_p3 = scmp.lt.s32.totalorder %s4183_s25, %s4183_s25 }
  0x30   :  { %p4190_p4 = por %p4189_p3, %p4188_p2 }
  0x32   :  { %p4191_p5 = pnand %p4190_p4, %p4184_p1 }
  0x34   :  { %4194 = shalt.err (!%p4191_p5)
}
  0x35   :  { %s4317_s26 = smov 256   ;;  %s4318_s27 = smov 16  }
  0x36   :  { %s5220_s0 = sld [smem:[#allocation23_spill]]  ;;  %s4319_s22 = smov [#allocation7]  }
  0x37   :  { %s61_s2 = sshll.u32 %s4319_s22, 4  ;;  %s4320_s21 = smov [#allocation10]   ;;  %s62_s2 = int_to_ptr.vmem [resolvable:$true] %s61_s2 }
  0x38   :  { %s87_s1 = sshll.u32 %s4320_s21, 4  ;;  %s4203_s10 = scalar_lea.vmem %s62_s2, 2048  ;;  %s88_s1 = int_to_ptr.vmem [resolvable:$true] %s87_s1 }
  0x39   :  { %p4204_p6 = scmp.ne.s32.totalorder %s62_s2, %s4203_s10  ;;  %p4208_p7 = scmp.lt.s32.totalorder %s62_s2, %s62_s2 }
  0x3a   :  { %p4209_p8 = scmp.lt.s32.totalorder %s4203_s10, %s4203_s10 }
  0x3c   :  { %41 = dma.hbm_to_vmem [thread:$0]  %s5220_s0, 1024, %s36_s30, [#allocation3], %s4317_s26, %s4317_s26, %s4318_s27  }
  0x3d   :  { %p4210_p9 = por %p4209_p8, %p4208_p7 }
  0x3f   :  { %p4211_p10 = pnand %p4210_p9, %p4204_p6 }
  0x41   :  { %4214 = shalt.err (!%p4211_p10)
}
  0x42   :  { %s5221_s4 = sld [smem:[#allocation26_spill]]  ;;  %s4223_s30 = scalar_lea.vmem %s88_s1, 1024 }
  0x43   :  { %p4224_p11 = scmp.ne.s32.totalorder %s88_s1, %s4223_s30  ;;  %p4228_p12 = scmp.lt.s32.totalorder %s88_s1, %s88_s1 }
  0x44   :  { %p4229_p13 = scmp.lt.s32.totalorder %s4223_s30, %s4223_s30 }
  0x46   :  { %p4230_p0 = por %p4229_p13, %p4228_p12 }
  0x48   :  { %67 = dma.hbm_to_vmem [thread:$0]  %s5221_s4, 2048, %s62_s2, [#allocation6], %s4315_s23, %s4315_s23, %s4316_s24  }
  0x49   :  { %p4231_p1 = pnand %p4230_p0, %p4224_p11 }
  0x4b   :  { %4234 = shalt.err (!%p4231_p1)
}
  0x4c   :  { %93 = dma.hbm_to_vmem [thread:$0]  %s5196_s6, 1024, %s88_s1, [#allocation9], %s4315_s23, %s4315_s23, %s4316_s24  }
  0x4d   :  { %s4321_s26 = smov [#allocation13]   ;;  %s4322_s28 = smov [#allocation14]  }
  0x4e   :  { %s119_s27 = sshll.u32 %s4321_s26, 4  ;;  %s137_s29 = sshll.u32 %s4322_s28, 4  ;;  %s120_s27 = int_to_ptr.vmem [resolvable:$true] %s119_s27  ;;  %s138_s29 = int_to_ptr.vmem [resolvable:$true] %s137_s29 }
  0x4f   :  { %s4243_s0 = scalar_lea.vmem %s120_s27, 1024  ;;  %p4248_p3 = scmp.lt.s32.totalorder %s120_s27, %s120_s27 }
  0x50   :  { %p4244_p2 = scmp.ne.s32.totalorder %s120_s27, %s4243_s0  ;;  %p4249_p4 = scmp.lt.s32.totalorder %s4243_s0, %s4243_s0 }
  0x52   :  { %p4250_p5 = por %p4249_p4, %p4248_p3 }
  0x54   :  { %p4251_p6 = pnand %p4250_p5, %p4244_p2 }
  0x56   :  { %4254 = shalt.err (!%p4251_p6)
}
  0x57   :  { %125 = dma.hbm_to_vmem [thread:$0]  %s5202_s12, 1024, %s120_s27, [#allocation12], %s4315_s23, %s4315_s23, %s4316_s24  }
  0x58   :  { %s4263_s6 = scalar_lea.vmem %s138_s29, 1024  ;;  %p4268_p8 = scmp.lt.s32.totalorder %s138_s29, %s138_s29 }
  0x59   :  { %p4264_p7 = scmp.ne.s32.totalorder %s138_s29, %s4263_s6  ;;  %p4269_p9 = scmp.lt.s32.totalorder %s4263_s6, %s4263_s6 }
  0x5b   :  { %p4270_p10 = por %p4269_p9, %p4268_p8 }
  0x5d   :  { %p4271_p11 = pnand %p4270_p10, %p4264_p7 }
  0x5f   :  { %4274 = shalt.err (!%p4271_p11)
}
  0x60   :  { %s5222_s1 = smov 8   ;;  %s5223_s10 = smov 128  }
  0x61   :  { %143 = dma.hbm_to_vmem [thread:$0]  %s5206_s16, 1024, %s138_s29, [#allocation15], %s5223_s10, %s5223_s10, %s5222_s1  }
  0x62   :  { %4295 = dma.done.wait [#allocation3], 1024  }
  0x63   :  { %4296 = vsyncadd [#allocation3], 4294966272 }
  0x64   :  { %4297 = dma.done.wait [#allocation6], 2560  }
  0x65   :  { %4298 = vsyncadd [#allocation6], 4294964736 }
  0x66   :  { %4299 = dma.done.wait [#allocation9], 4096  }
  0x67   :  { %4300 = vsyncadd [#allocation9], 4294963200 }
  0x68   :  { %4301 = dma.done.wait [#allocation12], 2048  }
  0x69   :  { %4302 = vsyncadd [#allocation12], 4294965248 }
  0x6a   :  { %4303 = dma.done.wait [#allocation15], 1024  }
  0x6b   :  { %4304 = vsyncadd [#allocation15], 4294966272  ;;  %v3811_v0 = vld [vmem:[#allocation7 + $0x78] sm:$0xff]   ;;  %v3813_v2 = vld [vmem:[#allocation7 + $0x70] sm:$0xff]   ;;  %s5224_s23 = sld [smem:[#allocation24_spill]]  ;;  %vm370_vm0 = vcmask 261120  }
  0x6c   :  { %v3812_v1 = vld [vmem:[#allocation7 + $0x38] sm:$0xff]   ;;  %3289 = vmatprep.subr.bf16.mxu0 %v3811_v0  ;;  %v3814_v3 = vld [vmem:[#allocation7 + $0x30] sm:$0xff]   ;;  %v3815_v4 = vld [vmem:[#allocation7 + $0x68] sm:$0xff]   ;;  %v4323_v60 = vmov 0   ;;  %vm884_vm1 = vcmask 130048  }
  0x6d   :  { %3290 = vmatpush3.bf16.msra.mxu0 %v3812_v1  ;;  %v3816_v5 = vld [vmem:[#allocation7 + $0x28] sm:$0xff]   ;;  %v3817_v6 = vld [vmem:[#allocation7 + $0x60] sm:$0xff]   ;;  %v3819_v8 = vld [vmem:[#allocation7 + $0x58] sm:$0xff]   ;;  %3810 = vset.pattern.permute.xlu1 %v4323_v60 }
  0x6e   :  { %3291 = vmatprep.subr.bf16.mxu0 %v3813_v2  ;;  %v3818_v7 = vld [vmem:[#allocation7 + $0x20] sm:$0xff]   ;;  %v3820_v9 = vld [vmem:[#allocation7 + $0x18] sm:$0xff]   ;;  %v3821_v10 = vld [vmem:[#allocation7 + $0x50] sm:$0xff]   ;;  %3809 = vset.pattern.permute.xlu0 %v4323_v60 }
  0x6f   :  { %v174_v11 = vld [vmem:[#allocation2 + $0x8] sm:$0xff]  ;;  %v176_v12 = vld [vmem:[#allocation2 + $0x18] sm:$0xff]  ;;  %v3822_v14 = vld [vmem:[#allocation7 + $0x10] sm:$0xff]  }
  0x70   :  { %v182_v13 = vpack.c.bf16 %v176_v12, %v174_v11  ;;  %v3823_v15 = vld [vmem:[#allocation7 + $0x48] sm:$0xff]   ;;  %v3825_v17 = vld [vmem:[#allocation7 + $0x40] sm:$0xff]   ;;  %v175_v20 = vld [vmem:[#allocation2 + $0x10] sm:$0xff] }
  0x71   :  { %3292 = vmatpush3.bf16.msra.mxu0 %v3814_v3  ;;  %v3824_v16 = vld [vmem:[#allocation7 + $0x8] sm:$0xff]   ;;  %v3826_v18 = vld [vmem:[#allocation7] sm:$0xff]   ;;  %v180_v22 = vld [vmem:[#allocation2 + $0x38] sm:$0xff] }
  0x72   :  { %3293 = vmatprep.subr.bf16.mxu0 %v3815_v4  ;;  %345 = vmatprep.mubr.bf16.mxu0 %v182_v13  ;;  %v173_v19 = vld [vmem:[#allocation2] sm:$0xff]  ;;  %v178_v21 = vld [vmem:[#allocation2 + $0x28] sm:$0xff]  ;;  %v179_v26 = vld [vmem:[#allocation2 + $0x30] sm:$0xff] }
  0x73   :  { %v181_v23 = vpack.c.bf16 %v175_v20, %v173_v19  ;;  %v184_v24 = vpack.c.bf16 %v180_v22, %v178_v21  ;;  %v177_v25 = vld [vmem:[#allocation2 + $0x20] sm:$0xff]  ;;  %v3829_v41 = vld [vmem:[#allocation8 + $0xac] ss:$12 sps:$4 sm:$0xff]   ;;  %v3827_v43 = vld [vmem:[#allocation8 + $0xa8] ss:$12 sps:$4 sm:$0xff]   ;;  %v520_v19 = vlaneseq }
  0x74   :  { %v183_v27 = vpack.c.bf16 %v179_v26, %v177_v25  ;;  %v362_v28 = vld [vmem:[%s5224_s23] sm:$0xff]  ;;  %v363_v42 = vld [vmem:[%s5224_s23 + $0x8] sm:$0xff]  ;;  %v364_v45 = vld [vmem:[%s5224_s23 + $0x10] sm:$0xff] }
  0x75   :  { %3294 = vmatpush3.bf16.msra.mxu0 %v3816_v5  ;;  %3493 = vmatprep.mubr.msk.f32.mxu1 %vm370_vm0, %v362_v28  ;;  %v3832_v44 = vld [vmem:[#allocation8 + $0x94] ss:$12 sps:$4 sm:$0xff]   ;;  %v3830_v46 = vld [vmem:[#allocation8 + $0x90] ss:$12 sps:$4 sm:$0xff]   ;;  %v3833_v49 = vld [vmem:[#allocation8 + $0x78] ss:$12 sps:$4 sm:$0xff]  }
  0x76   :  { %3295 = vmatprep.subr.bf16.mxu0 %v3817_v6  ;;  %v365_v47 = vld [vmem:[%s5224_s23 + $0x18] sm:$0xff]  ;;  %v3838_v50 = vld [vmem:[#allocation8 + $0x64] ss:$12 sps:$4 sm:$0xff]   ;;  %v3836_v51 = vld [vmem:[#allocation8 + $0x60] ss:$12 sps:$4 sm:$0xff]   ;;  %v521_v20 = vshrl.u32 %v520_v19, 7 }
  0x77   :  { %v3835_v48 = vld [vmem:[#allocation8 + $0x7c] ss:$12 sps:$4 sm:$0xff]   ;;  %v3841_v52 = vld [vmem:[#allocation8 + $0x4c] ss:$12 sps:$4 sm:$0xff]   ;;  %v3844_v54 = vld [vmem:[#allocation8 + $0x34] ss:$12 sps:$4 sm:$0xff]  }
  0x78   :  { %v3839_v53 = vld [vmem:[#allocation8 + $0x48] ss:$12 sps:$4 sm:$0xff]   ;;  %v3842_v55 = vld [vmem:[#allocation8 + $0x30] ss:$12 sps:$4 sm:$0xff]   ;;  %v3845_v57 = vld [vmem:[#allocation8 + $0x18] ss:$12 sps:$4 sm:$0xff]  }
  0x79   :  { %3296 = vmatpush3.bf16.msra.mxu0 %v3818_v7  ;;  %v3847_v56 = vld [vmem:[#allocation8 + $0x1c] ss:$12 sps:$4 sm:$0xff]   ;;  %v3850_v58 = vld [vmem:[#allocation8 + $0x4] ss:$12 sps:$4 sm:$0xff]   ;;  %v3848_v59 = vld [vmem:[#allocation8] ss:$12 sps:$4 sm:$0xff]  }
  0x7a   :  { %3297 = vmatprep.subr.bf16.mxu0 %v3819_v8  ;;  %v3851_v61 = vld [vmem:[#allocation8 + $0xb0] ss:$12 sps:$4 sm:$0xff]   ;;  %v3852_v62 = vld [vmem:[#allocation8 + $0x98] ss:$12 sps:$4 sm:$0xff]   ;;  %v3853_v63 = vld [vmem:[#allocation8 + $0x80] ss:$12 sps:$4 sm:$0xff]  }
  0x7b   :  { %v3854_v0 = vld [vmem:[#allocation8 + $0x68] ss:$12 sps:$4 sm:$0xff]   ;;  %v3855_v1 = vld [vmem:[#allocation8 + $0x50] ss:$12 sps:$4 sm:$0xff]   ;;  %v3856_v2 = vld [vmem:[#allocation8 + $0x38] ss:$12 sps:$4 sm:$0xff]  }
  0x7c   :  { %v3857_v3 = vld [vmem:[#allocation8 + $0x20] ss:$12 sps:$4 sm:$0xff]   ;;  %v3858_v4 = vld [vmem:[#allocation8 + $0x8] ss:$12 sps:$4 sm:$0xff]   ;;  %v522_v21 = vsub.s32 0, %v521_v20 }
  0x7d   :  { %3298 = vmatpush3.bf16.msra.mxu0 %v3820_v9  ;;  %v367_v5 = vld [vmem:[#allocation5 + $0x8] sm:$0xff]  ;;  %v366_v7 = vld [vmem:[#allocation5] sm:$0xff]  ;;  %v369_v9 = vld [vmem:[#allocation5 + $0x18] sm:$0xff] }
  0x7e   :  { %3299 = vmatprep.subr.bf16.mxu0 %v3821_v10  ;;  %v368_v13 = vld [vmem:[#allocation5 + $0x10] sm:$0xff]  ;;  %v481_v22 = vld [vmem:[%s5195_s5] sm:$0x7] }
  0x7f   :  { %v4504_v25 = vld [vmem:[#allocation14] sm:$0xff] }
  0x81   :  { %3300 = vmatpush3.bf16.msra.mxu0 %v3822_v14 }
  0x82   :  { %3301 = vmatprep.subr.bf16.mxu0 %v3823_v15 }
  0x85   :  { %3302 = vmatpush3.bf16.msra.mxu0 %v3824_v16 }
  0x86   :  { %3303 = vmatprep.subr.bf16.mxu0 %v3825_v17 }
  0x89   :  { %3304 = vmatpush3.bf16.msra.mxu0 %v3826_v18 }
  0x8a   :  { %3499 = vmatprep.subr.bf16.mxu0 %v3851_v61 }
  0x8c   :  { %346 = vmatmul.mubr.bf16.vlgmr.msra.gmra.mxu0 %v181_v23  ;;  %v4502_v23 = vrot.slane %v481_v22, %v522_v21 }
  0x8d   :  { %353 = vmatprep.mubr.bf16.mxu0 %v184_v24  ;;  %3500 = vmatpush3.bf16.msra.mxu0 %v3851_v61 }
  0x8e   :  { %3501 = vmatprep.subr.bf16.mxu0 %v3852_v62 }
  0x91   :  { %3502 = vmatpush3.bf16.msra.mxu0 %v3852_v62 }
  0x92   :  { %3503 = vmatprep.subr.bf16.mxu0 %v3853_v63 }
  0x94   :  { %354 = vmatmul.mubr.bf16.gmra.mxu0 %v183_v27  ;;  %v526_v27 = vsub.s32 1, %v521_v20 }
  0x95   :  { %3504 = vmatpush3.bf16.msra.mxu0 %v3853_v63  ;;  %v4551_v63 = vld [vmem:[#allocation14 + $0x38] sm:$0xff] }
  0x96   :  { %3505 = vmatprep.subr.bf16.mxu0 %v3854_v0 }
  0x99   :  { %3506 = vmatpush3.bf16.msra.mxu0 %v3854_v0 }
  0x9a   :  { %3507 = vmatprep.subr.bf16.mxu0 %v3855_v1 }
  0x9d   :  { %3508 = vmatpush3.bf16.msra.mxu0 %v3855_v1 }
  0x9e   :  { %3509 = vmatprep.subr.bf16.mxu0 %v3856_v2 }
  0xa1   :  { %3510 = vmatpush3.bf16.msra.mxu0 %v3856_v2 }
  0xa2   :  { %3511 = vmatprep.subr.bf16.mxu0 %v3857_v3 }
  0xa5   :  { %3512 = vmatpush3.bf16.msra.mxu0 %v3857_v3 }
  0xa6   :  { %3513 = vmatprep.subr.bf16.mxu0 %v3858_v4 }
  0xa9   :  { %3514 = vmatpush3.bf16.msra.mxu0 %v3858_v4  ;;  %v4561_v4 = vld [vmem:[%s5207_s17] ss:$0 sm:$0xff] }
 0x14c   :  { %v3305_v29 = vpop.f32.mrf.mxu0 }
 0x14e   :  { %v3306_v30 = vpop.f32.mrf.mxu0 }
 0x14f   :  { %v3307_v40 = vadd.f32 %v3306_v30, %v3305_v29  ;;  %v530_v30 = vsub.s32 2, %v521_v20 }
 0x150   :  { %v3308_v31 = vpop.f32.mrf.mxu0 }
 0x152   :  { %v3309_v32 = vpop.f32.mrf.mxu0 }
 0x153   :  { %v3310_v39 = vadd.f32 %v3309_v32, %v3308_v31 }
 0x154   :  { %v3311_v33 = vpop.f32.mrf.mxu0 }
 0x156   :  { %v3312_v34 = vpop.f32.mrf.mxu0 }
 0x157   :  { %v3313_v38 = vadd.f32 %v3312_v34, %v3311_v33  ;;  %v4510_v33 = vrot.slane %v481_v22, %v526_v27 }
 0x158   :  { %v3314_v35 = vpop.f32.mrf.mxu0 }
 0x15a   :  { %v3315_v36 = vpop.f32.mrf.mxu0 }
 0x15b   :  { %v3316_v37 = vadd.f32 %v3315_v36, %v3314_v35 }
 0x15d   :  { %3485 = vmatprep.subr.mxu1 %v3316_v37 }
 0x15e   :  { %3486 = vmatpush3.msra.mxu1 %v3316_v37  ;;  %v4513_v37 = vrot.slane %v481_v22, %v530_v30 }
 0x15f   :  { %3487 = vmatprep.subr.mxu1 %v3313_v38 }
 0x160   :  { %3488 = vmatpush3.msra.mxu1 %v3313_v38 }
 0x161   :  { %3489 = vmatprep.subr.mxu1 %v3310_v39 }
 0x162   :  { %3490 = vmatpush3.msra.mxu1 %v3310_v39 }
 0x163   :  { %3491 = vmatprep.subr.mxu1 %v3307_v40 }
 0x164   :  { %3492 = vmatpush3.msra.mxu1 %v3307_v40 }
 0x165   :  { %3494 = vmatmul.mubr.msk.f32.vlgmr.msra.gmra.mxu1 %vm370_vm0, %v363_v42  ;;  %663 = vmatprep.subr.bf16.mxu1 %v3829_v41 }
 0x166   :  { %664 = vmatpush1.bf16.msra.mxu1 %v3827_v43  ;;  %3496 = vmatprep.mubr.msk.f32.mxu1 %vm370_vm0, %v364_v45 }
 0x167   :  { %665 = vmatprep.subr.bf16.mxu1 %v3832_v44 }
 0x169   :  { %3497 = vmatmul.mubr.msk.f32.gmra.mxu1 %vm370_vm0, %v365_v47 }
 0x16a   :  { %666 = vmatpush1.bf16.msra.mxu1 %v3830_v46  ;;  %695 = vmatprep.mubr.bf16.mxu1 %v4323_v60  ;;  %v4523_v46 = vld [vmem:[#allocation14 + $0x8] sm:$0xff] }
 0x16b   :  { %667 = vmatprep.subr.bf16.mxu1 %v3835_v48  ;;  %v4527_v48 = vld [vmem:[#allocation14 + $0x10] sm:$0xff] }
 0x16e   :  { %668 = vmatpush1.bf16.msra.mxu1 %v3833_v49 }
 0x16f   :  { %669 = vmatprep.subr.bf16.mxu1 %v3838_v50 }
 0x172   :  { %670 = vmatpush1.bf16.msra.mxu1 %v3836_v51 }
 0x173   :  { %671 = vmatprep.subr.bf16.mxu1 %v3841_v52 }
 0x176   :  { %672 = vmatpush1.bf16.msra.mxu1 %v3839_v53  ;;  %v4534_v53 = vld [vmem:[#allocation14 + $0x18] sm:$0xff] }
 0x177   :  { %673 = vmatprep.subr.bf16.mxu1 %v3844_v54  ;;  %v4536_v54 = vld [vmem:[#allocation14 + $0x20] sm:$0xff] }
 0x17a   :  { %674 = vmatpush1.bf16.msra.mxu1 %v3842_v55 }
 0x17b   :  { %675 = vmatprep.subr.bf16.mxu1 %v3847_v56 }
 0x17e   :  { %676 = vmatpush1.bf16.msra.mxu1 %v3845_v57 }
 0x17f   :  { %677 = vmatprep.subr.bf16.mxu1 %v3850_v58  ;;  %v4544_v58 = vld [vmem:[#allocation14 + $0x28] sm:$0xff] }
 0x182   :  { %678 = vmatpush1.bf16.msra.mxu1 %v3848_v59  ;;  %v4546_v59 = vld [vmem:[#allocation14 + $0x30] sm:$0xff] }
 0x225   :  { %v3495_v6 = vpop.f32.mrf.mxu1 }
 0x226   :  { %v4486_v10 = vadd.f32 %v3495_v6, %v367_v5 }
 0x227   :  { %v449_v8 = vpop.f32.mrf.mxu1 }
 0x228   :  { %v4488_v11 = vadd.f32 %v449_v8, %v366_v7 }
 0x229   :  { %v3498_v12 = vpop.f32.mrf.mxu1 }
 0x22a   :  { %v485_v14 = vpack.c.bf16 %v4486_v10, %v4488_v11  ;;  %v4492_v15 = vadd.f32 %v3498_v12, %v369_v9 }
 0x22b   :  { %v459_v16 = vpop.f32.mrf.mxu1 }
 0x22c   :  { %696 = vmatmul.mubr.bf16.vlgmr.msra.gmra.mxu1 %v485_v14  ;;  %3515 = vmatprep.mubr.bf16.mxu0 %v485_v14  ;;  %v4494_v17 = vadd.f32 %v459_v16, %v368_v13 }
 0x22d   :  { %705 = vmatprep.mubr.bf16.mxu1 %v4323_v60 }
 0x22e   :  { %v486_v18 = vpack.c.bf16 %v4492_v15, %v4494_v17 }
 0x230   :  { %3516 = vmatmul.mubr.bf16.vlgmr.msra.gmra.mxu0 %v486_v18 }
 0x234   :  { %706 = vmatmul.mubr.bf16.gmra.mxu1 %v486_v18 }
 0x2ec   :  { %v697_v24 = vpop.f32.mrf.mxu1 }
 0x2ed   :  { %v698_v26 = vadd.f32 %v697_v24, %v4502_v23 }
 0x2ee   :  { %v699_v28 = vpop.f32.mrf.mxu1 }
 0x2ef   :  { %v765_v29 = vmul.f32 %v698_v26, %v4504_v25  ;;  %v700_v40 = vadd.f32 %v699_v28, %v4510_v33  ;;  %v767_v52 = vmul.f32 %v698_v26, %v4527_v48  ;;  %v769_v57 = vmul.f32 %v698_v26, %v4536_v54 }
 0x2f0   :  { %v701_v31 = vpop.f32.mrf.mxu1  ;;  %v4508_v32 = vpop.f32.mrf.mxu0  ;;  %v771_v62 = vmul.f32 %v698_v26, %v4546_v59 }
 0x2f1   :  { %3523 = vmatprep.mubr.f32.mxu1 %v765_v29  ;;  %v702_v43 = vadd.f32 %v701_v31, %v4502_v23 }
 0x2f2   :  { %v703_v34 = vpop.f32.mrf.mxu1  ;;  %v750_v35 = vpop.f32.mrf.mxu0 }
 0x2f3   :  { %v704_v36 = vadd.f32 %v703_v34, %v4510_v33  ;;  %v751_v44 = vadd.f32 %v750_v35, %v4513_v37  ;;  %v766_v51 = vmul.f32 %v702_v43, %v4523_v46  ;;  %v768_v56 = vmul.f32 %v702_v43, %v4534_v53 }
 0x2f4   :  { %v4515_v38 = vpop.f32.mrf.mxu1  ;;  %v3518_v39 = vpop.f32.mrf.mxu0  ;;  %v770_v61 = vmul.f32 %v702_v43, %v4544_v58  ;;  %v772_v0 = vmul.f32 %v702_v43, %v4551_v63 }
 0x2f5   :  { %3519 = vmatprep.subr.mxu1 %v704_v36  ;;  %v4530_v49 = vadd.f32 %v3518_v39, %v4513_v37 }
 0x2f6   :  { %3520 = vmatpush3.xpose.msra.mxu1 %v704_v36  ;;  %v4518_v41 = vpop.f32.mrf.mxu1  ;;  %v753_v42 = vpop.f32.mrf.mxu0 }
 0x2f7   :  { %3521 = vmatprep.subr.mxu1 %v700_v40  ;;  %v754_v45 = vadd.f32 %v753_v42, %v4513_v37 }
 0x2f8   :  { %v4525_v47 = vpop.f32.mrf.mxu1 }
 0x2f9   :  { %3535 = vmatprep.subr.mxu0 %v754_v45 }
 0x2fa   :  { %3522 = vmatpush3.xpose.msra.mxu1 %v700_v40  ;;  %v713_v50 = vpop.f32.mrf.mxu1  ;;  %3536 = vmatpush3.msra.mxu0 %v754_v45 }
 0x2fb   :  { %3787 = vmatprep.subr.mxu1 %v754_v45  ;;  %3537 = vmatprep.subr.mxu0 %v751_v44  ;;  %v4539_v55 = vadd.f32 %v713_v50, %v4510_v33 }
 0x2fc   :  { %3538 = vmatpush3.msra.mxu0 %v751_v44 }
 0x2fd   :  { %3524 = vmatmul.mubr.f32.vlgmr.msra.gmra.mxu1 %v766_v51  ;;  %3567 = vmatprep.subr.mxu0 %v4530_v49 }
 0x2fe   :  { %3526 = vmatprep.mubr.f32.mxu1 %v767_v52  ;;  %3789 = vmatpush3.msra.mxu1 %v754_v45 }
 0x2ff   :  { %3788 = vmatprep.subr.mxu1 %v751_v44 }
 0x300   :  { %3790 = vmatpush3.msra.mxu1 %v751_v44 }
 0x301   :  { %3527 = vmatmul.mubr.f32.gmra.mxu1 %v768_v56  ;;  %3551 = vmatprep.subr.mxu1 %v4539_v55 }
 0x302   :  { %3529 = vmatprep.mubr.f32.mxu1 %v769_v57 }
 0x305   :  { %3530 = vmatmul.mubr.f32.gmra.mxu1 %v770_v61 }
 0x306   :  { %3532 = vmatprep.mubr.f32.mxu1 %v771_v62 }
 0x309   :  { %3533 = vmatmul.mubr.f32.gmra.mxu1 %v772_v0 }
 0x3bd   :  { %v4554_v1 = vpop.f32.mrf.mxu1 }
 0x3bf   :  { %v4556_v2 = vpop.f32.mrf.mxu1 }
 0x3c1   :  { %v3528_v3 = vpop.f32.mrf.mxu1 }
 0x3c2   :  { %v861_v8 = vadd.f32 %v3528_v3, %v4561_v4 }
 0x3c3   :  { %v855_v5 = vpop.f32.mrf.mxu1 }
 0x3c4   :  { %v856_v6 = vadd.f32 %v4561_v4, %v855_v5  ;;  %v894_v19 = vsel %vm884_vm1, %v861_v8, -inf }
 0x3c5   :  { %v3531_v7 = vpop.f32.mrf.mxu1 }
 0x3c6   :  { %v891_v9 = vsel %vm884_vm1, %v856_v6, -inf  ;;  %v871_v16 = vadd.f32 %v3531_v7, %v4561_v4 }
 0x3c7   :  { %v865_v12 = vpop.f32.mrf.mxu1  ;;  %892 = vmax.xlane.f32.xlu0 %v891_v9 }
 0x3c8   :  { %v866_v13 = vadd.f32 %v4561_v4, %v865_v12  ;;  %v900_v24 = vsel %vm884_vm1, %v871_v16, -inf  ;;  %v4581_v12 = vadd.f32 %v4561_v4, %v4556_v2 }
 0x3c9   :  { %v3534_v14 = vpop.f32.mrf.mxu1 }
 0x3ca   :  { %v897_v18 = vsel %vm884_vm1, %v866_v13, -inf  ;;  %v881_v22 = vadd.f32 %v3534_v14, %v4561_v4 }
 0x3cb   :  { %v875_v20 = vpop.f32.mrf.mxu1  ;;  %898 = vmax.xlane.f32.xlu1 %v897_v18  ;;  %895 = vmax.xlane.f32.xlu0 %v894_v19  ;;  %v4587_v18 = vadd.f32 %v4554_v1, %v4561_v4  ;;  %v885_v19 = vsel %vm884_vm1, %v4581_v12, -inf }
 0x3cc   :  { %v876_v21 = vadd.f32 %v4561_v4, %v875_v20  ;;  %v906_v27 = vsel %vm884_vm1, %v881_v22, -inf }
 0x3cd   :  { %v888_v2 = vsel %vm884_vm1, %v4587_v18, -inf }
 0x3ce   :  { %v903_v26 = vsel %vm884_vm1, %v876_v21, -inf }
 0x3cf   :  { %901 = vmax.xlane.f32.xlu1 %v900_v24  ;;  %904 = vmax.xlane.f32.xlu0 %v903_v26 }
 0x3d3   :  { %907 = vmax.xlane.f32.xlu1 %v906_v27 }
 0x450   :  { %v893_v28 = vpop.xlane.xlu0 %892 }
 0x451   :  { %v911_v29 = vsub.f32 %v856_v6, %v893_v28 }
 0x453   :  { %v921_v30 = vmul.f32 1.442695, %v911_v29 }
 0x454   :  { %v899_v31 = vpop.xlane.xlu1 %898  ;;  %v896_v34 = vpop.xlane.xlu0 %895 }
 0x455   :  { %3883 = vpow2.f32 %v921_v30  ;;  %v913_v35 = vsub.f32 %v866_v13, %v899_v31  ;;  %v912_v36 = vsub.f32 %v861_v8, %v896_v34 }
 0x457   :  { %v925_v39 = vmul.f32 1.442695, %v913_v35  ;;  %v923_v40 = vmul.f32 1.442695, %v912_v36  ;;  %v710_v35 = vadd.f32 %v4518_v41, %v4510_v33  ;;  %v712_v41 = vadd.f32 %v4525_v47, %v4502_v23 }
 0x458   :  { %v902_v42 = vpop.xlane.xlu1 %901  ;;  %v905_v43 = vpop.xlane.xlu0 %904 }
 0x459   :  { %3885 = vpow2.f32 %v925_v39  ;;  %v914_v44 = vsub.f32 %v871_v16, %v902_v42  ;;  %v915_v45 = vsub.f32 %v876_v21, %v905_v43  ;;  %v708_v42 = vadd.f32 %v4515_v38, %v4502_v23 }
 0x45a   :  { %3887 = vpow2.f32 %v923_v40  ;;  %v1121_v47 = vmul.f32 %v712_v41, %v4544_v58 }
 0x45b   :  { %v927_v50 = vmul.f32 1.442695, %v914_v44  ;;  %v929_v51 = vmul.f32 1.442695, %v915_v45  ;;  %v1118_v38 = vmul.f32 %v708_v42, %v4527_v48 }
 0x45c   :  { %v908_v52 = vpop.xlane.xlu1 %907 }
 0x45d   :  { %3889 = vpow2.f32 %v927_v50  ;;  %v916_v56 = vsub.f32 %v881_v22, %v908_v52  ;;  %v1117_v50 = vmul.f32 %v712_v41, %v4523_v46  ;;  %v1120_v52 = vmul.f32 %v708_v42, %v4536_v54 }
 0x45e   :  { %3891 = vpow2.f32 %v929_v51  ;;  %v1119_v51 = vmul.f32 %v712_v41, %v4534_v53 }
 0x45f   :  { %v931_v57 = vmul.f32 1.442695, %v916_v56  ;;  %v1122_v56 = vmul.f32 %v708_v42, %v4546_v59 }
 0x461   :  { %3893 = vpow2.f32 %v931_v57  ;;  %v1123_v57 = vmul.f32 %v712_v41, %v4551_v63 }
 0x462   :  { %v3884_v61 = vpop.eup %3883 }
 0x463   :  { %v939_v62 = vsel %vm884_vm1, %v3884_v61, 0.0 }
 0x464   :  { %940 = vadd.xlane.f32.xlu0 %v939_v62 }
 0x466   :  { %v3886_v0 = vpop.eup %3885 }
 0x467   :  { %v3888_v3 = vpop.eup %3887  ;;  %v945_v5 = vsel %vm884_vm1, %v3886_v0, 0.0 }
 0x468   :  { %946 = vadd.xlane.f32.xlu0 %v945_v5  ;;  %v942_v6 = vsel %vm884_vm1, %v3888_v3, 0.0 }
 0x469   :  { %943 = vadd.xlane.f32.xlu1 %v942_v6 }
 0x46a   :  { %v3890_v7 = vpop.eup %3889 }
 0x46b   :  { %v3892_v8 = vpop.eup %3891  ;;  %v948_v9 = vsel %vm884_vm1, %v3890_v7, 0.0 }
 0x46c   :  { %v951_v13 = vsel %vm884_vm1, %v3892_v8, 0.0 }
 0x46d   :  { %949 = vadd.xlane.f32.xlu1 %v948_v9  ;;  %952 = vadd.xlane.f32.xlu0 %v951_v13 }
 0x46e   :  { %v3894_v14 = vpop.eup %3893 }
 0x46f   :  { %v954_v16 = vsel %vm884_vm1, %v3894_v14, 0.0 }
 0x471   :  { %955 = vadd.xlane.f32.xlu1 %v954_v16  ;;  %886 = vmax.xlane.f32.xlu0 %v885_v19 }
 0x475   :  { %889 = vmax.xlane.f32.xlu1 %v888_v2 }
 0x4ed   :  { %v941_v20 = vpop.xlane.xlu0 %940 }
 0x4ee   :  { %3895 = vrcp.f32 %v941_v20 }
 0x4f1   :  { %v947_v21 = vpop.xlane.xlu0 %946 }
 0x4f2   :  { %v944_v22 = vpop.xlane.xlu1 %943  ;;  %3897 = vrcp.f32 %v947_v21 }
 0x4f3   :  { %3899 = vrcp.f32 %v944_v22 }
 0x4f6   :  { %v950_v24 = vpop.xlane.xlu1 %949  ;;  %v953_v26 = vpop.xlane.xlu0 %952 }
 0x4f7   :  { %3901 = vrcp.f32 %v950_v24 }
 0x4f8   :  { %3903 = vrcp.f32 %v953_v26 }
 0x4fa   :  { %v956_v1 = vpop.xlane.xlu1 %955  ;;  %v887_v5 = vpop.xlane.xlu0 %886 }
 0x4fb   :  { %v3896_v27 = vpop.eup %3895  ;;  %3905 = vrcp.f32 %v956_v1  ;;  %v909_v9 = vsub.f32 %v4581_v12, %v887_v5 }
 0x4fc   :  { %v967_v28 = vmul.f32 %v3896_v27, %v3884_v61 }
 0x4fd   :  { %v917_v19 = vmul.f32 1.442695, %v909_v9 }
 0x4fe   :  { %3542 = vmatprep.mubr.msk.f32.mxu1 %vm884_vm1, %v967_v28 }
 0x4ff   :  { %v3898_v29 = vpop.eup %3897 }
 0x500   :  { %v3900_v30 = vpop.eup %3899  ;;  %v969_v31 = vmul.f32 %v3898_v29, %v3886_v0  ;;  %v890_v0 = vpop.xlane.xlu1 %889 }
 0x501   :  { %v968_v34 = vmul.f32 %v3900_v30, %v3888_v3 }
 0x503   :  { %3543 = vmatmul.mubr.msk.f32.vlgmr.msra.gmra.mxu1 %vm884_vm1, %v968_v34 }
 0x504   :  { %v3902_v36 = vpop.eup %3901  ;;  %3552 = vmatpush3.xpose.msra.mxu1 %v4539_v55  ;;  %3545 = vmatprep.mubr.msk.f32.mxu1 %vm884_vm1, %v969_v31  ;;  %v1116_v55 = vmul.f32 %v708_v42, %v4504_v25 }
 0x505   :  { %v3904_v39 = vpop.eup %3903  ;;  %3553 = vmatprep.subr.mxu1 %v710_v35  ;;  %v970_v40 = vmul.f32 %v3902_v36, %v3890_v7  ;;  %v910_v7 = vsub.f32 %v4587_v18, %v890_v0 }
 0x506   :  { %v971_v43 = vmul.f32 %v3904_v39, %v3892_v8 }
 0x507   :  { %3546 = vmatmul.mubr.msk.f32.gmra.mxu1 %vm884_vm1, %v970_v40 }
 0x508   :  { %v3906_v44 = vpop.eup %3905  ;;  %3554 = vmatpush3.xpose.msra.mxu1 %v710_v35  ;;  %3548 = vmatprep.mubr.msk.f32.mxu1 %vm884_vm1, %v971_v43 }
 0x509   :  { %v972_v45 = vmul.f32 %v3906_v44, %v3894_v14  ;;  %v919_v14 = vmul.f32 1.442695, %v910_v7 }
 0x50b   :  { %3549 = vmatmul.mubr.msk.f32.gmra.mxu1 %vm884_vm1, %v972_v45  ;;  %3907 = vpow2.f32 %v919_v14 }
 0x50c   :  { %3555 = vmatprep.mubr.f32.mxu1 %v1116_v55  ;;  %3909 = vpow2.f32 %v917_v19 }
 0x50f   :  { %3556 = vmatmul.mubr.f32.vlgmr.msra.gmra.mxu1 %v1117_v50 }
 0x510   :  { %3558 = vmatprep.mubr.f32.mxu1 %v1118_v38 }
 0x513   :  { %3559 = vmatmul.mubr.f32.gmra.mxu1 %v1119_v51 }
 0x514   :  { %3561 = vmatprep.mubr.f32.mxu1 %v1120_v52 }
 0x517   :  { %3562 = vmatmul.mubr.f32.gmra.mxu1 %v1121_v47 }
 0x518   :  { %3564 = vmatprep.mubr.f32.mxu1 %v1122_v56  ;;  %v4643_v41 = vpop.eup %3907 }
 0x519   :  { %v4646_v55 = vpop.eup %3909  ;;  %v936_v50 = vsel %vm884_vm1, %v4643_v41, 0.0 }
 0x51a   :  { %v933_v38 = vsel %vm884_vm1, %v4646_v55, 0.0 }
 0x51b   :  { %3565 = vmatmul.mubr.f32.gmra.mxu1 %v1123_v57 }
 0x5c3   :  { %v4614_v61 = vpop.f32.mrf.mxu1 }
 0x5c5   :  { %v4616_v62 = vpop.f32.mrf.mxu1 }
 0x5c7   :  { %v4618_v3 = vpop.f32.mrf.mxu1 }
 0x5c9   :  { %v4620_v6 = vpop.f32.mrf.mxu1 }
 0x5cb   :  { %v4623_v8 = vpop.f32.mrf.mxu1 }
 0x5cd   :  { %v4626_v13 = vpop.f32.mrf.mxu1 }
 0x5cf   :  { %v3557_v16 = vpop.f32.mrf.mxu1 }
 0x5d0   :  { %v1196_v2 = vadd.f32 %v3557_v16, %v4561_v4 }
 0x5d1   :  { %v1190_v20 = vpop.f32.mrf.mxu1 }
 0x5d2   :  { %v1191_v21 = vadd.f32 %v4561_v4, %v1190_v20  ;;  %v1232_v22 = vsel %vm884_vm1, %v1196_v2, -inf }
 0x5d3   :  { %1233 = vmax.xlane.f32.xlu1 %v1232_v22  ;;  %v3560_v24 = vpop.f32.mrf.mxu1 }
 0x5d4   :  { %v1206_v18 = vadd.f32 %v3560_v24, %v4561_v4  ;;  %v1229_v12 = vsel %vm884_vm1, %v1191_v21, -inf }
 0x5d5   :  { %v1200_v26 = vpop.f32.mrf.mxu1  ;;  %1230 = vmax.xlane.f32.xlu0 %v1229_v12 }
 0x5d6   :  { %v1201_v1 = vadd.f32 %v4561_v4, %v1200_v26  ;;  %v1238_v27 = vsel %vm884_vm1, %v1206_v18, -inf }
 0x5d7   :  { %1239 = vmax.xlane.f32.xlu1 %v1238_v27  ;;  %v3563_v28 = vpop.f32.mrf.mxu1 }
 0x5d8   :  { %v1216_v29 = vadd.f32 %v3563_v28, %v4561_v4  ;;  %v1235_v30 = vsel %vm884_vm1, %v1201_v1, -inf }
 0x5d9   :  { %v1210_v31 = vpop.f32.mrf.mxu1  ;;  %1236 = vmax.xlane.f32.xlu0 %v1235_v30 }
 0x5da   :  { %v1211_v34 = vadd.f32 %v4561_v4, %v1210_v31  ;;  %v1244_v35 = vsel %vm884_vm1, %v1216_v29, -inf }
 0x5db   :  { %1245 = vmax.xlane.f32.xlu1 %v1244_v35  ;;  %v3566_v36 = vpop.f32.mrf.mxu1 }
 0x5dc   :  { %v1226_v39 = vadd.f32 %v3566_v36, %v4561_v4  ;;  %v1241_v40 = vsel %vm884_vm1, %v1211_v34, -inf }
 0x5dd   :  { %v1220_v42 = vpop.f32.mrf.mxu1  ;;  %1242 = vmax.xlane.f32.xlu0 %v1241_v40 }
 0x5de   :  { %v1221_v43 = vadd.f32 %v4561_v4, %v1220_v42  ;;  %v1250_v44 = vsel %vm884_vm1, %v1226_v39, -inf }
 0x5df   :  { %1251 = vmax.xlane.f32.xlu1 %v1250_v44 }
 0x5e0   :  { %v1247_v45 = vsel %vm884_vm1, %v1221_v43, -inf }
 0x5e1   :  { %1248 = vmax.xlane.f32.xlu0 %v1247_v45 }
 0x5e3   :  { %937 = vadd.xlane.f32.xlu1 %v936_v50 }
 0x5e5   :  { %934 = vadd.xlane.f32.xlu0 %v933_v38 }
 0x65c   :  { %v1234_v51 = vpop.xlane.xlu1 %1233 }
 0x65d   :  { %v1254_v4 = vsub.f32 %v1196_v2, %v1234_v51 }
 0x65e   :  { %v1231_v52 = vpop.xlane.xlu0 %1230 }
 0x65f   :  { %v1263_v47 = vmul.f32 1.442695, %v1254_v4  ;;  %v1253_v56 = vsub.f32 %v1191_v21, %v1231_v52 }
 0x660   :  { %v1240_v57 = vpop.xlane.xlu1 %1239 }
 0x661   :  { %3911 = vpow2.f32 %v1263_v47  ;;  %v1261_v0 = vmul.f32 1.442695, %v1253_v56  ;;  %v1256_v5 = vsub.f32 %v1206_v18, %v1240_v57 }
 0x662   :  { %v1237_v7 = vpop.xlane.xlu0 %1236 }
 0x663   :  { %3913 = vpow2.f32 %v1261_v0  ;;  %v1267_v9 = vmul.f32 1.442695, %v1256_v5  ;;  %v1255_v14 = vsub.f32 %v1201_v1, %v1237_v7  ;;  %v759_v7 = vadd.f32 %v4508_v32, %v4513_v37 }
 0x664   :  { %v1246_v16 = vpop.xlane.xlu1 %1245 }
 0x665   :  { %3915 = vpow2.f32 %v1267_v9  ;;  %v1265_v19 = vmul.f32 1.442695, %v1255_v14  ;;  %v1258_v20 = vsub.f32 %v1216_v29, %v1246_v16  ;;  %v4679_v9 = vld [vmem:[#allocation10 + $0x38] sm:$0xff]   ;;  %v4681_v14 = vld [vmem:[#allocation10 + $0x30] sm:$0xff]  }
 0x666   :  { %v1243_v22 = vpop.xlane.xlu0 %1242  ;;  %3583 = vmatprep.subr.bf16.mxu1 %v4679_v9 }
 0x667   :  { %3917 = vpow2.f32 %v1265_v19  ;;  %v1271_v24 = vmul.f32 1.442695, %v1258_v20  ;;  %v1257_v12 = vsub.f32 %v1211_v34, %v1243_v22  ;;  %3584 = vmatpush3.bf16.msra.mxu1 %v4679_v9 }
 0x668   :  { %v1252_v2 = vpop.xlane.xlu1 %1251  ;;  %3585 = vmatprep.subr.bf16.mxu1 %v4681_v14 }
 0x669   :  { %3919 = vpow2.f32 %v1271_v24  ;;  %v1269_v26 = vmul.f32 1.442695, %v1257_v12  ;;  %v1260_v21 = vsub.f32 %v1226_v39, %v1252_v2 }
 0x66a   :  { %v1249_v27 = vpop.xlane.xlu0 %1248 }
 0x66b   :  { %3921 = vpow2.f32 %v1269_v26  ;;  %v1275_v28 = vmul.f32 1.442695, %v1260_v21  ;;  %v1259_v18 = vsub.f32 %v1221_v43, %v1249_v27  ;;  %3586 = vmatpush3.bf16.msra.mxu1 %v4681_v14 }
 0x66c   :  { %v938_v30 = vpop.xlane.xlu1 %937 }
 0x66d   :  { %3923 = vpow2.f32 %v1275_v28  ;;  %v1273_v31 = vmul.f32 1.442695, %v1259_v18 }
 0x66e   :  { %v4652_v1 = vpop.eup %3911  ;;  %3925 = vrcp.f32 %v938_v30  ;;  %v935_v35 = vpop.xlane.xlu0 %934 }
 0x66f   :  { %3927 = vpow2.f32 %v1273_v31  ;;  %v1280_v29 = vsel %vm884_vm1, %v4652_v1, 0.0 }
 0x670   :  { %v3914_v34 = vpop.eup %3913  ;;  %3929 = vrcp.f32 %v935_v35  ;;  %1281 = vadd.xlane.f32.xlu1 %v1280_v29 }
 0x671   :  { %v1277_v36 = vsel %vm884_vm1, %v3914_v34, 0.0 }
 0x672   :  { %v4657_v39 = vpop.eup %3915  ;;  %1278 = vadd.xlane.f32.xlu0 %v1277_v36 }
 0x673   :  { %v1286_v40 = vsel %vm884_vm1, %v4657_v39, 0.0 }
 0x674   :  { %v3918_v42 = vpop.eup %3917  ;;  %1287 = vadd.xlane.f32.xlu1 %v1286_v40 }
 0x675   :  { %v1283_v43 = vsel %vm884_vm1, %v3918_v42, 0.0 }
 0x676   :  { %v4662_v44 = vpop.eup %3919  ;;  %1284 = vadd.xlane.f32.xlu0 %v1283_v43  ;;  %v1105_v43 = vmul.f32 %v4614_v61, %v4534_v53 }
 0x677   :  { %v1292_v45 = vsel %vm884_vm1, %v4662_v44, 0.0 }
 0x678   :  { %v3922_v50 = vpop.eup %3921  ;;  %1293 = vadd.xlane.f32.xlu1 %v1292_v45 }
 0x679   :  { %v1289_v38 = vsel %vm884_vm1, %v3922_v50, 0.0 }
 0x67a   :  { %v4667_v51 = vpop.eup %3923  ;;  %1290 = vadd.xlane.f32.xlu0 %v1289_v38  ;;  %v1107_v38 = vmul.f32 %v4618_v3, %v4544_v58  ;;  %v4717_v3 = vld [vmem:[#allocation10 + $0x20] sm:$0xff]  }
 0x67b   :  { %v3926_v4 = vpop.eup %3925  ;;  %v1298_v52 = vsel %vm884_vm1, %v4667_v51, 0.0 }
 0x67c   :  { %v3928_v47 = vpop.eup %3927  ;;  %1299 = vadd.xlane.f32.xlu1 %v1298_v52  ;;  %v966_v5 = vmul.f32 %v3926_v4, %v4643_v41  ;;  %v4686_v41 = vld [vmem:[#allocation10 + $0x28] sm:$0xff]   ;;  %v1106_v52 = vmul.f32 %v4620_v6, %v4536_v54  ;;  %v4721_v6 = vld [vmem:[#allocation10 + $0x18] sm:$0xff]  }
 0x67d   :  { %v3930_v56 = vpop.eup %3929  ;;  %v1295_v57 = vsel %vm884_vm1, %v3928_v47, 0.0  ;;  %3587 = vmatprep.subr.bf16.mxu1 %v4686_v41 }
 0x67e   :  { %1296 = vadd.xlane.f32.xlu0 %v1295_v57  ;;  %v965_v0 = vmul.f32 %v3930_v56, %v4646_v55  ;;  %3588 = vmatpush3.bf16.msra.mxu1 %v4686_v41  ;;  %v1108_v57 = vmul.f32 %v4626_v13, %v4546_v59  ;;  %v4729_v13 = vld [vmem:[#allocation10 + $0x8] sm:$0xff]  }
 0x67f   :  { %3589 = vmatprep.subr.bf16.mxu1 %v4717_v3 }
 0x680   :  { %3539 = vmatprep.mubr.msk.f32.mxu0 %vm884_vm1, %v965_v0 }
 0x681   :  { %3540 = vmatmul.mubr.msk.f32.vlgmr.msra.gmra.mxu0 %vm884_vm1, %v966_v5 }
 0x682   :  { %3568 = vmatpush3.msra.mxu0 %v4530_v49  ;;  %3590 = vmatpush3.bf16.msra.mxu1 %v4717_v3 }
 0x683   :  { %3569 = vmatprep.subr.mxu0 %v759_v7  ;;  %3591 = vmatprep.subr.bf16.mxu1 %v4721_v6 }
 0x684   :  { %3570 = vmatpush3.msra.mxu0 %v759_v7 }
 0x686   :  { %3592 = vmatpush3.bf16.msra.mxu1 %v4721_v6 }
 0x6f9   :  { %v1282_v32 = vpop.xlane.xlu1 %1281 }
 0x6fa   :  { %3931 = vrcp.f32 %v1282_v32  ;;  %v4733_v32 = vld [vmem:[#allocation10] sm:$0xff]  }
 0x6fb   :  { %v1279_v49 = vpop.xlane.xlu0 %1278 }
 0x6fc   :  { %3933 = vrcp.f32 %v1279_v49 }
 0x6fd   :  { %v1288_v55 = vpop.xlane.xlu1 %1287 }
 0x6fe   :  { %3935 = vrcp.f32 %v1288_v55 }
 0x6ff   :  { %v1285_v16 = vpop.xlane.xlu0 %1284 }
 0x700   :  { %3937 = vrcp.f32 %v1285_v16 }
 0x701   :  { %v1294_v19 = vpop.xlane.xlu1 %1293 }
 0x702   :  { %3939 = vrcp.f32 %v1294_v19 }
 0x703   :  { %v1291_v20 = vpop.xlane.xlu0 %1290 }
 0x704   :  { %3941 = vrcp.f32 %v1291_v20 }
 0x705   :  { %v1300_v22 = vpop.xlane.xlu1 %1299 }
 0x706   :  { %3943 = vrcp.f32 %v1300_v22 }
 0x707   :  { %v1297_v24 = vpop.xlane.xlu0 %1296  ;;  %v3932_v12 = vpop.eup %3931 }
 0x708   :  { %3945 = vrcp.f32 %v1297_v24  ;;  %v1310_v21 = vmul.f32 %v3932_v12, %v4652_v1 }
 0x709   :  { %v3934_v2 = vpop.eup %3933 }
 0x70a   :  { %v1309_v26 = vmul.f32 %v3934_v2, %v3914_v34 }
 0x70b   :  { %v3936_v27 = vpop.eup %3935 }
 0x70c   :  { %3571 = vmatprep.mubr.msk.f32.mxu0 %vm884_vm1, %v1309_v26  ;;  %v1312_v30 = vmul.f32 %v3936_v27, %v4657_v39 }
 0x70d   :  { %v3938_v28 = vpop.eup %3937  ;;  %3572 = vmatmul.mubr.msk.f32.vlgmr.msra.gmra.mxu0 %vm884_vm1, %v1310_v21 }
 0x70e   :  { %v1311_v18 = vmul.f32 %v3938_v28, %v3918_v42 }
 0x70f   :  { %v3940_v31 = vpop.eup %3939 }
 0x710   :  { %3574 = vmatprep.mubr.msk.f32.mxu0 %vm884_vm1, %v1311_v18  ;;  %v1314_v34 = vmul.f32 %v3940_v31, %v4662_v44 }
 0x711   :  { %v3942_v35 = vpop.eup %3941  ;;  %3575 = vmatmul.mubr.msk.f32.gmra.mxu0 %vm884_vm1, %v1312_v30 }
 0x712   :  { %v1313_v29 = vmul.f32 %v3942_v35, %v3922_v50  ;;  %v1104_v50 = vmul.f32 %v4616_v62, %v4527_v48 }
 0x713   :  { %v3944_v36 = vpop.eup %3943 }
 0x714   :  { %3577 = vmatprep.mubr.msk.f32.mxu0 %vm884_vm1, %v1313_v29  ;;  %v1316_v42 = vmul.f32 %v3944_v36, %v4667_v51 }
 0x715   :  { %v3946_v1 = vpop.eup %3945  ;;  %3578 = vmatmul.mubr.msk.f32.gmra.mxu0 %vm884_vm1, %v1314_v34 }
 0x716   :  { %v1315_v40 = vmul.f32 %v3946_v1, %v3928_v47  ;;  %v1109_v47 = vmul.f32 %v4623_v8, %v4551_v63  ;;  %v4725_v8 = vld [vmem:[#allocation10 + $0x10] sm:$0xff]  }
 0x717   :  { %3593 = vmatprep.subr.bf16.mxu1 %v4725_v8 }
 0x718   :  { %3580 = vmatprep.mubr.msk.f32.mxu0 %vm884_vm1, %v1315_v40  ;;  %3594 = vmatpush3.bf16.msra.mxu1 %v4725_v8 }
 0x719   :  { %3581 = vmatmul.mubr.msk.f32.gmra.mxu0 %vm884_vm1, %v1316_v42  ;;  %3595 = vmatprep.subr.bf16.mxu1 %v4729_v13 }
 0x71c   :  { %3596 = vmatpush3.bf16.msra.mxu1 %v4729_v13 }
 0x71d   :  { %3597 = vmatprep.subr.bf16.mxu1 %v4733_v32 }
 0x720   :  { %3598 = vmatpush3.bf16.msra.mxu1 %v4733_v32 }
 0x741   :  { %v3541_v39 = vpop.f32.mrf.mxu0 }
 0x742   :  { %v1103_v45 = vmul.f32 %v3541_v39, %v4523_v46 }
 0x743   :  { %v1063_v44 = vpop.f32.mrf.mxu0 }
 0x744   :  { %v1111_v4 = vadd.f32 %v1105_v43, %v1103_v45  ;;  %v1102_v51 = vmul.f32 %v1063_v44, %v4504_v25 }
 0x746   :  { %v1113_v56 = vadd.f32 %v1111_v4, %v1107_v38  ;;  %v1110_v61 = vadd.f32 %v1104_v50, %v1102_v51 }
 0x748   :  { %v1112_v0 = vadd.f32 %v1110_v61, %v1106_v52  ;;  %v1115_v5 = vadd.f32 %v1113_v56, %v1109_v47  ;;  %v3867_v47 = vld [vmem:[#allocation11 + $0x38] sm:$0xff]   ;;  %v3868_v56 = vld [vmem:[#allocation11 + $0x30] sm:$0xff]   ;;  %v3869_v61 = vld [vmem:[#allocation11 + $0x28] sm:$0xff]  }
 0x749   :  { %3603 = vmatprep.subr.bf16.mxu0 %v3867_v47 }
 0x74a   :  { %v1114_v62 = vadd.f32 %v1112_v0, %v1108_v57  ;;  %3604 = vmatpush3.bf16.msra.mxu0 %v3867_v47  ;;  %v3870_v57 = vld [vmem:[#allocation11 + $0x20] sm:$0xff]   ;;  %v3871_v0 = vld [vmem:[#allocation11 + $0x18] sm:$0xff]  }
 0x74b   :  { %3605 = vmatprep.subr.bf16.mxu0 %v3868_v56 }
 0x74c   :  { %v1460_v7 = vpack.c.bf16 %v1115_v5, %v1114_v62  ;;  %v3872_v5 = vld [vmem:[#allocation11 + $0x10] sm:$0xff]   ;;  %v3873_v62 = vld [vmem:[#allocation11 + $0x8] sm:$0xff]  }
 0x74e   :  { %3599 = vmatprep.mubr.bf16.mxu1 %v1460_v7  ;;  %3606 = vmatpush3.bf16.msra.mxu0 %v3868_v56  ;;  %v3874_v7 = vld [vmem:[#allocation11] sm:$0xff]  }
 0x74f   :  { %3607 = vmatprep.subr.bf16.mxu0 %v3869_v61 }
 0x752   :  { %3608 = vmatpush3.bf16.msra.mxu0 %v3869_v61 }
 0x753   :  { %3609 = vmatprep.subr.bf16.mxu0 %v3870_v57 }
 0x756   :  { %3610 = vmatpush3.bf16.msra.mxu0 %v3870_v57 }
 0x757   :  { %3611 = vmatprep.subr.bf16.mxu0 %v3871_v0 }
 0x75a   :  { %3612 = vmatpush3.bf16.msra.mxu0 %v3871_v0  ;;  %v3252_v0 = vld [vmem:[%s5199_s9] ss:$0 sm:$0xff] }
 0x75b   :  { %3613 = vmatprep.subr.bf16.mxu0 %v3872_v5 }
 0x75e   :  { %3614 = vmatpush3.bf16.msra.mxu0 %v3872_v5 }
 0x75f   :  { %3615 = vmatprep.subr.bf16.mxu0 %v3873_v62 }
 0x762   :  { %3616 = vmatpush3.bf16.msra.mxu0 %v3873_v62 }
 0x763   :  { %3617 = vmatprep.subr.bf16.mxu0 %v3874_v7 }
 0x766   :  { %3618 = vmatpush3.bf16.msra.mxu0 %v3874_v7 }
 0x7cd   :  { %v3573_v49 = vpop.f32.mrf.mxu0 }
 0x7ce   :  { %v1447_v2 = vmul.f32 %v3573_v49, %v4523_v46  ;;  %v4059_v49 = vld [vmem:[#allocation8 + $0xac] ss:$12 sps:$4 sm:$0xff]  }
 0x7cf   :  { %v1407_v55 = vpop.f32.mrf.mxu0  ;;  %2049 = vmatprep.subr.bf16.mxu0 %v4059_v49 }
 0x7d0   :  { %v1446_v26 = vmul.f32 %v1407_v55, %v4504_v25  ;;  %v3242_v25 = vld [vmem:[%s5197_s7] ss:$0 sm:$0xff] }
 0x7d1   :  { %v3576_v16 = vpop.f32.mrf.mxu0 }
 0x7d2   :  { %v1449_v22 = vmul.f32 %v3576_v16, %v4534_v53 }
 0x7d3   :  { %v1417_v19 = vpop.f32.mrf.mxu0 }
 0x7d4   :  { %v1448_v24 = vmul.f32 %v1417_v19, %v4527_v48  ;;  %v1455_v18 = vadd.f32 %v1449_v22, %v1447_v2 }
 0x7d5   :  { %v3579_v20 = vpop.f32.mrf.mxu0 }
 0x7d6   :  { %v1451_v21 = vmul.f32 %v3579_v20, %v4544_v58  ;;  %v1454_v30 = vadd.f32 %v1448_v24, %v1446_v26 }
 0x7d7   :  { %v1427_v12 = vpop.f32.mrf.mxu0 }
 0x7d8   :  { %v1450_v27 = vmul.f32 %v1427_v12, %v4536_v54  ;;  %v1457_v29 = vadd.f32 %v1455_v18, %v1451_v21 }
 0x7d9   :  { %v3582_v28 = vpop.f32.mrf.mxu0 }
 0x7da   :  { %v1453_v31 = vmul.f32 %v3582_v28, %v4551_v63  ;;  %v1456_v34 = vadd.f32 %v1454_v30, %v1450_v27 }
 0x7db   :  { %v1437_v35 = vpop.f32.mrf.mxu0 }
 0x7dc   :  { %v1452_v53 = vmul.f32 %v1437_v35, %v4546_v59  ;;  %v1459_v48 = vadd.f32 %v1457_v29, %v1453_v31 }
 0x7de   :  { %v1458_v36 = vadd.f32 %v1456_v34, %v1452_v53 }
 0x7e0   :  { %v1461_v1 = vpack.c.bf16 %v1459_v48, %v1458_v36 }
 0x7e2   :  { %3600 = vmatmul.mubr.bf16.vlgmr.msra.gmra.mxu1 %v1461_v1 }
 0x8a2   :  { %v3601_v46 = vpop.f32.mrf.mxu1 }
 0x8a3   :  { %v1575_v54 = vadd.f32 %v3601_v46, %v3242_v25 }
 0x8a4   :  { %v1566_v58 = vpop.f32.mrf.mxu1 }
 0x8a5   :  { %v4749_v40 = vadd.f32 %v1575_v54, %v4494_v17  ;;  %v1567_v63 = vadd.f32 %v3242_v25, %v1566_v58 }
 0x8a6   :  { %v3602_v42 = vpop.f32.mrf.mxu1 }
 0x8a7   :  { %v1578_v39 = vadd.f32 %v3602_v42, %v3242_v25  ;;  %1589 = vadd.xlane.f32.xlu0 %v4749_v40  ;;  %v4753_v43 = vadd.f32 %v1567_v63, %v4488_v11  ;;  %v1599_v51 = vmul.f32 %v4749_v40, %v4749_v40 }
 0x8a8   :  { %v1569_v59 = vpop.f32.mrf.mxu1 }
 0x8a9   :  { %v4756_v45 = vadd.f32 %v1578_v39, %v4492_v15  ;;  %v1570_v44 = vadd.f32 %v3242_v25, %v1569_v59  ;;  %v1597_v38 = vmul.f32 %v4753_v43, %v4753_v43 }
 0x8ab   :  { %1591 = vadd.xlane.f32.xlu1 %v4756_v45  ;;  %1585 = vadd.xlane.f32.xlu0 %v4753_v43  ;;  %v4761_v50 = vadd.f32 %v1570_v44, %v4486_v10  ;;  %v1600_v52 = vmul.f32 %v4756_v45, %v4756_v45 }
 0x8ad   :  { %v1598_v4 = vmul.f32 %v4761_v50, %v4761_v50 }
 0x8af   :  { %1587 = vadd.xlane.f32.xlu1 %v4761_v50  ;;  %1601 = vadd.xlane.f32.xlu0 %v1597_v38  ;;  %v3251_v38 = vld [vmem:[%s5198_s8] ss:$0 sm:$0xff] }
 0x8b3   :  { %1603 = vadd.xlane.f32.xlu1 %v1598_v4  ;;  %1605 = vadd.xlane.f32.xlu0 %v1599_v51 }
 0x8b7   :  { %1607 = vadd.xlane.f32.xlu1 %v1600_v52 }
 0x930   :  { %v1590_v55 = vpop.xlane.xlu0 %1589 }
 0x931   :  { %v1595_v22 = vmul.f32 0.03125, %v1590_v55 }
 0x933   :  { %v1615_v28 = vmul.f32 %v1595_v22, %v1595_v22  ;;  %v1623_v52 = vsub.f32 %v4749_v40, %v1595_v22  ;;  %v4060_v22 = vld [vmem:[#allocation8 + $0xa8] ss:$12 sps:$4 sm:$0xff]  }
 0x934   :  { %v1592_v16 = vpop.xlane.xlu1 %1591  ;;  %v1586_v19 = vpop.xlane.xlu0 %1585 }
 0x935   :  { %v1593_v20 = vmul.f32 0.03125, %v1586_v19  ;;  %v1596_v18 = vmul.f32 0.03125, %v1592_v16 }
 0x937   :  { %v1613_v2 = vmul.f32 %v1593_v20, %v1593_v20  ;;  %v1616_v25 = vmul.f32 %v1596_v18, %v1596_v18  ;;  %v1621_v39 = vsub.f32 %v4753_v43, %v1593_v20  ;;  %v1624_v43 = vsub.f32 %v4756_v45, %v1596_v18  ;;  %v4068_v18 = vld [vmem:[#allocation8 + $0x48] ss:$12 sps:$4 sm:$0xff]  }
 0x938   :  { %v1588_v24 = vpop.xlane.xlu1 %1587  ;;  %v1602_v12 = vpop.xlane.xlu0 %1601 }
 0x939   :  { %v1594_v26 = vmul.f32 0.03125, %v1588_v24  ;;  %v1609_v21 = vmul.f32 0.03125, %v1602_v12  ;;  %v4061_v24 = vld [vmem:[#allocation8 + $0x94] ss:$12 sps:$4 sm:$0xff]   ;;  %v4062_v12 = vld [vmem:[#allocation8 + $0x90] ss:$12 sps:$4 sm:$0xff]  }
 0x93b   :  { %v1617_v27 = vsub.f32 %v1609_v21, %v1613_v2  ;;  %v1614_v35 = vmul.f32 %v1594_v26, %v1594_v26  ;;  %v1622_v4 = vsub.f32 %v4761_v50, %v1594_v26  ;;  %v4063_v2 = vld [vmem:[#allocation8 + $0x7c] ss:$12 sps:$4 sm:$0xff]   ;;  %v4064_v26 = vld [vmem:[#allocation8 + $0x78] ss:$12 sps:$4 sm:$0xff]  }
 0x93c   :  { %v1604_v30 = vpop.xlane.xlu1 %1603  ;;  %v1606_v31 = vpop.xlane.xlu0 %1605  ;;  %v4065_v21 = vld [vmem:[#allocation8 + $0x64] ss:$12 sps:$4 sm:$0xff]  }
 0x93d   :  { %v1625_v29 = vadd.f32 1e-05, %v1617_v27  ;;  %v1610_v34 = vmul.f32 0.03125, %v1604_v30  ;;  %v1611_v53 = vmul.f32 0.03125, %v1606_v31  ;;  %v4066_v27 = vld [vmem:[#allocation8 + $0x60] ss:$12 sps:$4 sm:$0xff]  }
 0x93e   :  { %v4069_v30 = vld [vmem:[#allocation8 + $0x34] ss:$12 sps:$4 sm:$0xff]   ;;  %v4070_v31 = vld [vmem:[#allocation8 + $0x30] ss:$12 sps:$4 sm:$0xff]  }
 0x93f   :  { %3947 = vrsqrt.f32 %v1625_v29  ;;  %v1618_v48 = vsub.f32 %v1610_v34, %v1614_v35  ;;  %v1619_v36 = vsub.f32 %v1611_v53, %v1615_v28  ;;  %v4067_v28 = vld [vmem:[#allocation8 + $0x4c] ss:$12 sps:$4 sm:$0xff]   ;;  %v4071_v35 = vld [vmem:[#allocation8 + $0x1c] ss:$12 sps:$4 sm:$0xff]   ;;  %v4073_v34 = vld [vmem:[#allocation8 + $0x4] ss:$12 sps:$4 sm:$0xff]  }
 0x940   :  { %v1608_v1 = vpop.xlane.xlu1 %1607  ;;  %v4072_v29 = vld [vmem:[#allocation8 + $0x18] ss:$12 sps:$4 sm:$0xff]   ;;  %v4074_v53 = vld [vmem:[#allocation8] ss:$12 sps:$4 sm:$0xff]  }
 0x941   :  { %v1626_v46 = vadd.f32 1e-05, %v1618_v48  ;;  %v1627_v54 = vadd.f32 1e-05, %v1619_v36  ;;  %v1612_v58 = vmul.f32 0.03125, %v1608_v1  ;;  %v4795_v48 = vld [vmem:[#allocation13 + $0x38] sm:$0xff]  }
 0x942   :  { %3623 = vmatprep.subr.bf16.mxu1 %v4795_v48  ;;  %v3876_v36 = vld [vmem:[#allocation13 + $0x30] sm:$0xff]   ;;  %v3877_v1 = vld [vmem:[#allocation13 + $0x28] sm:$0xff]  }
 0x943   :  { %3949 = vrsqrt.f32 %v1626_v46  ;;  %v1620_v63 = vsub.f32 %v1612_v58, %v1616_v25  ;;  %3624 = vmatpush3.bf16.msra.mxu1 %v4795_v48  ;;  %v3878_v25 = vld [vmem:[#allocation13 + $0x20] sm:$0xff]   ;;  %v3879_v46 = vld [vmem:[#allocation13 + $0x18] sm:$0xff]   ;;  %v3881_v58 = vld [vmem:[#allocation13 + $0x8] sm:$0xff]  }
 0x944   :  { %3951 = vrsqrt.f32 %v1627_v54  ;;  %3625 = vmatprep.subr.bf16.mxu1 %v3876_v36  ;;  %v3880_v54 = vld [vmem:[#allocation13 + $0x10] sm:$0xff]  }
 0x945   :  { %v1628_v42 = vadd.f32 1e-05, %v1620_v63  ;;  %v3882_v63 = vld [vmem:[#allocation13] sm:$0xff]  }
 0x947   :  { %3953 = vrsqrt.f32 %v1628_v42  ;;  %3626 = vmatpush3.bf16.msra.mxu1 %v3876_v36  ;;  %v4075_v42 = vld [vmem:[#allocation8 + $0xb0] ss:$12 sps:$4 sm:$0xff]  }
 0x948   :  { %3627 = vmatprep.subr.bf16.mxu1 %v3877_v1 }
 0x94b   :  { %3628 = vmatpush3.bf16.msra.mxu1 %v3877_v1 }
 0x94c   :  { %v3948_v59 = vpop.eup %3947  ;;  %3629 = vmatprep.subr.bf16.mxu1 %v3878_v25 }
 0x94d   :  { %v1633_v44 = vmul.f32 %v3948_v59, %v1621_v39  ;;  %v3253_v39 = vld [vmem:[%s5201_s11] ss:$0 sm:$0xff] }
 0x94f   :  { %v1643_v61 = vmul.f32 %v3251_v38, %v1633_v44  ;;  %3630 = vmatpush3.bf16.msra.mxu1 %v3878_v25 }
 0x950   :  { %v3950_v51 = vpop.eup %3949  ;;  %3631 = vmatprep.subr.bf16.mxu1 %v3879_v46 }
 0x951   :  { %v3952_v47 = vpop.eup %3951  ;;  %v1634_v56 = vmul.f32 %v3950_v51, %v1622_v4  ;;  %v4782_v49 = vadd.f32 %v3252_v0, %v1643_v61 }
 0x952   :  { %v1635_v57 = vmul.f32 %v3952_v47, %v1623_v52 }
 0x953   :  { %v1644_v5 = vmul.f32 %v3251_v38, %v1634_v56  ;;  %3632 = vmatpush3.bf16.msra.mxu1 %v3879_v46 }
 0x954   :  { %v3954_v62 = vpop.eup %3953  ;;  %v1645_v50 = vmul.f32 %v3251_v38, %v1635_v57  ;;  %3633 = vmatprep.subr.bf16.mxu1 %v3880_v54 }
 0x955   :  { %v1636_v7 = vmul.f32 %v3954_v62, %v1624_v43  ;;  %v4784_v55 = vadd.f32 %v3252_v0, %v1644_v5 }
 0x956   :  { %v4788_v19 = vadd.f32 %v3252_v0, %v1645_v50 }
 0x957   :  { %v1657_v40 = vpack.c.bf16 %v4784_v55, %v4782_v49  ;;  %v1646_v16 = vmul.f32 %v3251_v38, %v1636_v7  ;;  %3634 = vmatpush3.bf16.msra.mxu1 %v3880_v54 }
 0x958   :  { %3635 = vmatprep.subr.bf16.mxu1 %v3881_v58 }
 0x959   :  { %3619 = vmatprep.mubr.bf16.mxu0 %v1657_v40  ;;  %v4790_v20 = vadd.f32 %v3252_v0, %v1646_v16 }
 0x95b   :  { %v1658_v45 = vpack.c.bf16 %v4790_v20, %v4788_v19  ;;  %3636 = vmatpush3.bf16.msra.mxu1 %v3881_v58 }
 0x95c   :  { %3637 = vmatprep.subr.bf16.mxu1 %v3882_v63 }
 0x95d   :  { %3620 = vmatmul.mubr.bf16.vlgmr.msra.gmra.mxu0 %v1658_v45 }
 0x95e   :  { %2050 = vmatpush1.bf16.msra.mxu0 %v4060_v22  ;;  %2081 = vmatprep.mubr.bf16.mxu0 %v4323_v60 }
 0x95f   :  { %2051 = vmatprep.subr.bf16.mxu0 %v4061_v24  ;;  %3638 = vmatpush3.bf16.msra.mxu1 %v3882_v63 }
 0x960   :  { %3643 = vmatprep.subr.bf16.mxu1 %v4075_v42 }
 0x962   :  { %2052 = vmatpush1.bf16.msra.mxu0 %v4062_v12 }
 0x963   :  { %2053 = vmatprep.subr.bf16.mxu0 %v4063_v2 }
 0x966   :  { %2054 = vmatpush1.bf16.msra.mxu0 %v4064_v26 }
 0x967   :  { %2055 = vmatprep.subr.bf16.mxu0 %v4065_v21 }
 0x96a   :  { %2056 = vmatpush1.bf16.msra.mxu0 %v4066_v27 }
 0x96b   :  { %2057 = vmatprep.subr.bf16.mxu0 %v4067_v28 }
 0x96e   :  { %2058 = vmatpush1.bf16.msra.mxu0 %v4068_v18 }
 0x96f   :  { %2059 = vmatprep.subr.bf16.mxu0 %v4069_v30 }
 0x972   :  { %2060 = vmatpush1.bf16.msra.mxu0 %v4070_v31 }
 0x973   :  { %2061 = vmatprep.subr.bf16.mxu0 %v4071_v35 }
 0x976   :  { %2062 = vmatpush1.bf16.msra.mxu0 %v4072_v29 }
 0x977   :  { %2063 = vmatprep.subr.bf16.mxu0 %v4073_v34 }
 0x97a   :  { %2064 = vmatpush1.bf16.msra.mxu0 %v4074_v53 }
 0xa1d   :  { %v3621_v59 = vpop.f32.mrf.mxu0 }
 0xa1e   :  { %v1772_v44 = vadd.f32 %v3621_v59, %v3253_v39 }
 0xa1f   :  { %v1763_v38 = vpop.f32.mrf.mxu0 }
 0xa20   :  { %v1784_v4 = vmul.f32 0.044715, %v1772_v44  ;;  %v1764_v51 = vadd.f32 %v3253_v39, %v1763_v38  ;;  %v1780_v58 = vmul.f32 0.5, %v1772_v44 }
 0xa21   :  { %v3622_v52 = vpop.f32.mrf.mxu0 }
 0xa22   :  { %v1788_v47 = vmul.f32 %v1784_v4, %v1772_v44  ;;  %v1782_v56 = vmul.f32 0.044715, %v1764_v51  ;;  %v1775_v61 = vadd.f32 %v3622_v52, %v3253_v39  ;;  %v1778_v25 = vmul.f32 0.5, %v1764_v51 }
 0xa23   :  { %v1766_v57 = vpop.f32.mrf.mxu0 }
 0xa24   :  { %v1792_v0 = vmul.f32 %v1788_v47, %v1772_v44  ;;  %v1786_v43 = vmul.f32 %v1782_v56, %v1764_v51  ;;  %v1785_v5 = vmul.f32 0.044715, %v1775_v61  ;;  %v1767_v62 = vadd.f32 %v3253_v39, %v1766_v57  ;;  %v4076_v47 = vld [vmem:[#allocation8 + $0x98] ss:$12 sps:$4 sm:$0xff]   ;;  %v4077_v56 = vld [vmem:[#allocation8 + $0x80] ss:$12 sps:$4 sm:$0xff]  }
 0xa25   :  { %v1781_v36 = vmul.f32 0.5, %v1775_v61  ;;  %v4081_v57 = vld [vmem:[#allocation8 + $0x20] ss:$12 sps:$4 sm:$0xff]  }
 0xa26   :  { %v1796_v7 = vadd.f32 %v1792_v0, %v1772_v44  ;;  %v1790_v50 = vmul.f32 %v1786_v43, %v1764_v51  ;;  %v1789_v40 = vmul.f32 %v1785_v5, %v1775_v61  ;;  %v1783_v16 = vmul.f32 0.044715, %v1767_v62  ;;  %v4080_v44 = vld [vmem:[#allocation8 + $0x38] ss:$12 sps:$4 sm:$0xff]   ;;  %v4082_v0 = vld [vmem:[#allocation8 + $0x8] ss:$12 sps:$4 sm:$0xff]  }
 0xa27   :  { %v1779_v46 = vmul.f32 0.5, %v1767_v62 }
 0xa28   :  { %v1793_v45 = vmul.f32 %v1789_v40, %v1775_v61  ;;  %v1787_v22 = vmul.f32 %v1783_v16, %v1767_v62  ;;  %v1794_v24 = vadd.f32 %v1790_v50, %v1764_v51  ;;  %v1800_v12 = vmul.f32 0.7978846, %v1796_v7  ;;  %v4079_v51 = vld [vmem:[#allocation8 + $0x50] ss:$12 sps:$4 sm:$0xff]  }
 0xa2a   :  { %v1797_v2 = vadd.f32 %v1793_v45, %v1775_v61  ;;  %v1791_v26 = vmul.f32 %v1787_v22, %v1767_v62  ;;  %v1798_v21 = vmul.f32 0.7978846, %v1794_v24  ;;  %v4078_v61 = vld [vmem:[#allocation8 + $0x68] ss:$12 sps:$4 sm:$0xff]  }
 0xa2c   :  { %v1801_v27 = vmul.f32 0.7978846, %v1797_v2  ;;  %v1795_v28 = vadd.f32 %v1791_v26, %v1767_v62  ;;  %3955 = vtanh.f32 %v1798_v21  ;;  %v2011_v21 = vld [vmem:[%s5208_s18] sm:$0xff] }
 0xa2d   :  { %3957 = vtanh.f32 %v1800_v12 }
 0xa2e   :  { %3959 = vtanh.f32 %v1801_v27  ;;  %v1799_v18 = vmul.f32 0.7978846, %v1795_v28  ;;  %v2013_v27 = vld [vmem:[%s5208_s18 + $0x10] sm:$0xff]  ;;  %v2014_v28 = vld [vmem:[%s5208_s18 + $0x18] sm:$0xff] }
 0xa30   :  { %3961 = vtanh.f32 %v1799_v18 }
 0xa39   :  { %v3956_v30 = vpop.eup %3955 }
 0xa3a   :  { %v3958_v31 = vpop.eup %3957  ;;  %v1806_v29 = vadd.f32 1.0, %v3956_v30 }
 0xa3b   :  { %v3960_v35 = vpop.eup %3959  ;;  %v1808_v1 = vadd.f32 1.0, %v3958_v31 }
 0xa3c   :  { %v1809_v34 = vadd.f32 1.0, %v3960_v35  ;;  %v1810_v39 = vmul.f32 %v1806_v29, %v1778_v25 }
 0xa3d   :  { %v3962_v53 = vpop.eup %3961  ;;  %v1812_v38 = vmul.f32 %v1808_v1, %v1780_v58 }
 0xa3e   :  { %v1807_v54 = vadd.f32 1.0, %v3962_v53  ;;  %v1813_v63 = vmul.f32 %v1809_v34, %v1781_v36 }
 0xa40   :  { %v1811_v59 = vmul.f32 %v1807_v54, %v1779_v46  ;;  %v1815_v52 = vpack.c.bf16 %v1813_v63, %v1812_v38 }
 0xa42   :  { %v1814_v4 = vpack.c.bf16 %v1811_v59, %v1810_v39 }
 0xa44   :  { %3639 = vmatprep.mubr.bf16.mxu1 %v1814_v4 }
 0xa45   :  { %3640 = vmatmul.mubr.bf16.vlgmr.msra.gmra.mxu1 %v1815_v52 }
 0xa46   :  { %3644 = vmatpush3.bf16.msra.mxu1 %v4075_v42  ;;  %v3262_v42 = vld [vmem:[%s5203_s13] ss:$0 sm:$0xff] }
 0xa47   :  { %3645 = vmatprep.subr.bf16.mxu1 %v4076_v47 }
 0xa4a   :  { %3646 = vmatpush3.bf16.msra.mxu1 %v4076_v47 }
 0xa4b   :  { %3647 = vmatprep.subr.bf16.mxu1 %v4077_v56 }
 0xa4e   :  { %3648 = vmatpush3.bf16.msra.mxu1 %v4077_v56 }
 0xa4f   :  { %3649 = vmatprep.subr.bf16.mxu1 %v4078_v61 }
 0xa52   :  { %3650 = vmatpush3.bf16.msra.mxu1 %v4078_v61 }
 0xa53   :  { %3651 = vmatprep.subr.bf16.mxu1 %v4079_v51 }
 0xa56   :  { %3652 = vmatpush3.bf16.msra.mxu1 %v4079_v51 }
 0xa57   :  { %3653 = vmatprep.subr.bf16.mxu1 %v4080_v44 }
 0xa5a   :  { %3654 = vmatpush3.bf16.msra.mxu1 %v4080_v44 }
 0xa5b   :  { %3655 = vmatprep.subr.bf16.mxu1 %v4081_v57 }
 0xa5e   :  { %3656 = vmatpush3.bf16.msra.mxu1 %v4081_v57 }
 0xa5f   :  { %3657 = vmatprep.subr.bf16.mxu1 %v4082_v0 }
 0xa62   :  { %3658 = vmatpush3.bf16.msra.mxu1 %v4082_v0 }
 0xb05   :  { %v3641_v43 = vpop.f32.mrf.mxu1 }
 0xb06   :  { %v1929_v5 = vadd.f32 %v3641_v43, %v3262_v42 }
 0xb07   :  { %v1920_v62 = vpop.f32.mrf.mxu1 }
 0xb08   :  { %v4806_v7 = vadd.f32 %v1929_v5, %v4788_v19  ;;  %v1921_v50 = vadd.f32 %v3262_v42, %v1920_v62 }
 0xb09   :  { %v3642_v40 = vpop.f32.mrf.mxu1 }
 0xb0a   :  { %v1932_v16 = vadd.f32 %v3642_v40, %v3262_v42  ;;  %1943 = vadd.xlane.f32.xlu0 %v4806_v7  ;;  %v1935_v22 = vadd.f32 %v1921_v50, %v4782_v49  ;;  %v1953_v49 = vmul.f32 %v4806_v7, %v4806_v7  ;;  %v3271_v40 = vld [vmem:[%s5204_s14] ss:$0 sm:$0xff] }
 0xb0b   :  { %v1923_v45 = vpop.f32.mrf.mxu1 }
 0xb0c   :  { %v4811_v24 = vadd.f32 %v1932_v16, %v4790_v20  ;;  %v1924_v12 = vadd.f32 %v3262_v42, %v1923_v45  ;;  %v1951_v19 = vmul.f32 %v1935_v22, %v1935_v22 }
 0xb0e   :  { %1945 = vadd.xlane.f32.xlu1 %v4811_v24  ;;  %1939 = vadd.xlane.f32.xlu0 %v1935_v22  ;;  %v4815_v2 = vadd.f32 %v1924_v12, %v4784_v55  ;;  %v1954_v26 = vmul.f32 %v4811_v24, %v4811_v24  ;;  %v2012_v55 = vld [vmem:[%s5208_s18 + $0x8] sm:$0xff] }
 0xb10   :  { %v1952_v20 = vmul.f32 %v4815_v2, %v4815_v2 }
 0xb12   :  { %1941 = vadd.xlane.f32.xlu1 %v4815_v2  ;;  %1955 = vadd.xlane.f32.xlu0 %v1951_v19 }
 0xb16   :  { %1961 = vadd.xlane.f32.xlu1 %v1954_v26  ;;  %1959 = vadd.xlane.f32.xlu0 %v1953_v49  ;;  %v3272_v49 = vld [vmem:[%s5205_s15] ss:$0 sm:$0xff] }
 0xb1a   :  { %1957 = vadd.xlane.f32.xlu1 %v1952_v20 }
 0xb2b   :  { %2026 = vperm.xlu1 %3810, %v2012_v55  }
 0xb2c   :  { %2021 = vperm.xlu0 %3809, %v2011_v21  }
 0xb2f   :  { %2031 = vperm.xlu1 %3810, %v2013_v27  }
 0xb33   :  { %2036 = vperm.xlu1 %3810, %v2014_v28  }
 0xb93   :  { %v1944_v18 = vpop.xlane.xlu0 %1943 }
 0xb94   :  { %v1949_v29 = vmul.f32 0.03125, %v1944_v18 }
 0xb96   :  { %v1969_v54 = vmul.f32 %v1949_v29, %v1949_v29  ;;  %v1977_v26 = vsub.f32 %v4806_v7, %v1949_v29 }
 0xb97   :  { %v1946_v30 = vpop.xlane.xlu1 %1945  ;;  %v1940_v31 = vpop.xlane.xlu0 %1939 }
 0xb98   :  { %v1947_v35 = vmul.f32 0.03125, %v1940_v31  ;;  %v1950_v34 = vmul.f32 0.03125, %v1946_v30 }
 0xb9a   :  { %v1967_v1 = vmul.f32 %v1947_v35, %v1947_v35  ;;  %v1970_v58 = vmul.f32 %v1950_v34, %v1950_v34  ;;  %v1975_v5 = vsub.f32 %v1935_v22, %v1947_v35  ;;  %v1978_v45 = vsub.f32 %v4811_v24, %v1950_v34 }
 0xb9b   :  { %v1942_v53 = vpop.xlane.xlu1 %1941  ;;  %v1956_v36 = vpop.xlane.xlu0 %1955 }
 0xb9c   :  { %v1963_v25 = vmul.f32 0.03125, %v1956_v36  ;;  %v1948_v59 = vmul.f32 0.03125, %v1942_v53 }
 0xb9e   :  { %v1971_v46 = vsub.f32 %v1963_v25, %v1967_v1  ;;  %v1968_v51 = vmul.f32 %v1948_v59, %v1948_v59  ;;  %v1976_v27 = vsub.f32 %v4815_v2, %v1948_v59 }
 0xb9f   :  { %v1962_v63 = vpop.xlane.xlu1 %1961  ;;  %v1960_v39 = vpop.xlane.xlu0 %1959 }
 0xba0   :  { %v1979_v38 = vadd.f32 1e-05, %v1971_v46  ;;  %v1966_v4 = vmul.f32 0.03125, %v1962_v63  ;;  %v1965_v52 = vmul.f32 0.03125, %v1960_v39 }
 0xba2   :  { %3963 = vrsqrt.f32 %v1979_v38  ;;  %v1974_v47 = vsub.f32 %v1966_v4, %v1970_v58  ;;  %v1973_v56 = vsub.f32 %v1965_v52, %v1969_v54 }
 0xba3   :  { %v1958_v61 = vpop.xlane.xlu1 %1957 }
 0xba4   :  { %v1982_v44 = vadd.f32 1e-05, %v1974_v47  ;;  %v1981_v57 = vadd.f32 1e-05, %v1973_v56  ;;  %v1964_v0 = vmul.f32 0.03125, %v1958_v61 }
 0xba6   :  { %3965 = vrsqrt.f32 %v1982_v44  ;;  %v1972_v42 = vsub.f32 %v1964_v0, %v1968_v51  ;;  %v4869_v51 = vld [vmem:[#allocation14] sm:$0xff] }
 0xba7   :  { %3967 = vrsqrt.f32 %v1981_v57  ;;  %v2027_v62 = vpop.permute.xlu1 %2026  ;;  %v2022_v25 = vpop.permute.xlu0 %2021 }
 0xba8   :  { %v1980_v43 = vadd.f32 1e-05, %v1972_v42 }
 0xbaa   :  { %3969 = vrsqrt.f32 %v1980_v43 }
 0xbab   :  { %v2032_v55 = vpop.permute.xlu1 %2031 }
 0xbaf   :  { %v3964_v50 = vpop.eup %3963  ;;  %v2037_v36 = vpop.permute.xlu1 %2036 }
 0xbb0   :  { %v1987_v16 = vmul.f32 %v3964_v50, %v1975_v5 }
 0xbb2   :  { %v1997_v12 = vmul.f32 %v3271_v40, %v1987_v16 }
 0xbb3   :  { %v3966_v19 = vpop.eup %3965 }
 0xbb4   :  { %v3968_v20 = vpop.eup %3967  ;;  %v1990_v22 = vmul.f32 %v3966_v19, %v1978_v45  ;;  %v2007_v28 = vadd.f32 %v3272_v49, %v1997_v12 }
 0xbb5   :  { %v1989_v21 = vmul.f32 %v3968_v20, %v1977_v26 }
 0xbb6   :  { %v2000_v18 = vmul.f32 %v3271_v40, %v1990_v22  ;;  %v2015_v7 = vsub.f32 %v2007_v28, %v4488_v11  ;;  %v4885_v22 = vld [vmem:[#allocation14 + $0x10] sm:$0xff]  ;;  %v4889_v28 = vld [vmem:[#allocation14 + $0x18] sm:$0xff] }
 0xbb7   :  { %v3970_v30 = vpop.eup %3969  ;;  %v1999_v31 = vmul.f32 %v3271_v40, %v1989_v21 }
 0xbb8   :  { %v1988_v35 = vmul.f32 %v3970_v30, %v1976_v27  ;;  %v2010_v24 = vadd.f32 %v3272_v49, %v2000_v18  ;;  %v2039_v63 = vmul.f32 %v2022_v25, %v2015_v7  ;;  %v4892_v30 = vld [vmem:[#allocation14 + $0x20] sm:$0xff] }
 0xbb9   :  { %v2009_v34 = vadd.f32 %v3272_v49, %v1999_v31 }
 0xbba   :  { %v1998_v53 = vmul.f32 %v3271_v40, %v1988_v35  ;;  %v2018_v29 = vsub.f32 %v2010_v24, %v4492_v15  ;;  %v4859_v52 = vadd.f32 %v2039_v63, %v4488_v11  ;;  %v4895_v35 = vld [vmem:[#allocation14 + $0x28] sm:$0xff] }
 0xbbb   :  { %v2017_v1 = vsub.f32 %v2009_v34, %v4494_v17  ;;  %v4900_v34 = vld [vmem:[#allocation14 + $0x30] sm:$0xff] }
 0xbbc   :  { %v2008_v46 = vadd.f32 %v3272_v49, %v1998_v53  ;;  %v2042_v58 = vmul.f32 %v2037_v36, %v2018_v29  ;;  %v4881_v49 = vld [vmem:[#allocation14 + $0x8] sm:$0xff]  ;;  %v4904_v29 = vld [vmem:[#allocation14 + $0x38] sm:$0xff] }
 0xbbd   :  { %v2041_v54 = vmul.f32 %v2032_v55, %v2017_v1 }
 0xbbe   :  { %v2016_v2 = vsub.f32 %v2008_v46, %v4486_v10  ;;  %v4853_v38 = vadd.f32 %v2042_v58, %v4492_v15 }
 0xbbf   :  { %v4850_v59 = vadd.f32 %v2041_v54, %v4494_v17 }
 0xbc0   :  { %v2040_v39 = vmul.f32 %v2027_v62, %v2016_v2 }
 0xbc1   :  { %v2048_v56 = vpack.c.bf16 %v4853_v38, %v4850_v59 }
 0xbc2   :  { %v4856_v4 = vadd.f32 %v2040_v39, %v4486_v10 }
 0xbc4   :  { %v2047_v47 = vpack.c.bf16 %v4856_v4, %v4859_v52 }
 0xbc6   :  { %2082 = vmatmul.mubr.bf16.vlgmr.msra.gmra.mxu0 %v2047_v47  ;;  %3659 = vmatprep.mubr.bf16.mxu1 %v2047_v47 }
 0xbc7   :  { %3660 = vmatmul.mubr.bf16.vlgmr.msra.gmra.mxu1 %v2048_v56  ;;  %2091 = vmatprep.mubr.bf16.mxu0 %v4323_v60 }
 0xbce   :  { %2092 = vmatmul.mubr.bf16.gmra.mxu0 %v2048_v56 }
 0xc86   :  { %v2083_v15 = vpop.f32.mrf.mxu0 }
 0xc87   :  { %v2084_v17 = vadd.f32 %v2083_v15, %v4502_v23  ;;  %v4867_v10 = vpop.f32.mrf.mxu1 }
 0xc88   :  { %v2085_v61 = vpop.f32.mrf.mxu0 }
 0xc89   :  { %v2136_v11 = vpop.f32.mrf.mxu1  ;;  %v2151_v44 = vmul.f32 %v4869_v51, %v2084_v17  ;;  %v2086_v50 = vadd.f32 %v2085_v61, %v4510_v33  ;;  %v2153_v21 = vmul.f32 %v4885_v22, %v2084_v17  ;;  %v2155_v31 = vmul.f32 %v4892_v30, %v2084_v17 }
 0xc8a   :  { %v2087_v57 = vpop.f32.mrf.mxu0  ;;  %v2137_v40 = vadd.f32 %v2136_v11, %v4513_v37  ;;  %v2157_v53 = vmul.f32 %v4900_v34, %v2084_v17 }
 0xc8b   :  { %v3662_v0 = vpop.f32.mrf.mxu1  ;;  %3667 = vmatprep.mubr.f32.mxu0 %v2151_v44  ;;  %v2088_v45 = vadd.f32 %v2087_v57, %v4502_v23 }
 0xc8c   :  { %v2089_v42 = vpop.f32.mrf.mxu0  ;;  %v4878_v12 = vadd.f32 %v3662_v0, %v4513_v37 }
 0xc8d   :  { %v2090_v43 = vadd.f32 %v2089_v42, %v4510_v33  ;;  %v2139_v5 = vpop.f32.mrf.mxu1  ;;  %v2152_v20 = vmul.f32 %v4881_v49, %v2088_v45  ;;  %v2154_v18 = vmul.f32 %v4889_v28, %v2088_v45  ;;  %v2158_v36 = vmul.f32 %v4904_v29, %v2088_v45 }
 0xc8e   :  { %v2140_v60 = vadd.f32 %v2139_v5, %v4513_v37  ;;  %v2093_v62 = vpop.f32.mrf.mxu0 }
 0xc8f   :  { %3663 = vmatprep.subr.mxu0 %v2090_v43  ;;  %v2094_v24 = vadd.f32 %v2093_v62, %v4502_v23 }
 0xc90   :  { %v2095_v16 = vpop.f32.mrf.mxu0  ;;  %3664 = vmatpush3.xpose.msra.mxu0 %v2090_v43  ;;  %3679 = vmatprep.subr.mxu1 %v2140_v60 }
 0xc91   :  { %3665 = vmatprep.subr.mxu0 %v2086_v50  ;;  %3680 = vmatpush3.msra.mxu1 %v2140_v60  ;;  %v2096_v27 = vadd.f32 %v2095_v16, %v4510_v33  ;;  %v2495_v1 = vmul.f32 %v4869_v51, %v2094_v24  ;;  %v2497_v46 = vmul.f32 %v4885_v22, %v2094_v24 }
 0xc92   :  { %v2097_v19 = vpop.f32.mrf.mxu0  ;;  %3681 = vmatprep.subr.mxu1 %v2137_v40  ;;  %v2501_v2 = vmul.f32 %v4900_v34, %v2094_v24 }
 0xc93   :  { %3682 = vmatpush3.msra.mxu1 %v2137_v40  ;;  %v2098_v7 = vadd.f32 %v2097_v19, %v4502_v23  ;;  %v2499_v23 = vmul.f32 %v4892_v30, %v2094_v24 }
 0xc94   :  { %v2099_v26 = vpop.f32.mrf.mxu0  ;;  %3666 = vmatpush3.xpose.msra.mxu0 %v2086_v50  ;;  %3711 = vmatprep.subr.mxu1 %v4878_v12 }
 0xc95   :  { %v2100_v55 = vadd.f32 %v2099_v26, %v4510_v33  ;;  %v2156_v33 = vmul.f32 %v4895_v35, %v2088_v45  ;;  %v2496_v25 = vmul.f32 %v4881_v49, %v2098_v7  ;;  %v2498_v54 = vmul.f32 %v4889_v28, %v2098_v7 }
 0xc96   :  { %v2500_v58 = vmul.f32 %v4895_v35, %v2098_v7 }
 0xc97   :  { %3668 = vmatmul.mubr.f32.vlgmr.msra.gmra.mxu0 %v2152_v20  ;;  %3695 = vmatprep.subr.mxu0 %v2100_v55 }
 0xc98   :  { %3670 = vmatprep.mubr.f32.mxu0 %v2153_v21  ;;  %3696 = vmatpush3.xpose.msra.mxu0 %v2100_v55 }
 0xc99   :  { %3697 = vmatprep.subr.mxu0 %v2096_v27 }
 0xc9b   :  { %3671 = vmatmul.mubr.f32.gmra.mxu0 %v2154_v18 }
 0xc9c   :  { %3673 = vmatprep.mubr.f32.mxu0 %v2155_v31  ;;  %3698 = vmatpush3.xpose.msra.mxu0 %v2096_v27 }
 0xc9d   :  { %3727 = vmatprep.subr.bf16.mxu0 %v4679_v9 }
 0xc9f   :  { %3674 = vmatmul.mubr.f32.gmra.mxu0 %v2156_v33 }
 0xca0   :  { %3676 = vmatprep.mubr.f32.mxu0 %v2157_v53 }
 0xca3   :  { %3677 = vmatmul.mubr.f32.gmra.mxu0 %v2158_v36 }
 0xca4   :  { %3699 = vmatprep.mubr.f32.mxu0 %v2495_v1 }
 0xca7   :  { %3700 = vmatmul.mubr.f32.vlgmr.msra.gmra.mxu0 %v2496_v25 }
 0xca8   :  { %3702 = vmatprep.mubr.f32.mxu0 %v2497_v46  ;;  %3728 = vmatpush3.bf16.msra.mxu0 %v4679_v9  ;;  %v2502_v9 = vmul.f32 %v4904_v29, %v2098_v7 }
 0xca9   :  { %3729 = vmatprep.subr.bf16.mxu0 %v4681_v14 }
 0xcab   :  { %3703 = vmatmul.mubr.f32.gmra.mxu0 %v2498_v54 }
 0xcac   :  { %3705 = vmatprep.mubr.f32.mxu0 %v2499_v23  ;;  %3730 = vmatpush3.bf16.msra.mxu0 %v4681_v14 }
 0xcad   :  { %3731 = vmatprep.subr.bf16.mxu0 %v4686_v41 }
 0xcaf   :  { %3706 = vmatmul.mubr.f32.gmra.mxu0 %v2500_v58 }
 0xcb0   :  { %3708 = vmatprep.mubr.f32.mxu0 %v2501_v2  ;;  %3732 = vmatpush3.bf16.msra.mxu0 %v4686_v41  ;;  %v4091_v41 = vld [vmem:[%s5207_s17] ss:$0 sm:$0xff] }
 0xcb1   :  { %3733 = vmatprep.subr.bf16.mxu0 %v4717_v3 }
 0xcb3   :  { %3709 = vmatmul.mubr.f32.gmra.mxu0 %v2502_v9 }
 0xcb4   :  { %3734 = vmatpush3.bf16.msra.mxu0 %v4717_v3 }
 0xcb5   :  { %3735 = vmatprep.subr.bf16.mxu0 %v4721_v6 }
 0xcb8   :  { %3736 = vmatpush3.bf16.msra.mxu0 %v4721_v6 }
 0xcb9   :  { %3737 = vmatprep.subr.bf16.mxu0 %v4725_v8 }
 0xcbc   :  { %3738 = vmatpush3.bf16.msra.mxu0 %v4725_v8 }
 0xcbd   :  { %3739 = vmatprep.subr.bf16.mxu0 %v4729_v13 }
 0xcc0   :  { %3740 = vmatpush3.bf16.msra.mxu0 %v4729_v13 }
 0xcc1   :  { %3741 = vmatprep.subr.bf16.mxu0 %v4733_v32 }
 0xcc4   :  { %3742 = vmatpush3.bf16.msra.mxu0 %v4733_v32 }
 0xcc5   :  { %3767 = vmatprep.subr.bf16.mxu0 %v4795_v48 }
 0xd57   :  { %v3669_v14 = vpop.f32.mrf.mxu0 }
 0xd58   :  { %v4934_v3 = vadd.f32 %v4091_v41, %v3669_v14 }
 0xd59   :  { %v2225_v6 = vpop.f32.mrf.mxu0 }
 0xd5a   :  { %v4936_v63 = vadd.f32 %v4091_v41, %v2225_v6  ;;  %v2267_v8 = vsel %vm884_vm1, %v4934_v3, -inf }
 0xd5b   :  { %2268 = vmax.xlane.f32.xlu0 %v2267_v8  ;;  %v3672_v13 = vpop.f32.mrf.mxu0 }
 0xd5c   :  { %v4940_v39 = vadd.f32 %v4091_v41, %v3672_v13  ;;  %v2264_v32 = vsel %vm884_vm1, %v4936_v63, -inf }
 0xd5d   :  { %v2235_v48 = vpop.f32.mrf.mxu0  ;;  %2265 = vmax.xlane.f32.xlu1 %v2264_v32 }
 0xd5e   :  { %v4944_v56 = vadd.f32 %v4091_v41, %v2235_v48  ;;  %v2273_v15 = vsel %vm884_vm1, %v4940_v39, -inf }
 0xd5f   :  { %v3675_v47 = vpop.f32.mrf.mxu0 }
 0xd60   :  { %v2270_v44 = vsel %vm884_vm1, %v4944_v56, -inf  ;;  %v4954_v43 = vadd.f32 %v4091_v41, %v3675_v47 }
 0xd61   :  { %v2245_v17 = vpop.f32.mrf.mxu0  ;;  %2274 = vmax.xlane.f32.xlu1 %v2273_v15 }
 0xd62   :  { %v4948_v11 = vadd.f32 %v4091_v41, %v2245_v17  ;;  %v2279_v19 = vsel %vm884_vm1, %v4954_v43, -inf }
 0xd63   :  { %v3678_v61 = vpop.f32.mrf.mxu0 }
 0xd64   :  { %v2276_v60 = vsel %vm884_vm1, %v4948_v11, -inf  ;;  %v4962_v16 = vadd.f32 %v4091_v41, %v3678_v61 }
 0xd65   :  { %v2255_v57 = vpop.f32.mrf.mxu0  ;;  %2271 = vmax.xlane.f32.xlu1 %v2270_v44 }
 0xd66   :  { %v4952_v0 = vadd.f32 %v4091_v41, %v2255_v57  ;;  %v2285_v18 = vsel %vm884_vm1, %v4962_v16, -inf }
 0xd67   :  { %v3701_v42 = vpop.f32.mrf.mxu0 }
 0xd68   :  { %v2282_v5 = vsel %vm884_vm1, %v4952_v0, -inf  ;;  %v4970_v21 = vadd.f32 %v4091_v41, %v3701_v42 }
 0xd69   :  { %v2569_v62 = vpop.f32.mrf.mxu0  ;;  %2283 = vmax.xlane.f32.xlu0 %v2282_v5  ;;  %2277 = vmax.xlane.f32.xlu1 %v2276_v60 }
 0xd6a   :  { %v4960_v50 = vadd.f32 %v4091_v41, %v2569_v62  ;;  %v2611_v36 = vsel %vm884_vm1, %v4970_v21, -inf }
 0xd6b   :  { %v3704_v40 = vpop.f32.mrf.mxu0 }
 0xd6c   :  { %v2608_v45 = vsel %vm884_vm1, %v4960_v50, -inf  ;;  %v4978_v53 = vadd.f32 %v4091_v41, %v3704_v40 }
 0xd6d   :  { %v2579_v26 = vpop.f32.mrf.mxu0  ;;  %2609 = vmax.xlane.f32.xlu0 %v2608_v45  ;;  %2280 = vmax.xlane.f32.xlu1 %v2279_v19 }
 0xd6e   :  { %v4968_v20 = vadd.f32 %v4091_v41, %v2579_v26  ;;  %v2617_v23 = vsel %vm884_vm1, %v4978_v53, -inf }
 0xd6f   :  { %v3707_v55 = vpop.f32.mrf.mxu0 }
 0xd70   :  { %v2614_v27 = vsel %vm884_vm1, %v4968_v20, -inf  ;;  %v4986_v46 = vadd.f32 %v4091_v41, %v3707_v55 }
 0xd71   :  { %v2589_v31 = vpop.f32.mrf.mxu0  ;;  %2615 = vmax.xlane.f32.xlu0 %v2614_v27  ;;  %2286 = vmax.xlane.f32.xlu1 %v2285_v18 }
 0xd72   :  { %v4976_v33 = vadd.f32 %v4091_v41, %v2589_v31  ;;  %v2623_v2 = vsel %vm884_vm1, %v4986_v46, -inf }
 0xd73   :  { %v3710_v24 = vpop.f32.mrf.mxu0 }
 0xd74   :  { %v2620_v7 = vsel %vm884_vm1, %v4976_v33, -inf  ;;  %v4992_v58 = vadd.f32 %v4091_v41, %v3710_v24 }
 0xd75   :  { %v2599_v1 = vpop.f32.mrf.mxu0  ;;  %2621 = vmax.xlane.f32.xlu0 %v2620_v7  ;;  %2612 = vmax.xlane.f32.xlu1 %v2611_v36 }
 0xd76   :  { %v4984_v25 = vadd.f32 %v4091_v41, %v2599_v1  ;;  %v2629_v9 = vsel %vm884_vm1, %v4992_v58, -inf }
 0xd78   :  { %v2626_v54 = vsel %vm884_vm1, %v4984_v25, -inf }
 0xd79   :  { %2627 = vmax.xlane.f32.xlu0 %v2626_v54  ;;  %2618 = vmax.xlane.f32.xlu1 %v2617_v23 }
 0xd7d   :  { %2624 = vmax.xlane.f32.xlu1 %v2623_v2 }
 0xd81   :  { %2630 = vmax.xlane.f32.xlu1 %v2629_v9 }
 0xde4   :  { %v2269_v14 = vpop.xlane.xlu0 %2268 }
 0xde5   :  { %v2289_v6 = vsub.f32 %v4934_v3, %v2269_v14 }
 0xde6   :  { %v2266_v8 = vpop.xlane.xlu1 %2265 }
 0xde7   :  { %v2298_v13 = vmul.f32 1.442695, %v2289_v6  ;;  %v2288_v32 = vsub.f32 %v4936_v63, %v2266_v8 }
 0xde9   :  { %3971 = vpow2.f32 %v2298_v13  ;;  %v2296_v48 = vmul.f32 1.442695, %v2288_v32 }
 0xdea   :  { %v2275_v47 = vpop.xlane.xlu1 %2274 }
 0xdeb   :  { %3973 = vpow2.f32 %v2296_v48  ;;  %v2291_v41 = vsub.f32 %v4940_v39, %v2275_v47 }
 0xded   :  { %v2302_v15 = vmul.f32 1.442695, %v2291_v41 }
 0xdee   :  { %v2272_v17 = vpop.xlane.xlu1 %2271 }
 0xdef   :  { %3975 = vpow2.f32 %v2302_v15  ;;  %v2290_v61 = vsub.f32 %v4944_v56, %v2272_v17 }
 0xdf1   :  { %v2300_v44 = vmul.f32 1.442695, %v2290_v61 }
 0xdf2   :  { %v2284_v57 = vpop.xlane.xlu0 %2283  ;;  %v2278_v42 = vpop.xlane.xlu1 %2277 }
 0xdf3   :  { %3977 = vpow2.f32 %v2300_v44  ;;  %v2294_v3 = vsub.f32 %v4952_v0, %v2284_v57  ;;  %v2292_v5 = vsub.f32 %v4948_v11, %v2278_v42 }
 0xdf5   :  { %v2304_v63 = vmul.f32 1.442695, %v2292_v5  ;;  %v2308_v62 = vmul.f32 1.442695, %v2294_v3 }
 0xdf6   :  { %v5004_v60 = vpop.eup %3971  ;;  %v2610_v40 = vpop.xlane.xlu0 %2609 }
 0xdf7   :  { %v2281_v45 = vpop.xlane.xlu1 %2280  ;;  %v2632_v39 = vsub.f32 %v4960_v50, %v2610_v40  ;;  %v2315_v56 = vsel %vm884_vm1, %v5004_v60, 0.0  ;;  %3979 = vpow2.f32 %v2304_v63 }
 0xdf8   :  { %v2293_v19 = vsub.f32 %v4954_v43, %v2281_v45  ;;  %v5010_v26 = vpop.eup %3973  ;;  %2316 = vadd.xlane.f32.xlu1 %v2315_v56  ;;  %3981 = vpow2.f32 %v2308_v62 }
 0xdf9   :  { %v2312_v11 = vsel %vm884_vm1, %v5010_v26, 0.0  ;;  %v2640_v55 = vmul.f32 1.442695, %v2632_v39 }
 0xdfa   :  { %v2306_v0 = vmul.f32 1.442695, %v2293_v19  ;;  %v2616_v27 = vpop.xlane.xlu0 %2615  ;;  %2313 = vadd.xlane.f32.xlu0 %v2312_v11 }
 0xdfb   :  { %v2287_v18 = vpop.xlane.xlu1 %2286  ;;  %v2634_v50 = vsub.f32 %v4968_v20, %v2616_v27 }
 0xdfc   :  { %v2295_v43 = vsub.f32 %v4962_v16, %v2287_v18  ;;  %v5016_v31 = vpop.eup %3975  ;;  %3983 = vpow2.f32 %v2306_v0 }
 0xdfd   :  { %v2321_v7 = vsel %vm884_vm1, %v5016_v31, 0.0  ;;  %3985 = vpow2.f32 %v2640_v55  ;;  %v2644_v36 = vmul.f32 1.442695, %v2634_v50 }
 0xdfe   :  { %v2310_v24 = vmul.f32 1.442695, %v2295_v43  ;;  %v2622_v1 = vpop.xlane.xlu0 %2621  ;;  %2322 = vadd.xlane.f32.xlu1 %v2321_v7 }
 0xdff   :  { %v2613_v54 = vpop.xlane.xlu1 %2612  ;;  %v2636_v23 = vsub.f32 %v4976_v33, %v2622_v1 }
 0xe00   :  { %v2633_v2 = vsub.f32 %v4970_v21, %v2613_v54  ;;  %v5022_v9 = vpop.eup %3977  ;;  %3987 = vpow2.f32 %v2310_v24 }
 0xe01   :  { %v2318_v20 = vsel %vm884_vm1, %v5022_v9, 0.0  ;;  %3989 = vpow2.f32 %v2644_v36  ;;  %v2648_v14 = vmul.f32 1.442695, %v2636_v23 }
 0xe02   :  { %v2642_v16 = vmul.f32 1.442695, %v2633_v2  ;;  %v2628_v6 = vpop.xlane.xlu0 %2627  ;;  %2319 = vadd.xlane.f32.xlu0 %v2318_v20 }
 0xe03   :  { %v2619_v8 = vpop.xlane.xlu1 %2618  ;;  %v2638_v13 = vsub.f32 %v4984_v25, %v2628_v6 }
 0xe04   :  { %v2635_v32 = vsub.f32 %v4978_v53, %v2619_v8  ;;  %3991 = vpow2.f32 %v2642_v16  ;;  %v5028_v33 = vpop.eup %3979 }
 0xe05   :  { %3993 = vpow2.f32 %v2648_v14  ;;  %v2652_v48 = vmul.f32 1.442695, %v2638_v13  ;;  %v2324_v47 = vsel %vm884_vm1, %v5028_v33, 0.0  ;;  %v5032_v15 = vpop.eup %3981  ;;  %v2145_v13 = vadd.f32 %v4867_v10, %v4513_v37 }
 0xe06   :  { %v2646_v21 = vmul.f32 1.442695, %v2635_v32  ;;  %2325 = vadd.xlane.f32.xlu0 %v2324_v47  ;;  %v2330_v53 = vsel %vm884_vm1, %v5032_v15, 0.0 }
 0xe07   :  { %v2625_v41 = vpop.xlane.xlu1 %2624 }
 0xe08   :  { %v2637_v17 = vsub.f32 %v4986_v46, %v2625_v41  ;;  %3995 = vpow2.f32 %v2646_v21 }
 0xe09   :  { %v5035_v61 = vpop.eup %3983  ;;  %3997 = vpow2.f32 %v2652_v48 }
 0xe0a   :  { %v2650_v25 = vmul.f32 1.442695, %v2637_v17  ;;  %v2327_v44 = vsel %vm884_vm1, %v5035_v61, 0.0  ;;  %v5041_v42 = vpop.eup %3985  ;;  %2331 = vadd.xlane.f32.xlu0 %v2330_v53 }
 0xe0b   :  { %v2631_v57 = vpop.xlane.xlu1 %2630  ;;  %2328 = vadd.xlane.f32.xlu1 %v2327_v44  ;;  %v2656_v63 = vsel %vm884_vm1, %v5041_v42, 0.0 }
 0xe0c   :  { %3999 = vpow2.f32 %v2650_v25  ;;  %v2639_v3 = vsub.f32 %v4992_v58, %v2631_v57 }
 0xe0d   :  { %v5044_v46 = vpop.eup %3987 }
 0xe0e   :  { %v2654_v5 = vmul.f32 1.442695, %v2639_v3  ;;  %v2333_v62 = vsel %vm884_vm1, %v5044_v46, 0.0  ;;  %v5050_v40 = vpop.eup %3989  ;;  %2657 = vadd.xlane.f32.xlu0 %v2656_v63 }
 0xe0f   :  { %2334 = vadd.xlane.f32.xlu1 %v2333_v62  ;;  %v2662_v39 = vsel %vm884_vm1, %v5050_v40, 0.0 }
 0xe10   :  { %4001 = vpow2.f32 %v2654_v5 }
 0xe11   :  { %v5052_v45 = vpop.eup %3991 }
 0xe12   :  { %v2659_v58 = vsel %vm884_vm1, %v5052_v45, 0.0  ;;  %v5058_v19 = vpop.eup %3993  ;;  %2663 = vadd.xlane.f32.xlu0 %v2662_v39 }
 0xe13   :  { %2660 = vadd.xlane.f32.xlu1 %v2659_v58  ;;  %v2668_v0 = vsel %vm884_vm1, %v5058_v19, 0.0 }
 0xe15   :  { %v5060_v56 = vpop.eup %3995 }
 0xe16   :  { %v2665_v11 = vsel %vm884_vm1, %v5060_v56, 0.0  ;;  %v5066_v55 = vpop.eup %3997  ;;  %2669 = vadd.xlane.f32.xlu0 %v2668_v0 }
 0xe17   :  { %2666 = vadd.xlane.f32.xlu1 %v2665_v11  ;;  %v2674_v50 = vsel %vm884_vm1, %v5066_v55, 0.0 }
 0xe19   :  { %v5068_v27 = vpop.eup %3999 }
 0xe1a   :  { %v2671_v18 = vsel %vm884_vm1, %v5068_v27, 0.0  ;;  %2675 = vadd.xlane.f32.xlu0 %v2674_v50 }
 0xe1b   :  { %2672 = vadd.xlane.f32.xlu1 %v2671_v18 }
 0xe1d   :  { %v5074_v43 = vpop.eup %4001 }
 0xe1e   :  { %v2677_v24 = vsel %vm884_vm1, %v5074_v43, 0.0 }
 0xe1f   :  { %2678 = vadd.xlane.f32.xlu1 %v2677_v24  ;;  %v4093_v24 = vld [vmem:[#allocation11 + $0x30] sm:$0xff]  }
 0xe81   :  { %v2317_v7 = vpop.xlane.xlu1 %2316 }
 0xe82   :  { %4003 = vrcp.f32 %v2317_v7 }
 0xe83   :  { %v2314_v36 = vpop.xlane.xlu0 %2313 }
 0xe84   :  { %4005 = vrcp.f32 %v2314_v36 }
 0xe87   :  { %v2323_v1 = vpop.xlane.xlu1 %2322 }
 0xe88   :  { %4007 = vrcp.f32 %v2323_v1  ;;  %v4094_v1 = vld [vmem:[#allocation11 + $0x28] sm:$0xff]  }
 0xe8b   :  { %v2320_v54 = vpop.xlane.xlu0 %2319 }
 0xe8c   :  { %4009 = vrcp.f32 %v2320_v54 }
 0xe8f   :  { %v4004_v23 = vpop.eup %4003  ;;  %v2326_v2 = vpop.xlane.xlu0 %2325 }
 0xe90   :  { %4011 = vrcp.f32 %v2326_v2  ;;  %v2345_v14 = vmul.f32 %v4004_v23, %v5004_v60  ;;  %v4092_v60 = vld [vmem:[#allocation11 + $0x38] sm:$0xff]   ;;  %v4099_v2 = vld [vmem:[#allocation11] sm:$0xff]  }
 0xe91   :  { %v4006_v16 = vpop.eup %4005  ;;  %v4096_v23 = vld [vmem:[#allocation11 + $0x18] sm:$0xff]  }
 0xe92   :  { %v2344_v20 = vmul.f32 %v4006_v16, %v5010_v26 }
 0xe93   :  { %v2332_v6 = vpop.xlane.xlu0 %2331 }
 0xe94   :  { %v2329_v8 = vpop.xlane.xlu1 %2328  ;;  %3683 = vmatprep.mubr.msk.f32.mxu1 %vm884_vm1, %v2344_v20  ;;  %4013 = vrcp.f32 %v2332_v6 }
 0xe95   :  { %3684 = vmatmul.mubr.msk.f32.vlgmr.msra.gmra.mxu1 %vm884_vm1, %v2345_v14  ;;  %4015 = vrcp.f32 %v2329_v8  ;;  %v4008_v32 = vpop.eup %4007 }
 0xe96   :  { %3712 = vmatpush3.msra.mxu1 %v4878_v12  ;;  %v2347_v37 = vmul.f32 %v4008_v32, %v5016_v31 }
 0xe97   :  { %3713 = vmatprep.subr.mxu1 %v2145_v13  ;;  %v2658_v21 = vpop.xlane.xlu0 %2657 }
 0xe98   :  { %3714 = vmatpush3.msra.mxu1 %v2145_v13  ;;  %v2335_v26 = vpop.xlane.xlu1 %2334  ;;  %4017 = vrcp.f32 %v2658_v21 }
 0xe99   :  { %v4010_v48 = vpop.eup %4009  ;;  %3747 = vmatprep.subr.bf16.mxu1 %v4092_v60  ;;  %4019 = vrcp.f32 %v2335_v26 }
 0xe9a   :  { %v2346_v47 = vmul.f32 %v4010_v48, %v5022_v9 }
 0xe9b   :  { %v2664_v10 = vpop.xlane.xlu0 %2663 }
 0xe9c   :  { %v2661_v41 = vpop.xlane.xlu1 %2660  ;;  %3686 = vmatprep.mubr.msk.f32.mxu1 %vm884_vm1, %v2346_v47  ;;  %4021 = vrcp.f32 %v2664_v10 }
 0xe9d   :  { %3687 = vmatmul.mubr.msk.f32.gmra.mxu1 %vm884_vm1, %v2347_v37  ;;  %v4012_v12 = vpop.eup %4011  ;;  %4023 = vrcp.f32 %v2661_v41 }
 0xe9e   :  { %v2348_v17 = vmul.f32 %v4012_v12, %v5028_v33 }
 0xe9f   :  { %v2670_v25 = vpop.xlane.xlu0 %2669 }
 0xea0   :  { %v2667_v53 = vpop.xlane.xlu1 %2666  ;;  %4025 = vrcp.f32 %v2670_v25  ;;  %3689 = vmatprep.mubr.msk.f32.mxu1 %vm884_vm1, %v2348_v17 }
 0xea1   :  { %v4014_v44 = vpop.eup %4013  ;;  %4027 = vrcp.f32 %v2667_v53 }
 0xea2   :  { %v4016_v9 = vpop.eup %4015  ;;  %v2350_v31 = vmul.f32 %v4014_v44, %v5032_v15 }
 0xea3   :  { %v2676_v57 = vpop.xlane.xlu0 %2675  ;;  %v2349_v5 = vmul.f32 %v4016_v9, %v5035_v61 }
 0xea4   :  { %v2673_v3 = vpop.xlane.xlu1 %2672  ;;  %4029 = vrcp.f32 %v2676_v57 }
 0xea5   :  { %v4018_v63 = vpop.eup %4017  ;;  %4031 = vrcp.f32 %v2673_v3  ;;  %3690 = vmatmul.mubr.msk.f32.gmra.mxu1 %vm884_vm1, %v2349_v5 }
 0xea6   :  { %v4020_v33 = vpop.eup %4019  ;;  %3692 = vmatprep.mubr.msk.f32.mxu1 %vm884_vm1, %v2350_v31  ;;  %v2688_v62 = vmul.f32 %v4018_v63, %v5041_v42 }
 0xea7   :  { %v2351_v58 = vmul.f32 %v4020_v33, %v5044_v46 }
 0xea8   :  { %v2679_v39 = vpop.xlane.xlu1 %2678 }
 0xea9   :  { %4033 = vrcp.f32 %v2679_v39  ;;  %v4022_v0 = vpop.eup %4021  ;;  %3693 = vmatmul.mubr.msk.f32.gmra.mxu1 %vm884_vm1, %v2351_v58 }
 0xeaa   :  { %v4024_v15 = vpop.eup %4023  ;;  %3715 = vmatprep.mubr.msk.f32.mxu1 %vm884_vm1, %v2688_v62  ;;  %v2690_v61 = vmul.f32 %v4022_v0, %v5050_v40 }
 0xeab   :  { %v2689_v11 = vmul.f32 %v4024_v15, %v5052_v45 }
 0xead   :  { %v4026_v18 = vpop.eup %4025  ;;  %3716 = vmatmul.mubr.msk.f32.vlgmr.msra.gmra.mxu1 %vm884_vm1, %v2689_v11 }
 0xeae   :  { %v4028_v50 = vpop.eup %4027  ;;  %3718 = vmatprep.mubr.msk.f32.mxu1 %vm884_vm1, %v2690_v61  ;;  %v2692_v42 = vmul.f32 %v4026_v18, %v5058_v19  ;;  %3748 = vmatpush3.bf16.msra.mxu1 %v4092_v60 }
 0xeaf   :  { %v2691_v46 = vmul.f32 %v4028_v50, %v5060_v56  ;;  %3749 = vmatprep.subr.bf16.mxu1 %v4093_v24  ;;  %v4095_v56 = vld [vmem:[#allocation11 + $0x20] sm:$0xff]  }
 0xeb1   :  { %v4030_v7 = vpop.eup %4029  ;;  %3719 = vmatmul.mubr.msk.f32.gmra.mxu1 %vm884_vm1, %v2691_v46 }
 0xeb2   :  { %v4032_v36 = vpop.eup %4031  ;;  %3721 = vmatprep.mubr.msk.f32.mxu1 %vm884_vm1, %v2692_v42  ;;  %v2694_v40 = vmul.f32 %v4030_v7, %v5066_v55  ;;  %3750 = vmatpush3.bf16.msra.mxu1 %v4093_v24  ;;  %v4097_v55 = vld [vmem:[#allocation11 + $0x10] sm:$0xff]  }
 0xeb3   :  { %v2693_v45 = vmul.f32 %v4032_v36, %v5068_v27  ;;  %3751 = vmatprep.subr.bf16.mxu1 %v4094_v1  ;;  %v4098_v27 = vld [vmem:[#allocation11 + $0x8] sm:$0xff]  }
 0xeb5   :  { %3722 = vmatmul.mubr.msk.f32.gmra.mxu1 %vm884_vm1, %v2693_v45 }
 0xeb6   :  { %v4034_v54 = vpop.eup %4033  ;;  %3724 = vmatprep.mubr.msk.f32.mxu1 %vm884_vm1, %v2694_v40  ;;  %3752 = vmatpush3.bf16.msra.mxu1 %v4094_v1  ;;  %v4105_v1 = vld [vmem:[#allocation13 + $0x10] sm:$0xff]  }
 0xeb7   :  { %v2695_v19 = vmul.f32 %v4034_v54, %v5074_v43  ;;  %3753 = vmatprep.subr.bf16.mxu1 %v4095_v56  ;;  %v4107_v54 = vld [vmem:[#allocation13] sm:$0xff]  }
 0xeb9   :  { %3725 = vmatmul.mubr.msk.f32.gmra.mxu1 %vm884_vm1, %v2695_v19 }
 0xeba   :  { %3754 = vmatpush3.bf16.msra.mxu1 %v4095_v56  ;;  %v4108_v56 = vld [vmem:[%s5197_s7] ss:$0 sm:$0xff] }
 0xebb   :  { %3755 = vmatprep.subr.bf16.mxu1 %v4096_v23 }
 0xebe   :  { %3756 = vmatpush3.bf16.msra.mxu1 %v4096_v23 }
 0xebf   :  { %3757 = vmatprep.subr.bf16.mxu1 %v4097_v55 }
 0xec2   :  { %3758 = vmatpush3.bf16.msra.mxu1 %v4097_v55 }
 0xec3   :  { %3759 = vmatprep.subr.bf16.mxu1 %v4098_v27 }
 0xec6   :  { %3760 = vmatpush3.bf16.msra.mxu1 %v4098_v27 }
 0xec7   :  { %3761 = vmatprep.subr.bf16.mxu1 %v4099_v2 }
 0xeca   :  { %3762 = vmatpush3.bf16.msra.mxu1 %v4099_v2 }
 0xf55   :  { %v3685_v16 = vpop.f32.mrf.mxu1 }
 0xf56   :  { %v2482_v21 = vmul.f32 %v4881_v49, %v3685_v16 }
 0xf57   :  { %v2442_v43 = vpop.f32.mrf.mxu1 }
 0xf58   :  { %v2481_v26 = vmul.f32 %v4869_v51, %v2442_v43 }
 0xf5d   :  { %v3688_v20 = vpop.f32.mrf.mxu1 }
 0xf5e   :  { %v2484_v8 = vmul.f32 %v4889_v28, %v3688_v20 }
 0xf5f   :  { %v2452_v14 = vpop.f32.mrf.mxu1 }
 0xf60   :  { %v2483_v13 = vmul.f32 %v4885_v22, %v2452_v14  ;;  %v2490_v37 = vadd.f32 %v2484_v8, %v2482_v21 }
 0xf62   :  { %v2489_v10 = vadd.f32 %v2483_v13, %v2481_v26 }
 0xf65   :  { %v3691_v6 = vpop.f32.mrf.mxu1 }
 0xf66   :  { %v2486_v48 = vmul.f32 %v4895_v35, %v3691_v6 }
 0xf67   :  { %v2462_v32 = vpop.f32.mrf.mxu1 }
 0xf68   :  { %v2485_v60 = vmul.f32 %v4892_v30, %v2462_v32  ;;  %v2492_v17 = vadd.f32 %v2490_v37, %v2486_v48 }
 0xf69   :  { %v3694_v47 = vpop.f32.mrf.mxu1 }
 0xf6a   :  { %v2488_v41 = vmul.f32 %v4904_v29, %v3694_v47  ;;  %v2491_v25 = vadd.f32 %v2489_v10, %v2485_v60 }
 0xf6b   :  { %v2472_v12 = vpop.f32.mrf.mxu1 }
 0xf6c   :  { %v2487_v53 = vmul.f32 %v4900_v34, %v2472_v12  ;;  %v2494_v9 = vadd.f32 %v2492_v17, %v2488_v41 }
 0xf6d   :  { %v3717_v44 = vpop.f32.mrf.mxu1 }
 0xf6e   :  { %v2493_v31 = vadd.f32 %v2491_v25, %v2487_v53  ;;  %v2826_v0 = vmul.f32 %v4881_v49, %v3717_v44  ;;  %v4100_v49 = vld [vmem:[#allocation13 + $0x38] sm:$0xff]  }
 0xf6f   :  { %v2786_v57 = vpop.f32.mrf.mxu1 }
 0xf70   :  { %v2839_v3 = vpack.c.bf16 %v2494_v9, %v2493_v31  ;;  %v2825_v15 = vmul.f32 %v4869_v51, %v2786_v57  ;;  %v4101_v51 = vld [vmem:[#allocation13 + $0x30] sm:$0xff]  }
 0xf71   :  { %v3720_v5 = vpop.f32.mrf.mxu1 }
 0xf72   :  { %3743 = vmatprep.mubr.bf16.mxu0 %v2839_v3  ;;  %v2828_v62 = vmul.f32 %v4889_v28, %v3720_v5 }
 0xf73   :  { %v2796_v63 = vpop.f32.mrf.mxu1 }
 0xf74   :  { %v2827_v39 = vmul.f32 %v4885_v22, %v2796_v63  ;;  %v2834_v50 = vadd.f32 %v2828_v62, %v2826_v0 }
 0xf75   :  { %v3723_v33 = vpop.f32.mrf.mxu1 }
 0xf76   :  { %v2830_v61 = vmul.f32 %v4895_v35, %v3723_v33  ;;  %v2833_v42 = vadd.f32 %v2827_v39, %v2825_v15  ;;  %v4103_v35 = vld [vmem:[#allocation13 + $0x20] sm:$0xff]  }
 0xf77   :  { %v2806_v58 = vpop.f32.mrf.mxu1 }
 0xf78   :  { %v2829_v11 = vmul.f32 %v4892_v30, %v2806_v58  ;;  %v2836_v7 = vadd.f32 %v2834_v50, %v2830_v61  ;;  %v4102_v30 = vld [vmem:[#allocation13 + $0x28] sm:$0xff]  }
 0xf79   :  { %v3726_v18 = vpop.f32.mrf.mxu1 }
 0xf7a   :  { %v2832_v46 = vmul.f32 %v4904_v29, %v3726_v18  ;;  %v2835_v36 = vadd.f32 %v2833_v42, %v2829_v11  ;;  %v4104_v29 = vld [vmem:[#allocation13 + $0x18] sm:$0xff]  }
 0xf7b   :  { %v2816_v24 = vpop.f32.mrf.mxu1 }
 0xf7c   :  { %v2831_v28 = vmul.f32 %v4900_v34, %v2816_v24  ;;  %v2838_v22 = vadd.f32 %v2836_v7, %v2832_v46  ;;  %v4106_v34 = vld [vmem:[#allocation13 + $0x8] sm:$0xff]  }
 0xf7e   :  { %v2837_v40 = vadd.f32 %v2835_v36, %v2831_v28 }
 0xf80   :  { %v2840_v45 = vpack.c.bf16 %v2838_v22, %v2837_v40  ;;  %v4109_v22 = vld [vmem:[%s5198_s8] ss:$0 sm:$0xff] }
 0xf82   :  { %3744 = vmatmul.mubr.bf16.vlgmr.msra.gmra.mxu0 %v2840_v45 }
 0xf83   :  { %3768 = vmatpush3.bf16.msra.mxu0 %v4100_v49 }
 0xf84   :  { %3769 = vmatprep.subr.bf16.mxu0 %v4101_v51 }
 0xf87   :  { %3770 = vmatpush3.bf16.msra.mxu0 %v4101_v51 }
 0xf88   :  { %3771 = vmatprep.subr.bf16.mxu0 %v4102_v30 }
 0xf8b   :  { %3772 = vmatpush3.bf16.msra.mxu0 %v4102_v30 }
 0xf8c   :  { %3773 = vmatprep.subr.bf16.mxu0 %v4103_v35 }
 0xf8f   :  { %3774 = vmatpush3.bf16.msra.mxu0 %v4103_v35 }
 0xf90   :  { %3775 = vmatprep.subr.bf16.mxu0 %v4104_v29 }
 0xf93   :  { %3776 = vmatpush3.bf16.msra.mxu0 %v4104_v29  ;;  %v4110_v29 = vld [vmem:[%s5199_s9] ss:$0 sm:$0xff] }
 0xf94   :  { %3777 = vmatprep.subr.bf16.mxu0 %v4105_v1 }
 0xf97   :  { %3778 = vmatpush3.bf16.msra.mxu0 %v4105_v1 }
 0xf98   :  { %3779 = vmatprep.subr.bf16.mxu0 %v4106_v34 }
 0xf9b   :  { %3780 = vmatpush3.bf16.msra.mxu0 %v4106_v34 }
 0xf9c   :  { %3781 = vmatprep.subr.bf16.mxu0 %v4107_v54 }
 0xf9f   :  { %3782 = vmatpush3.bf16.msra.mxu0 %v4107_v54 }
0x1042   :  { %v3745_v19 = vpop.f32.mrf.mxu0 }
0x1043   :  { %v2884_v23 = vadd.f32 %v4108_v56, %v3745_v19 }
0x1044   :  { %v2875_v55 = vpop.f32.mrf.mxu0 }
0x1045   :  { %v5133_v27 = vadd.f32 %v2884_v23, %v4850_v59  ;;  %v2876_v2 = vadd.f32 %v4108_v56, %v2875_v55 }
0x1046   :  { %v3746_v16 = vpop.f32.mrf.mxu0 }
0x1047   :  { %v2887_v43 = vadd.f32 %v4108_v56, %v3746_v16  ;;  %2898 = vadd.xlane.f32.xlu0 %v5133_v27  ;;  %v2890_v14 = vadd.f32 %v2876_v2, %v4859_v52  ;;  %v2908_v21 = vmul.f32 %v5133_v27, %v5133_v27  ;;  %v4111_v16 = vld [vmem:[%s5201_s11] ss:$0 sm:$0xff] }
0x1048   :  { %v2878_v20 = vpop.f32.mrf.mxu0 }
0x1049   :  { %v2893_v6 = vadd.f32 %v2887_v43, %v4853_v38  ;;  %v2879_v8 = vadd.f32 %v4108_v56, %v2878_v20  ;;  %v2906_v32 = vmul.f32 %v2890_v14, %v2890_v14 }
0x104b   :  { %2900 = vadd.xlane.f32.xlu1 %v2893_v6  ;;  %2894 = vadd.xlane.f32.xlu0 %v2890_v14  ;;  %v2891_v13 = vadd.f32 %v2879_v8, %v4856_v4  ;;  %v2909_v26 = vmul.f32 %v2893_v6, %v2893_v6 }
0x104d   :  { %v2907_v59 = vmul.f32 %v2891_v13, %v2891_v13 }
0x104f   :  { %2896 = vadd.xlane.f32.xlu1 %v2891_v13  ;;  %2910 = vadd.xlane.f32.xlu0 %v2906_v32 }
0x1053   :  { %2912 = vadd.xlane.f32.xlu1 %v2907_v59  ;;  %2914 = vadd.xlane.f32.xlu0 %v2908_v21 }
0x1057   :  { %2916 = vadd.xlane.f32.xlu1 %v2909_v26 }
0x10d0   :  { %v2899_v48 = vpop.xlane.xlu0 %2898 }
0x10d1   :  { %v2904_v47 = vmul.f32 0.03125, %v2899_v48 }
0x10d3   :  { %v2924_v25 = vmul.f32 %v2904_v47, %v2904_v47  ;;  %v2932_v7 = vsub.f32 %v5133_v27, %v2904_v47 }
0x10d4   :  { %v2901_v52 = vpop.xlane.xlu1 %2900  ;;  %v2895_v60 = vpop.xlane.xlu0 %2894 }
0x10d5   :  { %v2902_v38 = vmul.f32 0.03125, %v2895_v60  ;;  %v2905_v53 = vmul.f32 0.03125, %v2901_v52 }
0x10d7   :  { %v2922_v41 = vmul.f32 %v2902_v38, %v2902_v38  ;;  %v2925_v39 = vmul.f32 %v2905_v53, %v2905_v53  ;;  %v2930_v18 = vsub.f32 %v2890_v14, %v2902_v38  ;;  %v2933_v49 = vsub.f32 %v2893_v6, %v2905_v53 }
0x10d8   :  { %v2897_v37 = vpop.xlane.xlu1 %2896  ;;  %v2911_v10 = vpop.xlane.xlu0 %2910 }
0x10d9   :  { %v2903_v4 = vmul.f32 0.03125, %v2897_v37  ;;  %v2918_v12 = vmul.f32 0.03125, %v2911_v10 }
0x10db   :  { %v2926_v17 = vsub.f32 %v2918_v12, %v2922_v41  ;;  %v2923_v31 = vmul.f32 %v2903_v4, %v2903_v4  ;;  %v2931_v46 = vsub.f32 %v2891_v13, %v2903_v4 }
0x10dc   :  { %v2913_v44 = vpop.xlane.xlu1 %2912  ;;  %v2915_v9 = vpop.xlane.xlu0 %2914 }
0x10dd   :  { %v2934_v57 = vadd.f32 1e-05, %v2926_v17  ;;  %v2919_v3 = vmul.f32 0.03125, %v2913_v44  ;;  %v2920_v5 = vmul.f32 0.03125, %v2915_v9 }
0x10df   :  { %4035 = vrsqrt.f32 %v2934_v57  ;;  %v2927_v63 = vsub.f32 %v2919_v3, %v2923_v31  ;;  %v2928_v33 = vsub.f32 %v2920_v5, %v2924_v25 }
0x10e0   :  { %v2917_v62 = vpop.xlane.xlu1 %2916 }
0x10e1   :  { %v2935_v58 = vadd.f32 1e-05, %v2927_v63  ;;  %v2936_v0 = vadd.f32 1e-05, %v2928_v33  ;;  %v2921_v15 = vmul.f32 0.03125, %v2917_v62 }
0x10e3   :  { %4037 = vrsqrt.f32 %v2935_v58  ;;  %v2929_v61 = vsub.f32 %v2921_v15, %v2925_v39 }
0x10e4   :  { %4039 = vrsqrt.f32 %v2936_v0 }
0x10e5   :  { %v2937_v11 = vadd.f32 1e-05, %v2929_v61 }
0x10e7   :  { %4041 = vrsqrt.f32 %v2937_v11 }
0x10ec   :  { %v4036_v50 = vpop.eup %4035 }
0x10ed   :  { %v2942_v42 = vmul.f32 %v4036_v50, %v2930_v18 }
0x10ef   :  { %v2946_v40 = vmul.f32 %v4109_v22, %v2942_v42 }
0x10f0   :  { %v4038_v24 = vpop.eup %4037 }
0x10f1   :  { %v4040_v36 = vpop.eup %4039  ;;  %v2943_v28 = vmul.f32 %v4038_v24, %v2931_v46  ;;  %v5148_v1 = vadd.f32 %v4110_v29, %v2946_v40 }
0x10f2   :  { %v2944_v45 = vmul.f32 %v4040_v36, %v2932_v7 }
0x10f3   :  { %v2947_v51 = vmul.f32 %v4109_v22, %v2943_v28 }
0x10f4   :  { %v4042_v30 = vpop.eup %4041  ;;  %v2948_v54 = vmul.f32 %v4109_v22, %v2944_v45 }
0x10f5   :  { %v2945_v35 = vmul.f32 %v4042_v30, %v2933_v49  ;;  %v5150_v34 = vadd.f32 %v4110_v29, %v2947_v51 }
0x10f6   :  { %v2952_v23 = vadd.f32 %v4110_v29, %v2948_v54 }
0x10f7   :  { %v2954_v19 = vpack.c.bf16 %v5150_v34, %v5148_v1  ;;  %v2949_v56 = vmul.f32 %v4109_v22, %v2945_v35  ;;  %v4112_v22 = vld [vmem:[%s5203_s13] ss:$0 sm:$0xff] }
0x10f9   :  { %3763 = vmatprep.mubr.bf16.mxu1 %v2954_v19  ;;  %v5154_v55 = vadd.f32 %v4110_v29, %v2949_v56 }
0x10fb   :  { %v2955_v27 = vpack.c.bf16 %v5154_v55, %v2952_v23 }
0x10fd   :  { %3764 = vmatmul.mubr.bf16.vlgmr.msra.gmra.mxu1 %v2955_v27 }
0x11bd   :  { %v3765_v2 = vpop.f32.mrf.mxu1 }
0x11be   :  { %v2999_v43 = vadd.f32 %v4111_v16, %v3765_v2 }
0x11bf   :  { %v2990_v20 = vpop.f32.mrf.mxu1 }
0x11c0   :  { %v3011_v14 = vmul.f32 0.044715, %v2999_v43  ;;  %v2991_v6 = vadd.f32 %v4111_v16, %v2990_v20  ;;  %v3007_v18 = vmul.f32 0.5, %v2999_v43 }
0x11c1   :  { %v3766_v8 = vpop.f32.mrf.mxu1 }
0x11c2   :  { %v3015_v13 = vmul.f32 %v3011_v14, %v2999_v43  ;;  %v3009_v32 = vmul.f32 0.044715, %v2991_v6  ;;  %v3002_v59 = vadd.f32 %v4111_v16, %v3766_v8  ;;  %v3005_v15 = vmul.f32 0.5, %v2991_v6 }
0x11c3   :  { %v2993_v21 = vpop.f32.mrf.mxu1 }
0x11c4   :  { %v3019_v26 = vmul.f32 %v3015_v13, %v2999_v43  ;;  %v3013_v48 = vmul.f32 %v3009_v32, %v2991_v6  ;;  %v3012_v52 = vmul.f32 0.044715, %v3002_v59  ;;  %v2994_v60 = vadd.f32 %v4111_v16, %v2993_v21 }
0x11c5   :  { %v3008_v58 = vmul.f32 0.5, %v3002_v59 }
0x11c6   :  { %v3023_v38 = vadd.f32 %v3019_v26, %v2999_v43  ;;  %v3017_v47 = vmul.f32 %v3013_v48, %v2991_v6  ;;  %v3016_v37 = vmul.f32 %v3012_v52, %v3002_v59  ;;  %v3010_v10 = vmul.f32 0.044715, %v2994_v60 }
0x11c7   :  { %v3006_v61 = vmul.f32 0.5, %v2994_v60 }
0x11c8   :  { %v3020_v41 = vmul.f32 %v3016_v37, %v3002_v59  ;;  %v3014_v4 = vmul.f32 %v3010_v10, %v2994_v60  ;;  %v3021_v12 = vadd.f32 %v3017_v47, %v2991_v6  ;;  %v3027_v17 = vmul.f32 0.7978846, %v3023_v38 }
0x11ca   :  { %v3024_v25 = vadd.f32 %v3020_v41, %v3002_v59  ;;  %v3018_v53 = vmul.f32 %v3014_v4, %v2994_v60  ;;  %v3025_v44 = vmul.f32 0.7978846, %v3021_v12 }
0x11cc   :  { %v3028_v9 = vmul.f32 0.7978846, %v3024_v25  ;;  %v3022_v31 = vadd.f32 %v3018_v53, %v2994_v60  ;;  %4043 = vtanh.f32 %v3025_v44 }
0x11cd   :  { %4045 = vtanh.f32 %v3027_v17 }
0x11ce   :  { %4047 = vtanh.f32 %v3028_v9  ;;  %v3026_v57 = vmul.f32 0.7978846, %v3022_v31 }
0x11d0   :  { %4049 = vtanh.f32 %v3026_v57 }
0x11d9   :  { %v4044_v3 = vpop.eup %4043 }
0x11da   :  { %v4046_v5 = vpop.eup %4045  ;;  %v3033_v33 = vadd.f32 1.0, %v4044_v3 }
0x11db   :  { %v4048_v63 = vpop.eup %4047  ;;  %v3035_v0 = vadd.f32 1.0, %v4046_v5 }
0x11dc   :  { %v3036_v62 = vadd.f32 1.0, %v4048_v63  ;;  %v3037_v42 = vmul.f32 %v3033_v33, %v3005_v15  ;;  %v4113_v33 = vld [vmem:[%s5204_s14] ss:$0 sm:$0xff]  ;;  %s4324_s14 = smov [#allocation16]  }
0x11dd   :  { %v4050_v39 = vpop.eup %4049  ;;  %v3039_v24 = vmul.f32 %v3035_v0, %v3007_v18  ;;  %s3165_s21 = sshll.u32 %s4324_s14, 4  ;;  %s3166_s21 = int_to_ptr.vmem [resolvable:$true] %s3165_s21 }
0x11de   :  { %v3034_v11 = vadd.f32 1.0, %v4050_v39  ;;  %v3040_v50 = vmul.f32 %v3036_v62, %v3008_v58  ;;  %p4280_p13 = scmp.lt.s32.totalorder %s3166_s21, %s3166_s21 }
0x11e0   :  { %v3038_v46 = vmul.f32 %v3034_v11, %v3006_v61  ;;  %v3042_v36 = vpack.c.bf16 %v3040_v50, %v3039_v24  ;;  %v4114_v61 = vld [vmem:[%s5205_s15] ss:$0 sm:$0xff]  ;;  %s4275_s15 = scalar_lea.vmem %s3166_s21, 512 }
0x11e1   :  { %p4276_p12 = scmp.ne.s32.totalorder %s3166_s21, %s4275_s15  ;;  %p4281_p0 = scmp.lt.s32.totalorder %s4275_s15, %s4275_s15 }
0x11e2   :  { %v3041_v7 = vpack.c.bf16 %v3038_v46, %v3037_v42 }
0x11e3   :  { %p4282_p1 = por %p4281_p0, %p4280_p13 }
0x11e4   :  { %3783 = vmatprep.mubr.bf16.mxu0 %v3041_v7 }
0x11e5   :  { %3784 = vmatmul.mubr.bf16.vlgmr.msra.gmra.mxu0 %v3042_v36  ;;  %p4283_p2 = pnand %p4282_p1, %p4276_p12 }
0x12a5   :  { %v3785_v28 = vpop.f32.mrf.mxu0 }
0x12a6   :  { %v3086_v40 = vadd.f32 %v4112_v22, %v3785_v28 }
0x12a7   :  { %v3077_v45 = vpop.f32.mrf.mxu0 }
0x12a8   :  { %v5163_v49 = vadd.f32 %v3086_v40, %v2952_v23  ;;  %v3078_v51 = vadd.f32 %v4112_v22, %v3077_v45 }
0x12a9   :  { %v3786_v30 = vpop.f32.mrf.mxu0 }
0x12aa   :  { %v3089_v35 = vadd.f32 %v4112_v22, %v3786_v30  ;;  %3100 = vadd.xlane.f32.xlu0 %v5163_v49  ;;  %v3092_v54 = vadd.f32 %v3078_v51, %v5148_v1  ;;  %v3110_v16 = vmul.f32 %v5163_v49, %v5163_v49 }
0x12ab   :  { %v3080_v29 = vpop.f32.mrf.mxu0 }
0x12ac   :  { %v5168_v19 = vadd.f32 %v3089_v35, %v5154_v55  ;;  %v3081_v56 = vadd.f32 %v4112_v22, %v3080_v29  ;;  %v3108_v2 = vmul.f32 %v3092_v54, %v3092_v54 }
0x12ae   :  { %3102 = vadd.xlane.f32.xlu1 %v5168_v19  ;;  %3096 = vadd.xlane.f32.xlu0 %v3092_v54  ;;  %v3093_v27 = vadd.f32 %v3081_v56, %v5150_v34  ;;  %v3111_v1 = vmul.f32 %v5168_v19, %v5168_v19 }
0x12b0   :  { %v3109_v23 = vmul.f32 %v3093_v27, %v3093_v27 }
0x12b2   :  { %3098 = vadd.xlane.f32.xlu1 %v3093_v27  ;;  %3112 = vadd.xlane.f32.xlu0 %v3108_v2 }
0x12b6   :  { %3114 = vadd.xlane.f32.xlu1 %v3109_v23  ;;  %3116 = vadd.xlane.f32.xlu0 %v3110_v16 }
0x12ba   :  { %3118 = vadd.xlane.f32.xlu1 %v3111_v1 }
0x1333   :  { %v3101_v55 = vpop.xlane.xlu0 %3100 }
0x1334   :  { %v3106_v6 = vmul.f32 0.03125, %v3101_v55 }
0x1336   :  { %v3126_v26 = vmul.f32 %v3106_v6, %v3106_v6  ;;  %v3134_v58 = vsub.f32 %v5163_v49, %v3106_v6 }
0x1337   :  { %v3103_v43 = vpop.xlane.xlu1 %3102  ;;  %v3097_v20 = vpop.xlane.xlu0 %3096 }
0x1338   :  { %v3104_v14 = vmul.f32 0.03125, %v3097_v20  ;;  %v3107_v48 = vmul.f32 0.03125, %v3103_v43 }
0x133a   :  { %v3124_v13 = vmul.f32 %v3104_v14, %v3104_v14  ;;  %v3127_v17 = vmul.f32 %v3107_v48, %v3107_v48  ;;  %v3132_v57 = vsub.f32 %v3092_v54, %v3104_v14  ;;  %v3135_v50 = vsub.f32 %v5168_v19, %v3107_v48 }
0x133b   :  { %v3099_v8 = vpop.xlane.xlu1 %3098  ;;  %v3113_v34 = vpop.xlane.xlu0 %3112 }
0x133c   :  { %v3105_v32 = vmul.f32 0.03125, %v3099_v8  ;;  %v3120_v59 = vmul.f32 0.03125, %v3113_v34 }
0x133e   :  { %v3128_v21 = vsub.f32 %v3120_v59, %v3124_v13  ;;  %v3125_v38 = vmul.f32 %v3105_v32, %v3105_v32  ;;  %v3133_v63 = vsub.f32 %v3093_v27, %v3105_v32 }
0x133f   :  { %v3115_v52 = vpop.xlane.xlu1 %3114  ;;  %v3117_v60 = vpop.xlane.xlu0 %3116 }
0x1340   :  { %v3136_v47 = vadd.f32 1e-05, %v3128_v21  ;;  %v3121_v37 = vmul.f32 0.03125, %v3115_v52  ;;  %v3122_v10 = vmul.f32 0.03125, %v3117_v60 }
0x1342   :  { %4051 = vrsqrt.f32 %v3136_v47  ;;  %v3129_v41 = vsub.f32 %v3121_v37, %v3125_v38  ;;  %v3130_v4 = vsub.f32 %v3122_v10, %v3126_v26 }
0x1343   :  { %v3119_v12 = vpop.xlane.xlu1 %3118 }
0x1344   :  { %v3137_v25 = vadd.f32 1e-05, %v3129_v41  ;;  %v3138_v53 = vadd.f32 1e-05, %v3130_v4  ;;  %v3123_v44 = vmul.f32 0.03125, %v3119_v12 }
0x1346   :  { %4053 = vrsqrt.f32 %v3137_v25  ;;  %v3131_v9 = vsub.f32 %v3123_v44, %v3127_v17 }
0x1347   :  { %4055 = vrsqrt.f32 %v3138_v53 }
0x1348   :  { %v3139_v31 = vadd.f32 1e-05, %v3131_v9 }
0x134a   :  { %4057 = vrsqrt.f32 %v3139_v31 }
0x134f   :  { %v4052_v3 = vpop.eup %4051 }
0x1350   :  { %v3144_v5 = vmul.f32 %v4052_v3, %v3132_v57 }
0x1352   :  { %v3148_v62 = vmul.f32 %v4113_v33, %v3144_v5 }
0x1353   :  { %v4054_v39 = vpop.eup %4053 }
0x1354   :  { %v4056_v0 = vpop.eup %4055  ;;  %v3145_v15 = vmul.f32 %v4054_v39, %v3133_v63  ;;  %v3152_v11 = vadd.f32 %v4114_v61, %v3148_v62 }
0x1355   :  { %v3146_v18 = vmul.f32 %v4056_v0, %v3134_v58 }
0x1356   :  { %v3149_v42 = vmul.f32 %v4113_v33, %v3145_v15  ;;  %3156 = vst [vmem:[#allocation16] sm:$0xff] %v3152_v11 }
0x1357   :  { %v4058_v46 = vpop.eup %4057  ;;  %v3150_v24 = vmul.f32 %v4113_v33, %v3146_v18 }
0x1358   :  { %v3147_v7 = vmul.f32 %v4058_v46, %v3135_v50  ;;  %v3153_v36 = vadd.f32 %v4114_v61, %v3149_v42 }
0x1359   :  { %v3154_v28 = vadd.f32 %v4114_v61, %v3150_v24 }
0x135a   :  { %v3151_v22 = vmul.f32 %v4113_v33, %v3147_v7  ;;  %3157 = vst [vmem:[#allocation16 + $0x8] sm:$0xff] %v3153_v36 }
0x135b   :  { %3158 = vst [vmem:[#allocation16 + $0x10] sm:$0xff] %v3154_v28 }
0x135c   :  { %v3155_v40 = vadd.f32 %v4114_v61, %v3151_v22 }
0x135e   :  { %3159 = vst [vmem:[#allocation16 + $0x18] sm:$0xff] %v3155_v40 }
0x135f   :  { %4286 = shalt.err (!%p4283_p2)
}
0x1360   :  { %3171 = dma.vmem_to_hbm [thread:$0]  %s3166_s21, 512, %s5209_s19, [#allocation4], %s5223_s10, %s5223_s10, %s5222_s1  }
0x1361   :  { %4305 = dma.done.wait [#allocation4], 512  }
0x1362   :  { %4306 = vsyncadd [#allocation4], 4294966784 }
0x1363   :  { %3175 = vsyncpa [#allocation3], 1 }
0x1364   :  { %3176 = vsyncpa [#allocation6], 1 }
0x1365   :  { %3177 = vsyncpa [#allocation9], 1 }
0x1366   :  { %3178 = vsyncpa [#allocation12], 1 }
0x1367   :  { %3179 = vsyncpa [#allocation15], 1 }
0x1368   :  { %3180 = vsyncpa [#allocation4], 1 }

</bundles_post_ra>
